<compile_context>
chip_gen: v7x
topology: tpu7x:2x2x1
jax: 0.10.0
libtpu: 0.0.40
codegen_flags: <defaults>
</compile_context>

<pallas_src>
import functools

import jax
import jax.numpy as jnp
from jax.experimental import pallas as pl
from jax.experimental.pallas import tpu as pltpu

_MASK_VALUE = -1e30


def _divisor_tile(dim: int, target: int) -> int:
    """Largest 128-multiple <= target that divides dim (else dim itself)."""
    if dim <= target:
        return dim
    t = (target // 128) * 128
    while t >= 128:
        if dim % t == 0:
            return t
        t -= 128
    return dim


# ---------------------------------------------------------------------------
# Kernel 1: QKV projection   qkv_tile = x_tile @ W_tile
# ---------------------------------------------------------------------------
def _qkv_proj_kernel(x_ref, w_ref, o_ref):
    o_ref[...] = jnp.dot(
        x_ref[...], w_ref[...], preferred_element_type=jnp.float32
    ).astype(o_ref.dtype)


# ---------------------------------------------------------------------------
# Kernel 2: flash attention (online softmax over KV tiles, causal tile skip)
#           fused with the output projection accumulated over heads.
# ---------------------------------------------------------------------------
def _flash_attn_proj_kernel(q_ref, k_ref, v_ref, wp_ref, bp_ref, o_ref,
                            m_s, l_s, acc_s, acc_o,
                            *, scale, tq, tk, approx_recip):
    i = pl.program_id(1)          # query tile index
    h = pl.program_id(2)          # head index
    j = pl.program_id(3)          # kv tile index
    n_heads = pl.num_programs(2)
    n_kv = pl.num_programs(3)

    # Init fused-projection accumulator once per (batch, q-tile).
    @pl.when((h == 0) & (j == 0))
    def _():
        acc_o[...] = jnp.zeros_like(acc_o)

    # Init per-head online-softmax state at the start of each KV sweep.
    @pl.when(j == 0)
    def _():
        m_s[...] = jnp.full_like(m_s, _MASK_VALUE)
        l_s[...] = jnp.zeros_like(l_s)
        acc_s[...] = jnp.zeros_like(acc_s)

    # Causal tile skip: tile j has >=1 valid key iff j*tk <= i*tq + tq - 1.
    @pl.when(j * tk <= i * tq + (tq - 1))
    def _():
        q = q_ref[...]                                           # (tq, hd)
        k = k_ref[...]                                           # (tk, hd)
        v = v_ref[...]                                           # (tk, hd)
        s = jnp.dot(q, k.T, preferred_element_type=jnp.float32) * scale
        q_pos = i * tq + jax.lax.broadcasted_iota(jnp.int32, (tq, tk), 0)
        k_pos = j * tk + jax.lax.broadcasted_iota(jnp.int32, (tq, tk), 1)
        s = jnp.where(q_pos >= k_pos, s, _MASK_VALUE)

        m_prev = m_s[...]
        m_new = jnp.maximum(m_prev, s.max(axis=-1, keepdims=True))
        alpha = jnp.exp(m_prev - m_new)
        p = jnp.exp(s - m_new)
        l_s[...] = alpha * l_s[...] + p.sum(axis=-1, keepdims=True)
        acc_s[...] = alpha * acc_s[...] + jnp.dot(
            p.astype(v.dtype), v, preferred_element_type=jnp.float32)
        m_s[...] = m_new

    # Fold this head's normalized output into the projection accumulator.
    @pl.when(j == n_kv - 1)
    def _():
        attn = acc_s[...] * pl.reciprocal(l_s[...], approx=approx_recip)
        acc_o[...] += jnp.dot(attn.astype(wp_ref.dtype), wp_ref[...],
                              preferred_element_type=jnp.float32)

    # Final head + final kv tile: add bias and write the lane-dense output tile.
    @pl.when((h == n_heads - 1) & (j == n_kv - 1))
    def _():
        o_ref[...] = (acc_o[...] + bp_ref[...]).astype(o_ref.dtype)


# ---------------------------------------------------------------------------
# Wrapper
# ---------------------------------------------------------------------------
@functools.partial(
    jax.jit,
    static_argnames=("num_heads", "head_dims", "compute_dtype", "tq", "tn"))
def causal_attention_forward(x, w_qkv, w_proj, b_proj, *,
                             num_heads, head_dims,
                             compute_dtype=jnp.bfloat16, tq=128, tn=128):
    B, N, D = x.shape
    inner = num_heads * head_dims
    assert w_qkv.shape == (D, 3 * inner)
    assert w_proj.shape == (inner, D)
    assert b_proj.shape == (1, D)
    scale = head_dims ** (-0.5)

    tq = min(tq, N)
    tn = min(tn, N)
    assert N % tq == 0 and N % tn == 0, "sequence length must divide the tiles"
    tk = tq   # equal Q/KV tiles keep the causal-frontier bookkeeping simple

    # ---- 1) QKV projection (tiled Pallas matmul, bf16 MXU feed, f32 accum) ----
    xc = x.astype(compute_dtype)
    wq = w_qkv.astype(compute_dtype)
    three_inner = 3 * inner
    tc = _divisor_tile(three_inner, 512)

    qkv = pl.pallas_call(
        _qkv_proj_kernel,
        out_shape=jax.ShapeDtypeStruct((B, N, three_inner), compute_dtype),
        grid=(B, N // tn, three_inner // tc),
        in_specs=[
            pl.BlockSpec((None, tn, D), lambda b, i, c: (b, i, 0)),
            pl.BlockSpec((D, tc), lambda b, i, c: (0, c)),
        ],
        out_specs=pl.BlockSpec((None, tn, tc), lambda b, i, c: (b, i, c)),
        compiler_params=pltpu.CompilerParams(
            dimension_semantics=("parallel", "parallel", "parallel"),
            vmem_limit_bytes=32 * 1024 * 1024),
    )(xc, wq)

    # ---- layout plumbing (XLA): split heads -> (B, H, N, hd) ----
    q, k, v = jnp.split(qkv, 3, axis=-1)

    def to_heads(t):
        return t.reshape(B, N, num_heads, head_dims).transpose(0, 2, 1, 3)

    q, k, v = to_heads(q), to_heads(k), to_heads(v)

    wp = w_proj.astype(compute_dtype)
    bp = b_proj.astype(jnp.float32)

    kernel = functools.partial(
        _flash_attn_proj_kernel, scale=scale, tq=tq, tk=tk,
        approx_recip=(compute_dtype != jnp.float32))

    n_q = N // tq
    n_kv = N // tk

    # Clamp the kv index at the causal frontier so skipped tiles re-use the
    # previous block (Pallas then skips the redundant DMA).
    kv_index = lambda b, i, h, j: (b, h, jnp.minimum(j, i), 0)

    out = pl.pallas_call(
        kernel,
        out_shape=jax.ShapeDtypeStruct((B, N, D), x.dtype),
        grid=(B, n_q, num_heads, n_kv),
        in_specs=[
            pl.BlockSpec((None, None, tq, head_dims),
                         lambda b, i, h, j: (b, h, i, 0)),          # Q tile
            pl.BlockSpec((None, None, tk, head_dims), kv_index),    # K tile
            pl.BlockSpec((None, None, tk, head_dims), kv_index),    # V tile
            pl.BlockSpec((head_dims, D), lambda b, i, h, j: (h, 0)),# W_proj[h]
            pl.BlockSpec((1, D), lambda b, i, h, j: (0, 0)),        # b_proj
        ],
        out_specs=pl.BlockSpec((None, tq, D), lambda b, i, h, j: (b, i, 0)),
        scratch_shapes=[
            pltpu.VMEM((tq, 1), jnp.float32),          # running max
            pltpu.VMEM((tq, 1), jnp.float32),          # running denom
            pltpu.VMEM((tq, head_dims), jnp.float32),  # per-head accumulator
            pltpu.VMEM((tq, D), jnp.float32),          # fused-proj accumulator
        ],
        compiler_params=pltpu.CompilerParams(
            dimension_semantics=("parallel", "parallel", "arbitrary", "arbitrary"),
            vmem_limit_bytes=32 * 1024 * 1024),
    )(q, k, v, wp, bp)
    return out


# ---------------- pure-JAX reference (mirrors the PyTorch forward) ----------------
def causal_attention_reference(x, w_qkv, w_proj, b_proj, *, num_heads, head_dims):
    B, N, D = x.shape
    inner = num_heads * head_dims
    scale = head_dims ** (-0.5)
    qkv = x @ w_qkv
    q, k, v = jnp.split(qkv, 3, axis=-1)
    q = q.reshape(B, N, num_heads, head_dims).transpose(0, 2, 1, 3)
    k = k.reshape(B, N, num_heads, head_dims).transpose(0, 2, 1, 3)
    v = v.reshape(B, N, num_heads, head_dims).transpose(0, 2, 1, 3)
    s = jnp.einsum("bhqd,bhkd->bhqk", q, k) * scale
    mask = jnp.tril(jnp.ones((N, N), bool))
    s = jnp.where(mask, s, -jnp.inf)
    p = jax.nn.softmax(s, axis=-1)
    o = jnp.einsum("bhqk,bhkd->bhqd", p, v)
    o = o.transpose(0, 2, 1, 3).reshape(B, N, inner)
    return o @ w_proj + b_proj.reshape(1, 1, D)


if __name__ == "__main__":
    # Small but TPU-friendly config: head_dims = dims // num_heads = 128 keeps the
    # q.k^T contraction MXU-friendly; all lane dims are multiples of 128.
    B, N, D = 2, 256, 256
    H = 2
    Hd = D // H                      # head_dims=None default -> dims // num_heads

    key = jax.random.PRNGKey(0)
    k0, k1, k2, k3 = jax.random.split(key, 4)
    x      = jax.random.normal(k0, (B, N, D), jnp.float32)
    w_qkv  = jax.random.normal(k1, (D, 3 * H * Hd), jnp.float32) * 0.02  # qkv_bias=False
    w_proj = jax.random.normal(k2, (H * Hd, D), jnp.float32) * 0.02
    b_proj = jax.random.normal(k3, (1, D), jnp.float32) * 0.02

    ref = causal_attention_reference(x, w_qkv, w_proj, b_proj,
                                     num_heads=H, head_dims=Hd)

    # f32 MXU operands: tight check against the reference.
    out_f32 = causal_attention_forward(x, w_qkv, w_proj, b_proj,
                                       num_heads=H, head_dims=Hd,
                                       compute_dtype=jnp.float32)
    out_f32 = jax.block_until_ready(out_f32)
    assert out_f32.shape == (B, N, D)
    assert jnp.allclose(out_f32, ref, atol=1e-4, rtol=1e-4), "f32 mismatch vs reference"

    # bf16 MXU operands (f32 softmax stats / accumulators): loose check.
    out_bf16 = causal_attention_forward(x, w_qkv, w_proj, b_proj,
                                        num_heads=H, head_dims=Hd,
                                        compute_dtype=jnp.bfloat16)
    out_bf16 = jax.block_until_ready(out_bf16)
    assert out_bf16.shape == (B, N, D)
    assert jnp.allclose(out_bf16, ref, atol=3e-2, rtol=3e-2), "bf16 mismatch vs reference"

    print("KERNEL_OK")
</pallas_src>

<mosaic_0001>
module attributes {stable_mosaic.version = 11 : i64} {
  func.func @_qkv_proj_kernel(%arg0: i32, %arg1: i32, %arg2: i32, %arg3: memref<1x128x256xf32, #tpu.memory_space<vmem>>, %arg4: memref<256x384xf32, #tpu.memory_space<vmem>>, %arg5: memref<1x128x384xf32, #tpu.memory_space<vmem>>) attributes {dimension_semantics = [#tpu.dimension_semantics<parallel>, #tpu.dimension_semantics<parallel>, #tpu.dimension_semantics<parallel>], iteration_bounds = array<i64: 2, 2, 2>, scalar_prefetch = 0 : i64, scratch_operands = 0 : i64, tpu.core_type = #tpu.core_type<tc>, window_params = [{transform_indices = @transform_0, window_bounds = array<i64: 1, 128, 256>}, {transform_indices = @transform_1, window_bounds = array<i64: 256, 384>}, {transform_indices = @transform_2, window_bounds = array<i64: 1, 128, 384>}]} {
    %c0 = arith.constant 0 : index
    %c0_0 = arith.constant 0 : index
    %c0_1 = arith.constant 0 : index
    %0 = vector.load %arg3[%c0, %c0_0, %c0_1] : memref<1x128x256xf32, #tpu.memory_space<vmem>>, vector<1x128x256xf32>
    %1 = vector.shape_cast %0 : vector<1x128x256xf32> to vector<128x256xf32>
    %c0_2 = arith.constant 0 : index
    %c0_3 = arith.constant 0 : index
    %2 = vector.load %arg4[%c0_2, %c0_3] : memref<256x384xf32, #tpu.memory_space<vmem>>, vector<256x384xf32>
    %cst = arith.constant dense<0.000000e+00> : vector<128x384xf32>
    %3 = tpu.matmul %1, %2, %cst {dimension_numbers = #tpu.dot_dimension_numbers<[1], [0], [0], [1], [0, 0, 1, 1], [], []>} : vector<128x256xf32>, vector<256x384xf32>, vector<128x384xf32> -> vector<128x384xf32>
    %c0_4 = arith.constant 0 : index
    %c0_5 = arith.constant 0 : index
    %c0_6 = arith.constant 0 : index
    %4 = vector.load %arg5[%c0_4, %c0_5, %c0_6] : memref<1x128x384xf32, #tpu.memory_space<vmem>>, vector<1x128x384xf32>
    %5 = vector.shape_cast %4 : vector<1x128x384xf32> to vector<128x384xf32>
    %6 = vector.shape_cast %3 : vector<128x384xf32> to vector<1x128x384xf32>
    tpu.vector_store %arg5[%c0_4, %c0_5, %c0_6], %6 {strides = array<i32>} : memref<1x128x384xf32, #tpu.memory_space<vmem>>, vector<1x128x384xf32>,
    return
  }
  func.func @transform_0(%arg0: i32, %arg1: i32, %arg2: i32) -> (i32, i32, i32) {
    %c0_i32 = arith.constant 0 : i32
    %c0_i32_0 = arith.constant 0 : i32
    return %arg0, %arg1, %c0_i32 : i32, i32, i32
  }
  func.func @transform_1(%arg0: i32, %arg1: i32, %arg2: i32) -> (i32, i32) {
    %c0_i32 = arith.constant 0 : i32
    %c0_i32_0 = arith.constant 0 : i32
    return %c0_i32, %arg2 : i32, i32
  }
  func.func @transform_2(%arg0: i32, %arg1: i32, %arg2: i32) -> (i32, i32, i32) {
    %c0_i32 = arith.constant 0 : i32
    return %arg0, %arg1, %arg2 : i32, i32, i32
  }
}

module attributes {stable_mosaic.version = 11 : i64} {
  func.func @_flash_attn_proj_kernel(%arg0: i32, %arg1: i32, %arg2: i32, %arg3: i32, %arg4: memref<1x1x128x128xf32, #tpu.memory_space<vmem>>, %arg5: memref<1x1x128x128xf32, #tpu.memory_space<vmem>>, %arg6: memref<1x1x128x128xf32, #tpu.memory_space<vmem>>, %arg7: memref<128x256xf32, #tpu.memory_space<vmem>>, %arg8: memref<1x256xf32, #tpu.memory_space<vmem>>, %arg9: memref<1x128x256xf32, #tpu.memory_space<vmem>>, %arg10: memref<128x1xf32, #tpu.memory_space<vmem>>, %arg11: memref<128x1xf32, #tpu.memory_space<vmem>>, %arg12: memref<128x128xf32, #tpu.memory_space<vmem>>, %arg13: memref<128x256xf32, #tpu.memory_space<vmem>>) attributes {dimension_semantics = [#tpu.dimension_semantics<parallel>, #tpu.dimension_semantics<parallel>, #tpu.dimension_semantics<arbitrary>, #tpu.dimension_semantics<arbitrary>], iteration_bounds = array<i64: 2, 2, 2, 2>, scalar_prefetch = 0 : i64, scratch_operands = 4 : i64, tpu.core_type = #tpu.core_type<tc>, window_params = [{transform_indices = @transform_0, window_bounds = array<i64: 1, 1, 128, 128>}, {transform_indices = @transform_1, window_bounds = array<i64: 1, 1, 128, 128>}, {transform_indices = @transform_2, window_bounds = array<i64: 1, 1, 128, 128>}, {transform_indices = @transform_3, window_bounds = array<i64: 128, 256>}, {pipeline_mode = #tpu.pipeline_mode<synchronous>, transform_indices = @transform_4, window_bounds = array<i64: 1, 256>}, {transform_indices = @transform_5, window_bounds = array<i64: 1, 128, 256>}]} {
    %c0_i32 = arith.constant 0 : i32
    %0 = arith.cmpi eq, %arg2, %c0_i32 : i32
    %c0_i32_0 = arith.constant 0 : i32
    %1 = arith.cmpi eq, %arg3, %c0_i32_0 : i32
    %2 = arith.andi %0, %1 : i1
    %3 = arith.extui %2 : i1 to i32
    %c0_i32_1 = arith.constant 0 : i32
    %4 = arith.cmpi ne, %3, %c0_i32_1 : i32
    scf.if %4 {
      %cst = arith.constant 0.000000e+00 : f32
      %22 = vector.broadcast %cst : f32 to vector<128x256xf32>
      %c0 = arith.constant 0 : index
      %c0_10 = arith.constant 0 : index
      %23 = vector.load %arg13[%c0, %c0_10] : memref<128x256xf32, #tpu.memory_space<vmem>>, vector<128x256xf32>
      tpu.vector_store %arg13[%c0, %c0_10], %22 {strides = array<i32>} : memref<128x256xf32, #tpu.memory_space<vmem>>, vector<128x256xf32>,
    } else {
    }
    %c0_i32_2 = arith.constant 0 : i32
    %5 = arith.cmpi eq, %arg3, %c0_i32_2 : i32
    %6 = arith.extui %5 : i1 to i32
    %c0_i32_3 = arith.constant 0 : i32
    %7 = arith.cmpi ne, %6, %c0_i32_3 : i32
    scf.if %7 {
      %cst = arith.constant -1.000000e+30 : f32
      %22 = vector.broadcast %cst : f32 to vector<128x1xf32>
      %c0 = arith.constant 0 : index
      %c0_10 = arith.constant 0 : index
      %23 = vector.load %arg10[%c0, %c0_10] : memref<128x1xf32, #tpu.memory_space<vmem>>, vector<128x1xf32>
      tpu.vector_store %arg10[%c0, %c0_10], %22 {strides = array<i32>} : memref<128x1xf32, #tpu.memory_space<vmem>>, vector<128x1xf32>,
      %cst_11 = arith.constant 0.000000e+00 : f32
      %24 = vector.broadcast %cst_11 : f32 to vector<128x1xf32>
      %c0_12 = arith.constant 0 : index
      %c0_13 = arith.constant 0 : index
      %25 = vector.load %arg11[%c0_12, %c0_13] : memref<128x1xf32, #tpu.memory_space<vmem>>, vector<128x1xf32>
      tpu.vector_store %arg11[%c0_12, %c0_13], %24 {strides = array<i32>} : memref<128x1xf32, #tpu.memory_space<vmem>>, vector<128x1xf32>,
      %cst_14 = arith.constant 0.000000e+00 : f32
      %26 = vector.broadcast %cst_14 : f32 to vector<128x128xf32>
      %c0_15 = arith.constant 0 : index
      %c0_16 = arith.constant 0 : index
      %27 = vector.load %arg12[%c0_15, %c0_16] : memref<128x128xf32, #tpu.memory_space<vmem>>, vector<128x128xf32>
      tpu.vector_store %arg12[%c0_15, %c0_16], %26 {strides = array<i32>} : memref<128x128xf32, #tpu.memory_space<vmem>>, vector<128x128xf32>,
    } else {
    }
    %c128_i32 = arith.constant 128 : i32
    %8 = arith.muli %arg3, %c128_i32 : i32
    %c128_i32_4 = arith.constant 128 : i32
    %9 = arith.muli %arg1, %c128_i32_4 : i32
    %c127_i32 = arith.constant 127 : i32
    %10 = arith.addi %9, %c127_i32 : i32
    %11 = arith.cmpi sle, %8, %10 : i32
    %12 = arith.extui %11 : i1 to i32
    %c0_i32_5 = arith.constant 0 : i32
    %13 = arith.cmpi ne, %12, %c0_i32_5 : i32
    scf.if %13 {
      %c0 = arith.constant 0 : index
      %c0_10 = arith.constant 0 : index
      %c0_11 = arith.constant 0 : index
      %c0_12 = arith.constant 0 : index
      %22 = vector.load %arg4[%c0, %c0_10, %c0_11, %c0_12] : memref<1x1x128x128xf32, #tpu.memory_space<vmem>>, vector<1x1x128x128xf32>
      %23 = vector.shape_cast %22 : vector<1x1x128x128xf32> to vector<128x128xf32>
      %c0_13 = arith.constant 0 : index
      %c0_14 = arith.constant 0 : index
      %c0_15 = arith.constant 0 : index
      %c0_16 = arith.constant 0 : index
      %24 = vector.load %arg5[%c0_13, %c0_14, %c0_15, %c0_16] : memref<1x1x128x128xf32, #tpu.memory_space<vmem>>, vector<1x1x128x128xf32>
      %25 = vector.shape_cast %24 : vector<1x1x128x128xf32> to vector<128x128xf32>
      %c0_17 = arith.constant 0 : index
      %c0_18 = arith.constant 0 : index
      %c0_19 = arith.constant 0 : index
      %c0_20 = arith.constant 0 : index
      %26 = vector.load %arg6[%c0_17, %c0_18, %c0_19, %c0_20] : memref<1x1x128x128xf32, #tpu.memory_space<vmem>>, vector<1x1x128x128xf32>
      %27 = vector.shape_cast %26 : vector<1x1x128x128xf32> to vector<128x128xf32>
      %28 = tpu.transpose %25, [1, 0] : vector<128x128xf32> -> vector<128x128xf32>
      %cst = arith.constant dense<0.000000e+00> : vector<128x128xf32>
      %29 = tpu.matmul %23, %28, %cst {dimension_numbers = #tpu.dot_dimension_numbers<[1], [0], [0], [1], [0, 0, 1, 1], [], []>} : vector<128x128xf32>, vector<128x128xf32>, vector<128x128xf32> -> vector<128x128xf32>
      %cst_21 = arith.constant 0.0883883461 : f32
      %30 = vector.broadcast %cst_21 : f32 to vector<128x128xf32>
      %31 = arith.mulf %29, %30 : vector<128x128xf32>
      %c128_i32_22 = arith.constant 128 : i32
      %32 = arith.muli %arg1, %c128_i32_22 : i32
      %33 = tpu.iota {dimensions = array<i32: 0>} : vector<128x128xi32>
      %34 = vector.broadcast %32 : i32 to vector<128x128xi32>
      %35 = arith.addi %34, %33 : vector<128x128xi32>
      %c128_i32_23 = arith.constant 128 : i32
      %36 = arith.muli %arg3, %c128_i32_23 : i32
      %37 = tpu.iota {dimensions = array<i32: 1>} : vector<128x128xi32>
      %38 = vector.broadcast %36 : i32 to vector<128x128xi32>
      %39 = arith.addi %38, %37 : vector<128x128xi32>
      %40 = arith.cmpi sge, %35, %39 : vector<128x128xi32>
      %cst_24 = arith.constant -1.000000e+30 : f32
      %41 = vector.broadcast %cst_24 : f32 to vector<128x128xf32>
      %42 = arith.select %40, %31, %41 : vector<128x128xi1>, vector<128x128xf32>
      %c0_25 = arith.constant 0 : index
      %c0_26 = arith.constant 0 : index
      %43 = vector.load %arg10[%c0_25, %c0_26] : memref<128x1xf32, #tpu.memory_space<vmem>>, vector<128x1xf32>
      %cst_27 = arith.constant dense<0xFF800000> : vector<128xf32>
      %44 = vector.multi_reduction <maximumf>, %42, %cst_27 [1] : vector<128x128xf32> to vector<128xf32>
      %45 = vector.shape_cast %44 : vector<128xf32> to vector<128x1xf32>
      %46 = arith.maximumf %43, %45 : vector<128x1xf32>
      %47 = arith.subf %43, %46 : vector<128x1xf32>
      %48 = math.exp %47 : vector<128x1xf32>
      %49 = vector.broadcast %46 : vector<128x1xf32> to vector<128x128xf32>
      %50 = arith.subf %42, %49 : vector<128x128xf32>
      %51 = math.exp %50 : vector<128x128xf32>
      %c0_28 = arith.constant 0 : index
      %c0_29 = arith.constant 0 : index
      %52 = vector.load %arg11[%c0_28, %c0_29] : memref<128x1xf32, #tpu.memory_space<vmem>>, vector<128x1xf32>
      %53 = arith.mulf %48, %52 : vector<128x1xf32>
      %cst_30 = arith.constant dense<0.000000e+00> : vector<128xf32>
      %54 = vector.multi_reduction <add>, %51, %cst_30 [1] : vector<128x128xf32> to vector<128xf32>
      %55 = vector.shape_cast %54 : vector<128xf32> to vector<128x1xf32>
      %56 = arith.addf %53, %55 : vector<128x1xf32>
      %c0_31 = arith.constant 0 : index
      %c0_32 = arith.constant 0 : index
      %57 = vector.load %arg11[%c0_31, %c0_32] : memref<128x1xf32, #tpu.memory_space<vmem>>, vector<128x1xf32>
      tpu.vector_store %arg11[%c0_31, %c0_32], %56 {strides = array<i32>} : memref<128x1xf32, #tpu.memory_space<vmem>>, vector<128x1xf32>,
      %c0_33 = arith.constant 0 : index
      %c0_34 = arith.constant 0 : index
      %58 = vector.load %arg12[%c0_33, %c0_34] : memref<128x128xf32, #tpu.memory_space<vmem>>, vector<128x128xf32>
      %59 = vector.broadcast %48 : vector<128x1xf32> to vector<128x128xf32>
      %60 = arith.mulf %59, %58 : vector<128x128xf32>
      %cst_35 = arith.constant dense<0.000000e+00> : vector<128x128xf32>
      %61 = tpu.matmul %51, %27, %cst_35 {dimension_numbers = #tpu.dot_dimension_numbers<[1], [0], [0], [1], [0, 0, 1, 1], [], []>} : vector<128x128xf32>, vector<128x128xf32>, vector<128x128xf32> -> vector<128x128xf32>
      %62 = arith.addf %60, %61 : vector<128x128xf32>
      %c0_36 = arith.constant 0 : index
      %c0_37 = arith.constant 0 : index
      %63 = vector.load %arg12[%c0_36, %c0_37] : memref<128x128xf32, #tpu.memory_space<vmem>>, vector<128x128xf32>
      tpu.vector_store %arg12[%c0_36, %c0_37], %62 {strides = array<i32>} : memref<128x128xf32, #tpu.memory_space<vmem>>, vector<128x128xf32>,
      %c0_38 = arith.constant 0 : index
      %c0_39 = arith.constant 0 : index
      %64 = vector.load %arg10[%c0_38, %c0_39] : memref<128x1xf32, #tpu.memory_space<vmem>>, vector<128x1xf32>
      tpu.vector_store %arg10[%c0_38, %c0_39], %46 {strides = array<i32>} : memref<128x1xf32, #tpu.memory_space<vmem>>, vector<128x1xf32>,
    } else {
    }
    %c1_i32 = arith.constant 1 : i32
    %14 = arith.cmpi eq, %arg3, %c1_i32 : i32
    %15 = arith.extui %14 : i1 to i32
    %c0_i32_6 = arith.constant 0 : i32
    %16 = arith.cmpi ne, %15, %c0_i32_6 : i32
    scf.if %16 {
      %c0 = arith.constant 0 : index
      %c0_10 = arith.constant 0 : index
      %22 = vector.load %arg12[%c0, %c0_10] : memref<128x128xf32, #tpu.memory_space<vmem>>, vector<128x128xf32>
      %c0_11 = arith.constant 0 : index
      %c0_12 = arith.constant 0 : index
      %23 = vector.load %arg11[%c0_11, %c0_12] : memref<128x1xf32, #tpu.memory_space<vmem>>, vector<128x1xf32>
      %24 = tpu.reciprocal %23 : vector<128x1xf32> -> vector<128x1xf32>
      %25 = vector.broadcast %24 : vector<128x1xf32> to vector<128x128xf32>
      %26 = arith.mulf %22, %25 : vector<128x128xf32>
      %c0_13 = arith.constant 0 : index
      %c0_14 = arith.constant 0 : index
      %27 = vector.load %arg13[%c0_13, %c0_14] : memref<128x256xf32, #tpu.memory_space<vmem>>, vector<128x256xf32>
      %c0_15 = arith.constant 0 : index
      %c0_16 = arith.constant 0 : index
      %28 = vector.load %arg7[%c0_15, %c0_16] : memref<128x256xf32, #tpu.memory_space<vmem>>, vector<128x256xf32>
      %cst = arith.constant dense<0.000000e+00> : vector<128x256xf32>
      %29 = tpu.matmul %26, %28, %cst {dimension_numbers = #tpu.dot_dimension_numbers<[1], [0], [0], [1], [0, 0, 1, 1], [], []>} : vector<128x128xf32>, vector<128x256xf32>, vector<128x256xf32> -> vector<128x256xf32>
      %30 = arith.addf %27, %29 : vector<128x256xf32>
      %c0_17 = arith.constant 0 : index
      %c0_18 = arith.constant 0 : index
      %31 = vector.load %arg13[%c0_17, %c0_18] : memref<128x256xf32, #tpu.memory_space<vmem>>, vector<128x256xf32>
      tpu.vector_store %arg13[%c0_17, %c0_18], %30 {strides = array<i32>} : memref<128x256xf32, #tpu.memory_space<vmem>>, vector<128x256xf32>,
    } else {
    }
    %c1_i32_7 = arith.constant 1 : i32
    %17 = arith.cmpi eq, %arg2, %c1_i32_7 : i32
    %c1_i32_8 = arith.constant 1 : i32
    %18 = arith.cmpi eq, %arg3, %c1_i32_8 : i32
    %19 = arith.andi %17, %18 : i1
    %20 = arith.extui %19 : i1 to i32
    %c0_i32_9 = arith.constant 0 : i32
    %21 = arith.cmpi ne, %20, %c0_i32_9 : i32
    scf.if %21 {
      %c0 = arith.constant 0 : index
      %c0_10 = arith.constant 0 : index
      %22 = vector.load %arg13[%c0, %c0_10] : memref<128x256xf32, #tpu.memory_space<vmem>>, vector<128x256xf32>
      %c0_11 = arith.constant 0 : index
      %c0_12 = arith.constant 0 : index
      %23 = vector.load %arg8[%c0_11, %c0_12] : memref<1x256xf32, #tpu.memory_space<vmem>>, vector<1x256xf32>
      %24 = vector.broadcast %23 : vector<1x256xf32> to vector<128x256xf32>
      %25 = arith.addf %22, %24 : vector<128x256xf32>
      %c0_13 = arith.constant 0 : index
      %c0_14 = arith.constant 0 : index
      %c0_15 = arith.constant 0 : index
      %26 = vector.load %arg9[%c0_13, %c0_14, %c0_15] : memref<1x128x256xf32, #tpu.memory_space<vmem>>, vector<1x128x256xf32>
      %27 = vector.shape_cast %26 : vector<1x128x256xf32> to vector<128x256xf32>
      %28 = vector.shape_cast %25 : vector<128x256xf32> to vector<1x128x256xf32>
      tpu.vector_store %arg9[%c0_13, %c0_14, %c0_15], %28 {strides = array<i32>} : memref<1x128x256xf32, #tpu.memory_space<vmem>>, vector<1x128x256xf32>,
    } else {
    }
    return
  }
  func.func @transform_0(%arg0: i32, %arg1: i32, %arg2: i32, %arg3: i32) -> (i32, i32, i32, i32) {
    %c0_i32 = arith.constant 0 : i32
    %c0_i32_0 = arith.constant 0 : i32
    return %arg0, %arg2, %arg1, %c0_i32 : i32, i32, i32, i32
  }
  func.func @transform_1(%arg0: i32, %arg1: i32, %arg2: i32, %arg3: i32) -> (i32, i32, i32, i32) {
    %0 = arith.minsi %arg3, %arg1 : i32
    %c0_i32 = arith.constant 0 : i32
    %c0_i32_0 = arith.constant 0 : i32
    return %arg0, %arg2, %0, %c0_i32 : i32, i32, i32, i32
  }
  func.func @transform_2(%arg0: i32, %arg1: i32, %arg2: i32, %arg3: i32) -> (i32, i32, i32, i32) {
    %0 = arith.minsi %arg3, %arg1 : i32
    %c0_i32 = arith.constant 0 : i32
    %c0_i32_0 = arith.constant 0 : i32
    return %arg0, %arg2, %0, %c0_i32 : i32, i32, i32, i32
  }
  func.func @transform_3(%arg0: i32, %arg1: i32, %arg2: i32, %arg3: i32) -> (i32, i32) {
    %c0_i32 = arith.constant 0 : i32
    %c0_i32_0 = arith.constant 0 : i32
    return %arg2, %c0_i32 : i32, i32
  }
  func.func @transform_4(%arg0: i32, %arg1: i32, %arg2: i32, %arg3: i32) -> (i32, i32) {
    %c0_i32 = arith.constant 0 : i32
    %c0_i32_0 = arith.constant 0 : i32
    %c0_i32_1 = arith.constant 0 : i32
    return %c0_i32, %c0_i32_0 : i32, i32
  }
  func.func @transform_5(%arg0: i32, %arg1: i32, %arg2: i32, %arg3: i32) -> (i32, i32, i32) {
    %c0_i32 = arith.constant 0 : i32
    %c0_i32_0 = arith.constant 0 : i32
    return %arg0, %arg1, %c0_i32 : i32, i32, i32
  }
}

</mosaic_0001>

<bundles_post_ra>
// kernel: causal_attention_forward.2
= control target key start
LH: loop header
LB: loop body
LE: loop exit
PB: predicated region body
PF: predicated region fallthrough
CT: control target
= control target key end

     0   :  { %s2102_s0 = inlined_call_operand.hbm [shape: f32[2,256,256], index: 0, kind: input, shape index: {}]   ;;  %s2103_s1 = inlined_call_operand.hbm [shape: f32[256,768], index: 1, kind: input, shape index: {}]   ;;  %s2104_s2 = inlined_call_operand.vmem [shape: f32[2,256,768], index: 2, kind: output, shape index: {}]  }
   0x1   :  { %2114 = sst [smem:[#allocation17_spill]] %s2102_s0 }
   0x2   :  { %2115 = sst [smem:[#allocation18_spill]] %s2104_s2 }
   0x3   :  { %7 = vsyncpa [#allocation3], 0 }
   0x4   :  { %9 = vsyncpa [#allocation3 + $0x1], 0 }
   0x5   :  { %10 = vsyncpa [#allocation5], 0 }
   0x6   :  { %12 = vsyncpa [#allocation5 + $0x1], 0  ;;  %s1495_s9 = smov 0   ;;  %s1497_s10 = smov 0  }
   0x7   :  { %s1499_s11 = smov 0   ;;  %s1501_s12 = smov 0  }
   0x8   :  { %s1503_s13 = smov 0   ;;  %s1505_s14 = smov 0  }
   0x9   :  { %s1507_s15 = smov 0   ;;  %s1509_s16 = smov 0  }
   0xa   :  { %s1511_s17 = smov 0   ;;  %s1513_s18 = smov 0  }
   0xb   :  { %s1515_s19 = smov 0   ;;  %s1517_s20 = smov 0  }
   0xc   :  { %s1519_s21 = smov 0   ;;  %s1521_s22 = smov 0  }
   0xd   :  { %s1523_s23 = smov 0  }
   0xe LB: > { %2116 = sst [smem:[#allocation9_spill]] %s1431_s13  ;;  %s948_s24 = sadd.s32 4294967295, %s1471_s23   ;;  %s1471_s23 = sphi %s1523_s23, %s18_s23   ;;  %s1467_s22 = sphi %s1521_s22, %s2165_s22   ;;  %s1463_s21 = sphi %s1519_s21, %s2152_s21   ;;  %s1459_s20 = sphi %s1517_s20, %s2164_s20   ;;  %s1455_s19 = sphi %s1515_s19, %s2163_s19   ;;  %s1451_s18 = sphi %s1513_s18, %s2150_s18   ;;  %s1447_s17 = sphi %s1511_s17, %s2162_s17   ;;  %s1443_s16 = sphi %s1509_s16, %s2161_s16   ;;  %s1439_s15 = sphi %s1507_s15, %s2160_s15   ;;  %s1435_s14 = sphi %s1505_s14, %s2159_s14   ;;  %s1431_s13 = sphi %s1503_s13, %s2149_s13   ;;  %s1427_s12 = sphi %s1501_s12, %s2158_s12   ;;  %s1423_s11 = sphi %s1499_s11, %s2157_s11   ;;  %s1419_s10 = sphi %s1497_s10, %s2156_s10   ;;  %s1415_s9 = sphi %s1495_s9, %s2155_s9  }
   0xf   : > { %2117 = sst [smem:[#allocation10_spill]] %s1451_s18  ;;  %p53_p0 = scmp.ne.s32.totalorder %s1443_s16, %s1439_s15 }
  0x10   : > { %2118 = sst [smem:[#allocation11_spill]] %s1455_s19  ;;  %p2106_p1 = scmp.eq.s32.totalorder %s1471_s23, 0 }
  0x11   : > { %2119 = sst [smem:[#allocation12_spill]] %s1463_s21  ;;  %p59_p2 = scmp.ne.s32.totalorder %s1439_s15, %s1435_s14 }
  0x12   : > { %p1576_p3 = scmp.eq.s32.totalorder %s948_s24, 0  ;;  %p1582_p4 = por %p2106_p1, %p53_p0 }
  0x13   : > { %p1586_p5 = scmp.eq.s32.totalorder %s948_s24, 7  ;;  %p2105_p7 = scmp.lt.s32.totalorder %s1471_s23, 8 }
  0x14   : > { %p1592_p6 = por %p1576_p3, %p59_p2  ;;  %s139_s4 = sand.u32 1, %s1443_s16  }
  0x15   : > { %s2122_s30 = scalar_select %p1586_p5, 1, 0 }
  0x16   : > { %s2123_s3 = scalar_select %p1592_p6, 1, 0 }
  0x17   : > { %s952_s5 = sshll.u32 %s139_s4, 8  ;;  %s965_s6 = sshll.u32 %s1463_s21, 5 }
  0x18   : > { %s955_s7 = sshll.u32 %s1467_s22, 6  ;;  %s143_s8 = scalar_lea.vmem [#allocation2], %s952_s5 }
  0x19   : > { %s153_s14 = sshll.u32 %s143_s8, 4  ;;  %s150_s27 = sadd.s32 %s965_s6, %s955_s7  ;;  %s1600_s14 = int_to_ptr.vmem [resolvable:$true] %s153_s14 }
  0x1a   : > { %s956_s26 = sshll.u32 %s150_s27, 7  ;;  %p1606_p8 = pnand %p2105_p7, %p1582_p4 }
  0x1b   : > { %s2125_s0 = sld [smem:[#allocation17_spill]]  ;;  %s1615_s5 = scalar_lea.sflag [#allocation3], %s139_s4 }
  0x1c   : > { %p1287_p10 = pneg %p1606_p8 }
  0x21   : > { %s1613_s19 = scalar_lea.hbm %s2125_s0, %s956_s26  ;;  %s1290_s25 = scalar_lea.hbm %s2125_s0, 16384 }
  0x22   : > { %s1285_s27 = scalar_lea.hbm %s1613_s19, 4096  ;;  %p1291_p13 = scmp.lt.u32.totalorder %s1613_s19, %s2125_s0 }
  0x23   : > { %p1286_p9 = scmp.ne.s32.totalorder %s1613_s19, %s1285_s27  ;;  %p1292_p0 = scmp.lt.u32.totalorder %s1290_s25, %s1285_s27 }
  0x24   : > { %p1294_p4 = scmp.lt.u32.totalorder %s1285_s27, %s1613_s19 }
  0x25   : > { %p1288_p11 = pnand %p1287_p10, %p1286_p9  ;;  %p1293_p2 = por %p1292_p0, %p1291_p13 }
  0x27   : > { %p1289_p12 = pneg %p1288_p11  ;;  %p1295_p7 = por %p1294_p4, %p1293_p2 }
  0x29   : > { %p1296_p1 = pnand %p1295_p7, %p1289_p12 }
  0x2b   : > { %1299 = shalt.err (!%p1296_p1)
}
  0x2c   : > { %s1300_s4 = scalar_lea.vmem %s1600_s14, 4096  ;;  %s1473_s7 = smov [#allocation2]  }
  0x2d   : > { %p1301_p9 = scmp.ne.s32.totalorder %s1600_s14, %s1300_s4  ;;  %s1305_s8 = sshll.u32 %s1473_s7, 4  ;;  %s1306_s8 = int_to_ptr.vmem [resolvable:$false] %s1305_s8 }
  0x2e   : > { %s1307_s29 = scalar_lea.vmem %s1306_s8, 8192  ;;  %p1308_p5 = scmp.lt.s32.totalorder %s1600_s14, %s1306_s8 }
  0x2f   : > { %p1303_p11 = pnand %p1301_p9, %p1287_p10  ;;  %p1309_p13 = scmp.lt.s32.totalorder %s1307_s29, %s1300_s4 }
  0x31   : > { %p1304_p6 = pneg %p1303_p11  ;;  %p1310_p0 = por %p1309_p13, %p1308_p5 }
  0x33   : > { %p1311_p2 = pnand %p1310_p0, %p1304_p6 }
  0x35   : > { %1314 = shalt.err (!%p1311_p2)
}
  0x36   : > { %s1474_s27 = smov 256   ;;  %s1475_s2 = smov 16  }
  0x37   : > { %1155 = dma.hbm_to_vmem [thread:$0]  (!%p1606_p8), %s1613_s19, 4096, %s1600_s14, %s1615_s5, %s1474_s27, %s1474_s27, %s1475_s2  }
  0x38   : > { %p958_p1 = scmp.ge.s32.totalorder %s1471_s23, 1  ;;  %p182_p5 = scmp.lt.s32.totalorder %s1471_s23, 9 }
  0x39   : > { %s30_s26 = sadd.s32 1, %s1459_s20  ;;  %s72_s6 = sadd.s32 1, %s1431_s13 }
  0x3a   : > { %p1645_p6 = pnand %p958_p1, %p182_p5  ;;  %p31_p7 = scmp.ge.s32.totalorder %s30_s26, 2 }
  0x3b   : > { %p79_p10 = scmp.ne.s32.totalorder %s1431_s13, %s1427_s12  ;;  %p85_p12 = scmp.ne.s32.totalorder %s1427_s12, %s1423_s11 }
  0x3c   : > { %s2167_s26 = smov (%p31_p7, %s30_s26), 0  ;;  %s2128_s19 = sadd.s32 1, %s1463_s21 }
  0x3d   : > { %2127 = sst [smem:[#allocation13_spill]] %s2167_s26  ;;  %s2169_s19 = smov (!%p31_p7, %s2128_s19), %s1463_s21 }
  0x3e   : > { %s69_s14 = ssub.s32 %s1459_s20, %s2167_s26  ;;  %p2129_p8 = scmp.eq.s32.totalorder %s1471_s23, 0 }
  0x3f   : > { %p35_p9 = scmp.ge.s32.totalorder %s2169_s19, 2  ;;  %p70_p11 = scmp.eq.s32.totalorder %s69_s14, 0 }
  0x40   : > { %p1664_p4 = por %p79_p10, %p2129_p8  ;;  %p1670_p13 = por %p85_p12, %p1576_p3 }
  0x41   : > { %s102_s11 = sadd.s32 1, %s1419_s10  ;;  %s2171_s19 = smov (%p35_p9, %s2169_s19), 0 }
  0x42   : > { %s2131_s5 = scalar_select %p1670_p13, 1, 0 }
  0x43   : > { %2132 = sst [smem:[#allocation14_spill]] %s2171_s19  ;;  %s2133_s4 = sadd.s32 1, %s1467_s22 }
  0x44   : > { %s2173_s4 = smov (!%p35_p9, %s2133_s4), %s1467_s22  ;;  %s42_s7 = ssub.s32 %s1463_s21, %s2171_s19 }
  0x45   : > { %p112_p0 = scmp.ne.s32.totalorder %s1419_s10, %s1415_s9  ;;  %p39_p2 = scmp.ge.s32.totalorder %s2173_s4, 2 }
  0x46   : > { %s163_s8 = sand.u32 1, %s1431_s13   ;;  %p2136_p3 = scmp.ne.s32.totalorder %s2122_s30, 0 }
  0x47   : > { %s1686_s29 = scalar_select %p70_p11, %s1431_s13, %s72_s6  }
  0x48   : > { %s2175_s4 = smov (%p39_p2, %s2173_s4), 0  ;;  %p1692_p1 = por %p2136_p3, %p112_p0 }
  0x49   : > { %2134 = sst [smem:[#allocation15_spill]] %s1686_s29  ;;  %s41_s27 = ssub.s32 %s1467_s22, %s2175_s4 }
  0x4a   : > { %2135 = sst [smem:[#allocation16_spill]] %s2175_s4  ;;  %s1143_s2 = smul.u32 768, %s163_s8 }
  0x4b   : > { %s2137_s28 = scalar_select %p1692_p1, 1, 0 }
  0x4c   : > { %s43_s0 = sor.u32 %s42_s7, %s41_s27  ;;  %s966_s26 = smul.u32 384, %s1459_s20 }
  0x4d   : > { %p44_p5 = scmp.eq.s32.totalorder %s43_s0, 0  ;;  %s99_s19 = sor.u32 %s69_s14, %s43_s0 }
  0x4e   : > { %p100_p7 = scmp.eq.s32.totalorder %s99_s19, 0  ;;  %s2138_s21 = sadd.s32 1, %s1443_s16 }
  0x4f   : > { %s1702_s6 = scalar_select %p44_p5, %s1443_s16, %s2138_s21  }
  0x50   : > { %s1705_s29 = scalar_select %p100_p7, %s1419_s10, %s102_s11  }
  0x51   : > { %s1710_s30 = scalar_lea.hbm %s2103_s1, %s966_s26  ;;  %s167_s4 = scalar_lea.vmem [#allocation4], %s1143_s2 }
  0x52   : > { %s174_s7 = sshll.u32 %s167_s4, 4  ;;  %p2139_p10 = scmp.lt.s32.totalorder %s1471_s23, 8  ;;  %s1712_s7 = int_to_ptr.vmem [resolvable:$true] %s174_s7 }
  0x53   : > { %s1722_s21 = scalar_lea.sflag [#allocation5], %s163_s8  ;;  %s1315_s13 = scalar_lea.hbm %s1710_s30, 12288 }
  0x54   : > { %p1718_p12 = pnand %p2139_p10, %p1664_p4  ;;  %p1316_p8 = scmp.ne.s32.totalorder %s1710_s30, %s1315_s13 }
  0x55   : > { %s1320_s19 = scalar_lea.hbm %s2103_s1, 24576  ;;  %p1321_p4 = scmp.lt.u32.totalorder %s1710_s30, %s2103_s1 }
  0x56   : > { %p1317_p9 = pneg %p1718_p12  ;;  %p1322_p2 = scmp.lt.u32.totalorder %s1320_s19, %s1315_s13 }
  0x57   : > { %p1324_p5 = scmp.lt.u32.totalorder %s1315_s13, %s1710_s30 }
  0x58   : > { %p1318_p11 = pnand %p1317_p9, %p1316_p8  ;;  %p1323_p3 = por %p1322_p2, %p1321_p4 }
  0x5a   : > { %p1319_p0 = pneg %p1318_p11  ;;  %p1325_p7 = por %p1324_p5, %p1323_p3 }
  0x5c   : > { %p1326_p10 = pnand %p1325_p7, %p1319_p0 }
  0x5e   : > { %1329 = shalt.err (!%p1326_p10)
}
  0x5f   : > { %s1330_s11 = scalar_lea.vmem %s1712_s7, 12288  ;;  %s1476_s4 = smov [#allocation4]  }
  0x60   : > { %p1331_p8 = scmp.ne.s32.totalorder %s1712_s7, %s1330_s11  ;;  %s1335_s8 = sshll.u32 %s1476_s4, 4  ;;  %s1336_s8 = int_to_ptr.vmem [resolvable:$false] %s1335_s8 }
  0x61   : > { %s1337_s27 = scalar_lea.vmem %s1336_s8, 24576  ;;  %p1338_p13 = scmp.lt.s32.totalorder %s1712_s7, %s1336_s8 }
  0x62   : > { %p1333_p11 = pnand %p1331_p8, %p1317_p9  ;;  %p1339_p4 = scmp.lt.s32.totalorder %s1337_s27, %s1330_s11 }
  0x64   : > { %p1334_p1 = pneg %p1333_p11  ;;  %p1340_p2 = por %p1339_p4, %p1338_p13 }
  0x66   : > { %p1341_p3 = pnand %p1340_p2, %p1334_p1 }
  0x68   : > { %1344 = shalt.err (!%p1341_p3)
}
  0x69   : > { %s1477_s2 = smov 768   ;;  %s1478_s13 = smov 384  }
  0x6a   : > { %s1479_s18 = smov 24   ;;  %186 = sbr.rel (%p1645_p6) target bundleno = 468 (0x1d4), region = 28 }
  0x6b   : > { %1158 = dma.hbm_to_vmem [thread:$0]  (!%p1718_p12), %s1710_s30, 12288, %s1712_s7, %s1722_s21, %s1477_s2, %s1478_s13, %s1479_s18  }
  0x6c   : > { %s188_s26 = sand.u32 (!%p1645_p6), 1, %s1439_s15   ;;  %p2141_p13 = scmp.ne.s32.totalorder (!%p1645_p6), %s2123_s3, 0 }
  0x6d   : > { %s959_s19 = sshll.u32 (!%p1645_p6), %s188_s26, 8  ;;  %s189_s14 = scalar_lea.sflag (!%p1645_p6), [#allocation3], %s188_s26 }
  0x6e   : > { %s1753_s24 = scalar_lea.vmem (!%p1645_p6), [#allocation2], %s959_s19 }
  0x71   : > { %1406 = dma.done.wait (%p2141_p13), %s189_s14, 4096  }
  0x72   : > { %1408 = vsyncadd (%p2141_p13), %s189_s14, 4294963200  ;;  %s197_s11 = sand.u32 1, %s1427_s12   ;;  %p2142_p6 = scmp.ne.s32.totalorder %s2131_s5, 0 }
  0x73   : > { %s1144_s0 = smul.u32 768, %s197_s11  ;;  %s198_s30 = scalar_lea.sflag [#allocation5], %s197_s11 }
  0x75   : > { %s1760_s7 = scalar_lea.vmem [#allocation4], %s1144_s0 }
  0x76   : > { %1410 = dma.done.wait (%p2142_p6), %s198_s30, 12288  }
  0x77   : > { %1412 = vsyncadd (%p2142_p6), %s198_s30, 4294955008  ;;  %v263_v0 = vld [vmem:[%s1760_s7 + $0x8] sm:$0xff]  ;;  %v266_v1 = vld [vmem:[%s1760_s7 + $0x20] sm:$0xff]  ;;  %s223_s3 = sand.u32 1, %s1415_s9   ;;  %p2143_p1 = scmp.ne.s32.totalorder %s2137_s28, 0 }
  0x78   : > { %v262_v2 = vld [vmem:[%s1760_s7] sm:$0xff]  ;;  %v1047_v3 = vpack.c.bf16 %v266_v1, %v263_v0  ;;  %v265_v4 = vld [vmem:[%s1760_s7 + $0x18] sm:$0xff]  ;;  %v272_v6 = vld [vmem:[%s1760_s7 + $0x50] sm:$0xff]  ;;  %s1145_s25 = smul.u32 384, %s223_s3  ;;  %s2144_s9 = sld [smem:[#allocation10_spill]] (%p2143_p1) }
  0x79   : > { %v269_v5 = vld [vmem:[%s1760_s7 + $0x38] sm:$0xff]  ;;  %v1049_v7 = vpack.c.bf16 %v265_v4, %v262_v2  ;;  %v268_v9 = vld [vmem:[%s1760_s7 + $0x30] sm:$0xff]  ;;  %v271_v10 = vld [vmem:[%s1760_s7 + $0x48] sm:$0xff]  ;;  %s2145_s21 = sld [smem:[#allocation11_spill]] (%p2143_p1)  ;;  %s720_s4 = smul.u32 (%p2143_p1), 3, %s1447_s17 }
  0x7a   : > { %v1051_v8 = vpack.c.bf16 %v272_v6, %v269_v5  ;;  %v275_v11 = vld [vmem:[%s1760_s7 + $0x68] sm:$0xff]  ;;  %1048 = vmatprep.subr.bf16.mxu0 %v1047_v3  ;;  %v278_v12 = vld [vmem:[%s1760_s7 + $0x80] sm:$0xff]  ;;  %v1053_v13 = vpack.c.bf16 %v271_v10, %v268_v9  ;;  %v277_v16 = vld [vmem:[%s1760_s7 + $0x78] sm:$0xff]  ;;  %s1895_s5 = scalar_lea.vmem [#allocation6], %s1145_s25  ;;  %s2146_s26 = sld [smem:[#allocation18_spill]] (%p2143_p1) }
  0x7b   : > { %1050 = vmatpush1.bf16.msra.mxu0 %v1049_v7  ;;  %v1055_v14 = vpack.c.bf16 %v278_v12, %v275_v11  ;;  %v274_v15 = vld [vmem:[%s1760_s7 + $0x60] sm:$0xff]  ;;  %v281_v17 = vld [vmem:[%s1760_s7 + $0x98] sm:$0xff]  ;;  %v284_v18 = vld [vmem:[%s1760_s7 + $0xb0] sm:$0xff] }
  0x7c   : > { %1052 = vmatprep.subr.bf16.mxu0 %v1051_v8  ;;  %v1057_v19 = vpack.c.bf16 %v277_v16, %v274_v15  ;;  %v1059_v20 = vpack.c.bf16 %v284_v18, %v281_v17  ;;  %v280_v21 = vld [vmem:[%s1760_s7 + $0x90] sm:$0xff]  ;;  %v283_v22 = vld [vmem:[%s1760_s7 + $0xa8] sm:$0xff]  ;;  %v290_v24 = vld [vmem:[%s1760_s7 + $0xe0] sm:$0xff] }
  0x7d   : > { %v287_v23 = vld [vmem:[%s1760_s7 + $0xc8] sm:$0xff]  ;;  %v312_v25 = vld [vmem:[%s1760_s7 + $0x190] sm:$0xff]  ;;  %v1061_v29 = vpack.c.bf16 %v283_v22, %v280_v21  ;;  %v286_v30 = vld [vmem:[%s1760_s7 + $0xc0] sm:$0xff] }
  0x7e   : > { %v315_v26 = vld [vmem:[%s1760_s7 + $0x1a8] sm:$0xff]  ;;  %v264_v27 = vld [vmem:[%s1760_s7 + $0x10] sm:$0xff]  ;;  %v289_v31 = vld [vmem:[%s1760_s7 + $0xd8] sm:$0xff]  ;;  %v1063_v34 = vpack.c.bf16 %v290_v24, %v287_v23  ;;  %s1146_s8 = smul.u32 (%p2143_p1), 96, %s2144_s9 }
  0x7f   : > { %1054 = vmatpush1.bf16.msra.mxu0 %v1053_v13  ;;  %v267_v28 = vld [vmem:[%s1760_s7 + $0x28] sm:$0xff]  ;;  %v1111_v32 = vpack.c.bf16 %v315_v26, %v312_v25  ;;  %v293_v35 = vld [vmem:[%s1760_s7 + $0xf8] sm:$0xff]  ;;  %v318_v36 = vld [vmem:[%s1760_s7 + $0x1c0] sm:$0xff]  ;;  %v1065_v43 = vpack.c.bf16 %v289_v31, %v286_v30  ;;  %s1147_s28 = smul.u32 (%p2143_p1), 192, %s2145_s21 }
  0x80   : > { %1056 = vmatprep.subr.bf16.mxu0 %v1055_v14  ;;  %v1113_v33 = vpack.c.bf16 %v267_v28, %v264_v27  ;;  %v321_v37 = vld [vmem:[%s1760_s7 + $0x1d8] sm:$0xff]  ;;  %v296_v38 = vld [vmem:[%s1760_s7 + $0x110] sm:$0xff]  ;;  %v270_v40 = vld [vmem:[%s1760_s7 + $0x40] sm:$0xff]  ;;  %s722_s17 = sadd.s32 (%p2143_p1), %s1146_s8, %s720_s4 }
  0x81   : > { %1112 = vmatprep.subr.bf16.mxu1 %v1111_v32  ;;  %v1115_v39 = vpack.c.bf16 %v321_v37, %v318_v36  ;;  %v273_v41 = vld [vmem:[%s1760_s7 + $0x58] sm:$0xff]  ;;  %v324_v44 = vld [vmem:[%s1760_s7 + $0x1f0] sm:$0xff]  ;;  %v327_v45 = vld [vmem:[%s1760_s7 + $0x208] sm:$0xff]  ;;  %v1067_v47 = vpack.c.bf16 %v296_v38, %v293_v35  ;;  %s724_s27 = sadd.s32 (%p2143_p1), %s1147_s28, %s722_s17 }
  0x82   : > { %1114 = vmatpush3.bf16.msra.mxu1 %v1113_v33  ;;  %v1117_v42 = vpack.c.bf16 %v273_v41, %v270_v40  ;;  %v276_v46 = vld [vmem:[%s1760_s7 + $0x70] sm:$0xff]  ;;  %v295_v49 = vld [vmem:[%s1760_s7 + $0x108] sm:$0xff]  ;;  %v1119_v50 = vpack.c.bf16 %v327_v45, %v324_v44  ;;  %v302_v53 = vld [vmem:[%s1760_s7 + $0x140] sm:$0xff]  ;;  %s962_s2 = sshll.u32 (%p2143_p1), %s724_s27, 3 }
  0x83   : > { %1058 = vmatpush1.bf16.msra.mxu0 %v1057_v19  ;;  %1116 = vmatprep.subr.bf16.mxu1 %v1115_v39  ;;  %v292_v48 = vld [vmem:[%s1760_s7 + $0xf0] sm:$0xff]  ;;  %v279_v51 = vld [vmem:[%s1760_s7 + $0x88] sm:$0xff]  ;;  %v330_v54 = vld [vmem:[%s1760_s7 + $0x220] sm:$0xff]  ;;  %s1971_s19 = scalar_lea.vmem (%p2143_p1), %s2146_s26, %s962_s2 }
  0x84   : > { %1060 = vmatprep.subr.bf16.mxu0 %v1059_v20  ;;  %v299_v52 = vld [vmem:[%s1760_s7 + $0x128] sm:$0xff]  ;;  %v1121_v55 = vpack.c.bf16 %v279_v51, %v276_v46  ;;  %v333_v56 = vld [vmem:[%s1760_s7 + $0x238] sm:$0xff]  ;;  %v1069_v57 = vpack.c.bf16 %v295_v49, %v292_v48  ;;  %v298_v58 = vld [vmem:[%s1760_s7 + $0x120] sm:$0xff] }
  0x85   : > { %v1123_v59 = vpack.c.bf16 %v333_v56, %v330_v54  ;;  %v282_v60 = vld [vmem:[%s1760_s7 + $0xa0] sm:$0xff]  ;;  %v285_v61 = vld [vmem:[%s1760_s7 + $0xb8] sm:$0xff]  ;;  %v1071_v62 = vpack.c.bf16 %v302_v53, %v299_v52  ;;  %v336_v0 = vld [vmem:[%s1760_s7 + $0x250] sm:$0xff] }
  0x86   : > { %1118 = vmatpush3.bf16.msra.mxu1 %v1117_v42  ;;  %v301_v63 = vld [vmem:[%s1760_s7 + $0x138] sm:$0xff]  ;;  %v339_v1 = vld [vmem:[%s1760_s7 + $0x268] sm:$0xff]  ;;  %v308_v3 = vld [vmem:[%s1760_s7 + $0x170] sm:$0xff]  ;;  %v1125_v4 = vpack.c.bf16 %v285_v61, %v282_v60 }
  0x87   : > { %1062 = vmatpush1.bf16.msra.mxu0 %v1061_v29  ;;  %1120 = vmatprep.subr.bf16.mxu1 %v1119_v50  ;;  %v305_v2 = vld [vmem:[%s1760_s7 + $0x158] sm:$0xff]  ;;  %v1073_v5 = vpack.c.bf16 %v301_v63, %v298_v58  ;;  %v304_v6 = vld [vmem:[%s1760_s7 + $0x150] sm:$0xff]  ;;  %v1127_v7 = vpack.c.bf16 %v339_v1, %v336_v0  ;;  %v291_v9 = vld [vmem:[%s1760_s7 + $0xe8] sm:$0xff] }
  0x88   : > { %1064 = vmatprep.subr.bf16.mxu0 %v1063_v34  ;;  %v288_v8 = vld [vmem:[%s1760_s7 + $0xd0] sm:$0xff]  ;;  %v1075_v10 = vpack.c.bf16 %v308_v3, %v305_v2  ;;  %v307_v11 = vld [vmem:[%s1760_s7 + $0x168] sm:$0xff]  ;;  %v342_v12 = vld [vmem:[%s1760_s7 + $0x280] sm:$0xff] }
  0x89   : > { %v345_v13 = vld [vmem:[%s1760_s7 + $0x298] sm:$0xff]  ;;  %v311_v14 = vld [vmem:[%s1760_s7 + $0x188] sm:$0xff]  ;;  %v314_v15 = vld [vmem:[%s1760_s7 + $0x1a0] sm:$0xff]  ;;  %v1129_v16 = vpack.c.bf16 %v291_v9, %v288_v8  ;;  %v1077_v17 = vpack.c.bf16 %v307_v11, %v304_v6 }
  0x8a   : > { %1122 = vmatpush3.bf16.msra.mxu1 %v1121_v55  ;;  %v310_v18 = vld [vmem:[%s1760_s7 + $0x180] sm:$0xff]  ;;  %v1131_v19 = vpack.c.bf16 %v345_v13, %v342_v12  ;;  %v297_v21 = vld [vmem:[%s1760_s7 + $0x118] sm:$0xff]  ;;  %v1079_v22 = vpack.c.bf16 %v314_v15, %v311_v14  ;;  %v348_v24 = vld [vmem:[%s1760_s7 + $0x2b0] sm:$0xff] }
  0x8b   : > { %1066 = vmatpush1.bf16.msra.mxu0 %v1065_v43  ;;  %1124 = vmatprep.subr.bf16.mxu1 %v1123_v59  ;;  %v294_v20 = vld [vmem:[%s1760_s7 + $0x100] sm:$0xff]  ;;  %v313_v23 = vld [vmem:[%s1760_s7 + $0x198] sm:$0xff]  ;;  %v351_v25 = vld [vmem:[%s1760_s7 + $0x2c8] sm:$0xff] }
  0x8c   : > { %1068 = vmatprep.subr.bf16.mxu0 %v1067_v47  ;;  %v317_v26 = vld [vmem:[%s1760_s7 + $0x1b8] sm:$0xff]  ;;  %v320_v27 = vld [vmem:[%s1760_s7 + $0x1d0] sm:$0xff]  ;;  %v1133_v28 = vpack.c.bf16 %v297_v21, %v294_v20  ;;  %v231_v29 = vld [vmem:[%s1753_s24 + $0x8] sm:$0xff]  ;;  %v1081_v30 = vpack.c.bf16 %v313_v23, %v310_v18  ;;  %v1135_v32 = vpack.c.bf16 %v351_v25, %v348_v24 }
  0x8d   : > { %v316_v31 = vld [vmem:[%s1760_s7 + $0x1b0] sm:$0xff]  ;;  %v303_v34 = vld [vmem:[%s1760_s7 + $0x148] sm:$0xff]  ;;  %v1083_v35 = vpack.c.bf16 %v320_v27, %v317_v26  ;;  %v354_v37 = vld [vmem:[%s1760_s7 + $0x2e0] sm:$0xff]  ;;  %583 = vmatprep.mubr.f32.mxu1 %v231_v29  ;;  %422 = vmatprep.mubr.f32.mxu0 %v231_v29 }
  0x8e   : > { %1126 = vmatpush3.bf16.msra.mxu1 %v1125_v4  ;;  %v300_v33 = vld [vmem:[%s1760_s7 + $0x130] sm:$0xff]  ;;  %v319_v36 = vld [vmem:[%s1760_s7 + $0x1c8] sm:$0xff]  ;;  %v357_v38 = vld [vmem:[%s1760_s7 + $0x2f8] sm:$0xff] }
  0x8f   : > { %1070 = vmatpush1.bf16.msra.mxu0 %v1069_v57  ;;  %1128 = vmatprep.subr.bf16.mxu1 %v1127_v7  ;;  %v323_v39 = vld [vmem:[%s1760_s7 + $0x1e8] sm:$0xff]  ;;  %v326_v40 = vld [vmem:[%s1760_s7 + $0x200] sm:$0xff]  ;;  %v1137_v41 = vpack.c.bf16 %v303_v34, %v300_v33  ;;  %v1085_v42 = vpack.c.bf16 %v319_v36, %v316_v31  ;;  %v1139_v43 = vpack.c.bf16 %v357_v38, %v354_v37  ;;  %v309_v45 = vld [vmem:[%s1760_s7 + $0x178] sm:$0xff] }
  0x90   : > { %1072 = vmatprep.subr.bf16.mxu0 %v1071_v62  ;;  %v306_v44 = vld [vmem:[%s1760_s7 + $0x160] sm:$0xff]  ;;  %v1087_v46 = vpack.c.bf16 %v326_v40, %v323_v39  ;;  %v325_v48 = vld [vmem:[%s1760_s7 + $0x1f8] sm:$0xff]  ;;  %v332_v50 = vld [vmem:[%s1760_s7 + $0x230] sm:$0xff] }
  0x91   : > { %v322_v47 = vld [vmem:[%s1760_s7 + $0x1e0] sm:$0xff]  ;;  %v329_v49 = vld [vmem:[%s1760_s7 + $0x218] sm:$0xff]  ;;  %v1141_v51 = vpack.c.bf16 %v309_v45, %v306_v44  ;;  %v328_v54 = vld [vmem:[%s1760_s7 + $0x210] sm:$0xff] }
  0x92   : > { %1130 = vmatpush3.bf16.msra.mxu1 %v1129_v16  ;;  %v1089_v52 = vpack.c.bf16 %v325_v48, %v322_v47  ;;  %v1091_v53 = vpack.c.bf16 %v332_v50, %v329_v49  ;;  %v331_v55 = vld [vmem:[%s1760_s7 + $0x228] sm:$0xff]  ;;  %v338_v57 = vld [vmem:[%s1760_s7 + $0x260] sm:$0xff]  ;;  %v233_v60 = vld [vmem:[%s1753_s24 + $0x18] sm:$0xff] }
  0x93   : > { %1074 = vmatpush1.bf16.msra.mxu0 %v1073_v5  ;;  %1132 = vmatprep.subr.bf16.mxu1 %v1131_v19  ;;  %v335_v56 = vld [vmem:[%s1760_s7 + $0x248] sm:$0xff]  ;;  %v230_v58 = vld [vmem:[%s1753_s24] sm:$0xff]  ;;  %v1093_v59 = vpack.c.bf16 %v331_v55, %v328_v54  ;;  %v337_v63 = vld [vmem:[%s1760_s7 + $0x258] sm:$0xff] }
  0x94   : > { %1076 = vmatprep.subr.bf16.mxu0 %v1075_v10  ;;  %v1095_v61 = vpack.c.bf16 %v338_v57, %v335_v56  ;;  %v334_v62 = vld [vmem:[%s1760_s7 + $0x240] sm:$0xff]  ;;  %v341_v0 = vld [vmem:[%s1760_s7 + $0x278] sm:$0xff]  ;;  %v344_v1 = vld [vmem:[%s1760_s7 + $0x290] sm:$0xff] }
  0x95   : > { %v232_v2 = vld [vmem:[%s1753_s24 + $0x10] sm:$0xff]  ;;  %v1097_v3 = vpack.c.bf16 %v337_v63, %v334_v62  ;;  %v235_v4 = vld [vmem:[%s1753_s24 + $0x28] sm:$0xff]  ;;  %v1099_v5 = vpack.c.bf16 %v344_v1, %v341_v0  ;;  %v350_v9 = vld [vmem:[%s1760_s7 + $0x2c0] sm:$0xff] }
  0x96   : > { %1134 = vmatpush3.bf16.msra.mxu1 %v1133_v28  ;;  %v340_v6 = vld [vmem:[%s1760_s7 + $0x270] sm:$0xff]  ;;  %v343_v7 = vld [vmem:[%s1760_s7 + $0x288] sm:$0xff]  ;;  %v234_v10 = vld [vmem:[%s1753_s24 + $0x20] sm:$0xff] }
  0x97   : > { %1078 = vmatpush1.bf16.msra.mxu0 %v1077_v17  ;;  %1136 = vmatprep.subr.bf16.mxu1 %v1135_v32  ;;  %v347_v8 = vld [vmem:[%s1760_s7 + $0x2a8] sm:$0xff]  ;;  %v1101_v11 = vpack.c.bf16 %v343_v7, %v340_v6  ;;  %v237_v12 = vld [vmem:[%s1753_s24 + $0x38] sm:$0xff]  ;;  %v346_v14 = vld [vmem:[%s1760_s7 + $0x2a0] sm:$0xff] }
  0x98   : > { %1080 = vmatprep.subr.bf16.mxu0 %v1079_v22  ;;  %v1103_v13 = vpack.c.bf16 %v350_v9, %v347_v8  ;;  %v349_v15 = vld [vmem:[%s1760_s7 + $0x2b8] sm:$0xff]  ;;  %v356_v17 = vld [vmem:[%s1760_s7 + $0x2f0] sm:$0xff]  ;;  %v239_v20 = vld [vmem:[%s1753_s24 + $0x48] sm:$0xff] }
  0x99   : > { %v353_v16 = vld [vmem:[%s1760_s7 + $0x2d8] sm:$0xff]  ;;  %v236_v18 = vld [vmem:[%s1753_s24 + $0x30] sm:$0xff]  ;;  %v1105_v19 = vpack.c.bf16 %v349_v15, %v346_v14  ;;  %v355_v23 = vld [vmem:[%s1760_s7 + $0x2e8] sm:$0xff] }
  0x9a   : > { %1138 = vmatpush3.bf16.msra.mxu1 %v1137_v41  ;;  %v1107_v21 = vpack.c.bf16 %v356_v17, %v353_v16  ;;  %v352_v22 = vld [vmem:[%s1760_s7 + $0x2d0] sm:$0xff]  ;;  %v238_v24 = vld [vmem:[%s1753_s24 + $0x40] sm:$0xff]  ;;  %v241_v26 = vld [vmem:[%s1753_s24 + $0x58] sm:$0xff] }
  0x9b   : > { %1082 = vmatpush1.bf16.msra.mxu0 %v1081_v30  ;;  %1140 = vmatprep.subr.bf16.mxu1 %v1139_v43  ;;  %v1109_v25 = vpack.c.bf16 %v355_v23, %v352_v22  ;;  %v240_v27 = vld [vmem:[%s1753_s24 + $0x50] sm:$0xff]  ;;  %v243_v28 = vld [vmem:[%s1753_s24 + $0x68] sm:$0xff]  ;;  %v242_v29 = vld [vmem:[%s1753_s24 + $0x60] sm:$0xff] }
  0x9c   : > { %1084 = vmatprep.subr.bf16.mxu0 %v1083_v35  ;;  %v245_v30 = vld [vmem:[%s1753_s24 + $0x78] sm:$0xff]  ;;  %v244_v31 = vld [vmem:[%s1753_s24 + $0x70] sm:$0xff]  ;;  %v247_v32 = vld [vmem:[%s1753_s24 + $0x88] sm:$0xff] }
  0x9d   : > { %v246_v33 = vld [vmem:[%s1753_s24 + $0x80] sm:$0xff]  ;;  %v249_v34 = vld [vmem:[%s1753_s24 + $0x98] sm:$0xff]  ;;  %v248_v35 = vld [vmem:[%s1753_s24 + $0x90] sm:$0xff] }
  0x9e   : > { %1142 = vmatpush3.bf16.msra.mxu1 %v1141_v51  ;;  %v251_v36 = vld [vmem:[%s1753_s24 + $0xa8] sm:$0xff]  ;;  %v250_v37 = vld [vmem:[%s1753_s24 + $0xa0] sm:$0xff]  ;;  %v253_v38 = vld [vmem:[%s1753_s24 + $0xb8] sm:$0xff] }
  0x9f   : > { %1086 = vmatpush1.bf16.msra.mxu0 %v1085_v42  ;;  %v252_v39 = vld [vmem:[%s1753_s24 + $0xb0] sm:$0xff]  ;;  %v255_v40 = vld [vmem:[%s1753_s24 + $0xc8] sm:$0xff]  ;;  %v254_v41 = vld [vmem:[%s1753_s24 + $0xc0] sm:$0xff] }
  0xa0   : > { %1088 = vmatprep.subr.bf16.mxu0 %v1087_v46  ;;  %v257_v42 = vld [vmem:[%s1753_s24 + $0xd8] sm:$0xff]  ;;  %v256_v43 = vld [vmem:[%s1753_s24 + $0xd0] sm:$0xff]  ;;  %v259_v44 = vld [vmem:[%s1753_s24 + $0xe8] sm:$0xff] }
  0xa1   : > { %584 = vmatmul.mubr.f32.vlgmr.msra.gmra.mrb[0].mxu1 %v230_v58  ;;  %v258_v45 = vld [vmem:[%s1753_s24 + $0xe0] sm:$0xff]  ;;  %v261_v46 = vld [vmem:[%s1753_s24 + $0xf8] sm:$0xff]  ;;  %v260_v47 = vld [vmem:[%s1753_s24 + $0xf0] sm:$0xff] }
  0xa2   : > { %588 = vmatprep.mubr.f32.mxu1 %v233_v60 }
  0xa3   : > { %1090 = vmatpush1.bf16.msra.mxu0 %v1089_v52 }
  0xa4   : > { %1092 = vmatprep.subr.bf16.mxu0 %v1091_v53 }
  0xa5   : > { %589 = vmatmul.mubr.f32.gmra.mrb[2].mxu1 %v232_v2 }
  0xa6   : > { %593 = vmatprep.mubr.f32.mxu1 %v235_v4 }
  0xa7   : > { %1094 = vmatpush1.bf16.msra.mxu0 %v1093_v59 }
  0xa8   : > { %1096 = vmatprep.subr.bf16.mxu0 %v1095_v61 }
  0xa9   : > { %594 = vmatmul.mubr.f32.gmra.mrb[4].mxu1 %v234_v10 }
  0xaa   : > { %598 = vmatprep.mubr.f32.mxu1 %v237_v12 }
  0xab   : > { %1098 = vmatpush1.bf16.msra.mxu0 %v1097_v3 }
  0xac   : > { %1100 = vmatprep.subr.bf16.mxu0 %v1099_v5 }
  0xad   : > { %599 = vmatmul.mubr.f32.gmra.mrb[6].mxu1 %v236_v18 }
  0xae   : > { %603 = vmatprep.mubr.f32.mxu1 %v239_v20 }
  0xaf   : > { %1102 = vmatpush1.bf16.msra.mxu0 %v1101_v11 }
  0xb0   : > { %1104 = vmatprep.subr.bf16.mxu0 %v1103_v13 }
  0xb1   : > { %604 = vmatmul.mubr.f32.gmra.mrb[8].mxu1 %v238_v24 }
  0xb2   : > { %608 = vmatprep.mubr.f32.mxu1 %v241_v26 }
  0xb3   : > { %1106 = vmatpush1.bf16.msra.mxu0 %v1105_v19 }
  0xb4   : > { %1108 = vmatprep.subr.bf16.mxu0 %v1107_v21 }
  0xb5   : > { %609 = vmatmul.mubr.f32.gmra.mrb[10].mxu1 %v240_v27 }
  0xb6   : > { %613 = vmatprep.mubr.f32.mxu1 %v243_v28 }
  0xb7   : > { %1110 = vmatpush1.bf16.msra.mxu0 %v1109_v25 }
  0xb9   : > { %614 = vmatmul.mubr.f32.gmra.mrb[12].mxu1 %v242_v29 }
  0xba   : > { %423 = vmatmul.mubr.f32.vlgmr.msra.gmra.mrb[0].mxu0 %v230_v58  ;;  %618 = vmatprep.mubr.f32.mxu1 %v245_v30 }
  0xbb   : > { %428 = vmatprep.mubr.f32.mxu0 %v233_v60 }
  0xbd   : > { %619 = vmatmul.mubr.f32.gmra.mrb[14].mxu1 %v244_v31 }
  0xbe   : > { %429 = vmatmul.mubr.f32.gmra.mrb[2].mxu0 %v232_v2  ;;  %623 = vmatprep.mubr.f32.mxu1 %v247_v32 }
  0xbf   : > { %434 = vmatprep.mubr.f32.mxu0 %v235_v4 }
  0xc1   : > { %624 = vmatmul.mubr.f32.gmra.mrb[16].mxu1 %v246_v33 }
  0xc2   : > { %435 = vmatmul.mubr.f32.gmra.mrb[4].mxu0 %v234_v10  ;;  %628 = vmatprep.mubr.f32.mxu1 %v249_v34 }
  0xc3   : > { %440 = vmatprep.mubr.f32.mxu0 %v237_v12 }
  0xc5   : > { %629 = vmatmul.mubr.f32.gmra.mrb[18].mxu1 %v248_v35 }
  0xc6   : > { %441 = vmatmul.mubr.f32.gmra.mrb[6].mxu0 %v236_v18  ;;  %633 = vmatprep.mubr.f32.mxu1 %v251_v36 }
  0xc7   : > { %446 = vmatprep.mubr.f32.mxu0 %v239_v20 }
  0xc9   : > { %634 = vmatmul.mubr.f32.gmra.mrb[20].mxu1 %v250_v37 }
  0xca   : > { %447 = vmatmul.mubr.f32.gmra.mrb[8].mxu0 %v238_v24  ;;  %638 = vmatprep.mubr.f32.mxu1 %v253_v38 }
  0xcb   : > { %452 = vmatprep.mubr.f32.mxu0 %v241_v26 }
  0xcd   : > { %639 = vmatmul.mubr.f32.gmra.mrb[22].mxu1 %v252_v39 }
  0xce   : > { %453 = vmatmul.mubr.f32.gmra.mrb[10].mxu0 %v240_v27  ;;  %643 = vmatprep.mubr.f32.mxu1 %v255_v40 }
  0xcf   : > { %458 = vmatprep.mubr.f32.mxu0 %v243_v28 }
  0xd1   : > { %644 = vmatmul.mubr.f32.gmra.mrb[24].mxu1 %v254_v41 }
  0xd2   : > { %459 = vmatmul.mubr.f32.gmra.mrb[12].mxu0 %v242_v29  ;;  %648 = vmatprep.mubr.f32.mxu1 %v257_v42 }
  0xd3   : > { %464 = vmatprep.mubr.f32.mxu0 %v245_v30 }
  0xd5   : > { %649 = vmatmul.mubr.f32.gmra.mrb[26].mxu1 %v256_v43 }
  0xd6   : > { %465 = vmatmul.mubr.f32.gmra.mrb[14].mxu0 %v244_v31  ;;  %653 = vmatprep.mubr.f32.mxu1 %v259_v44 }
  0xd7   : > { %470 = vmatprep.mubr.f32.mxu0 %v247_v32 }
  0xd9   : > { %654 = vmatmul.mubr.f32.gmra.mrb[28].mxu1 %v258_v45 }
  0xda   : > { %471 = vmatmul.mubr.f32.gmra.mrb[16].mxu0 %v246_v33  ;;  %658 = vmatprep.mubr.f32.mxu1 %v261_v46 }
  0xdb   : > { %476 = vmatprep.mubr.f32.mxu0 %v249_v34 }
  0xdd   : > { %659 = vmatmul.mubr.f32.gmra.mrb[30].mxu1 %v260_v47 }
  0xde   : > { %477 = vmatmul.mubr.f32.gmra.mrb[18].mxu0 %v248_v35 }
  0xdf   : > { %482 = vmatprep.mubr.f32.mxu0 %v251_v36 }
  0xe2   : > { %483 = vmatmul.mubr.f32.gmra.mrb[20].mxu0 %v250_v37 }
  0xe3   : > { %488 = vmatprep.mubr.f32.mxu0 %v253_v38 }
  0xe6   : > { %489 = vmatmul.mubr.f32.gmra.mrb[22].mxu0 %v252_v39 }
  0xe7   : > { %494 = vmatprep.mubr.f32.mxu0 %v255_v40 }
  0xea   : > { %495 = vmatmul.mubr.f32.gmra.mrb[24].mxu0 %v254_v41 }
  0xeb   : > { %500 = vmatprep.mubr.f32.mxu0 %v257_v42 }
  0xee   : > { %501 = vmatmul.mubr.f32.gmra.mrb[26].mxu0 %v256_v43 }
  0xef   : > { %506 = vmatprep.mubr.f32.mxu0 %v259_v44 }
  0xf2   : > { %507 = vmatmul.mubr.f32.gmra.mrb[28].mxu0 %v258_v45 }
  0xf3   : > { %512 = vmatprep.mubr.f32.mxu0 %v261_v46 }
  0xf6   : > { %513 = vmatmul.mubr.f32.gmra.mrb[30].mxu0 %v260_v47 }
 0x174   : > { %v999_v48 = vpop.f32.mrb[0].mxu1 }
 0x175   : > { %v1000_v49 = vpop.f32.mrb[1].mxu1 }
 0x176   : > { %v1001_v50 = vadd.f32 %v1000_v49, %v999_v48 }
 0x178   : > { %666 = vst [vmem:[%s1895_s5 + $0x10] sm:$0xff] %v1001_v50  ;;  %v1002_v51 = vpop.f32.mrb[2].mxu1 }
 0x179   : > { %v1003_v52 = vpop.f32.mrb[3].mxu1 }
 0x17a   : > { %v1004_v53 = vadd.f32 %v1003_v52, %v1002_v51 }
 0x17c   : > { %669 = vst [vmem:[%s1895_s5 + $0x28] sm:$0xff] %v1004_v53  ;;  %v1005_v54 = vpop.f32.mrb[4].mxu1 }
 0x17d   : > { %v1006_v55 = vpop.f32.mrb[5].mxu1 }
 0x17e   : > { %v1007_v56 = vadd.f32 %v1006_v55, %v1005_v54 }
 0x180   : > { %672 = vst [vmem:[%s1895_s5 + $0x40] sm:$0xff] %v1007_v56  ;;  %v1008_v57 = vpop.f32.mrb[6].mxu1 }
 0x181   : > { %v1009_v58 = vpop.f32.mrb[7].mxu1 }
 0x182   : > { %v1010_v59 = vadd.f32 %v1009_v58, %v1008_v57 }
 0x184   : > { %675 = vst [vmem:[%s1895_s5 + $0x58] sm:$0xff] %v1010_v59  ;;  %v1011_v60 = vpop.f32.mrb[8].mxu1 }
 0x185   : > { %v1012_v61 = vpop.f32.mrb[9].mxu1 }
 0x186   : > { %v1013_v62 = vadd.f32 %v1012_v61, %v1011_v60 }
 0x188   : > { %678 = vst [vmem:[%s1895_s5 + $0x70] sm:$0xff] %v1013_v62  ;;  %v1014_v63 = vpop.f32.mrb[10].mxu1 }
 0x189   : > { %v1015_v1 = vpop.f32.mrb[11].mxu1 }
 0x18a   : > { %v1016_v3 = vadd.f32 %v1015_v1, %v1014_v63 }
 0x18c   : > { %681 = vst [vmem:[%s1895_s5 + $0x88] sm:$0xff] %v1016_v3  ;;  %v1017_v4 = vpop.f32.mrb[12].mxu1 }
 0x18d   : > { %v424_v0 = vpop.f32.mrb[0].mxu0  ;;  %v1018_v6 = vpop.f32.mrb[13].mxu1 }
 0x18e   : > { %664 = vst [vmem:[%s1895_s5] sm:$0xff] %v424_v0  ;;  %v426_v2 = vpop.f32.mrb[1].mxu0  ;;  %v1019_v8 = vadd.f32 %v1018_v6, %v1017_v4 }
 0x18f   : > { %665 = vst [vmem:[%s1895_s5 + $0x8] sm:$0xff] %v426_v2  ;;  %v743_v2 = vld [vmem:[%s1895_s5 + $0x10] sm:$0xff] (%p2143_p1) }
 0x190   : > { %684 = vst [vmem:[%s1895_s5 + $0xa0] sm:$0xff] %v1019_v8  ;;  %v1020_v9 = vpop.f32.mrb[14].mxu1  ;;  %v755_v8 = vld [vmem:[%s1895_s5 + $0x40] sm:$0xff] (%p2143_p1)  ;;  %744 = vst [vmem:[%s1971_s19 + $0x10] sm:$0xff] (%p2143_p1), %v743_v2 }
 0x191   : > { %v430_v5 = vpop.f32.mrb[2].mxu0  ;;  %v1021_v11 = vpop.f32.mrb[15].mxu1  ;;  %756 = vst [vmem:[%s1971_s19 + $0x70] sm:$0xff] (%p2143_p1), %v755_v8 }
 0x192   : > { %667 = vst [vmem:[%s1895_s5 + $0x18] sm:$0xff] %v430_v5  ;;  %v432_v7 = vpop.f32.mrb[3].mxu0  ;;  %v1022_v13 = vadd.f32 %v1021_v11, %v1020_v9  ;;  %v749_v5 = vld [vmem:[%s1895_s5 + $0x28] sm:$0xff] (%p2143_p1)  ;;  %v761_v11 = vld [vmem:[%s1895_s5 + $0x58] sm:$0xff] (%p2143_p1) }
 0x193   : > { %668 = vst [vmem:[%s1895_s5 + $0x20] sm:$0xff] %v432_v7  ;;  %750 = vst [vmem:[%s1971_s19 + $0x40] sm:$0xff] (%p2143_p1), %v749_v5 }
 0x194   : > { %687 = vst [vmem:[%s1895_s5 + $0xb8] sm:$0xff] %v1022_v13  ;;  %v1023_v14 = vpop.f32.mrb[16].mxu1  ;;  %762 = vst [vmem:[%s1971_s19 + $0xa0] sm:$0xff] (%p2143_p1), %v761_v11 }
 0x195   : > { %v436_v10 = vpop.f32.mrb[4].mxu0  ;;  %v1024_v16 = vpop.f32.mrb[17].mxu1  ;;  %v739_v0 = vld [vmem:[%s1895_s5] sm:$0xff] (%p2143_p1) }
 0x196   : > { %670 = vst [vmem:[%s1895_s5 + $0x30] sm:$0xff] %v436_v10  ;;  %v438_v12 = vpop.f32.mrb[5].mxu0  ;;  %v1025_v18 = vadd.f32 %v1024_v16, %v1023_v14  ;;  %v741_v1 = vld [vmem:[%s1895_s5 + $0x8] sm:$0xff] (%p2143_p1)  ;;  %v767_v14 = vld [vmem:[%s1895_s5 + $0x70] sm:$0xff] (%p2143_p1)  ;;  %740 = vst [vmem:[%s1971_s19] sm:$0xff] (%p2143_p1), %v739_v0 }
 0x197   : > { %671 = vst [vmem:[%s1895_s5 + $0x38] sm:$0xff] %v438_v12  ;;  %742 = vst [vmem:[%s1971_s19 + $0x8] sm:$0xff] (%p2143_p1), %v741_v1 }
 0x198   : > { %690 = vst [vmem:[%s1895_s5 + $0xd0] sm:$0xff] %v1025_v18  ;;  %v1026_v19 = vpop.f32.mrb[18].mxu1  ;;  %768 = vst [vmem:[%s1971_s19 + $0xd0] sm:$0xff] (%p2143_p1), %v767_v14 }
 0x199   : > { %v442_v15 = vpop.f32.mrb[6].mxu0  ;;  %v1027_v21 = vpop.f32.mrb[19].mxu1  ;;  %v745_v3 = vld [vmem:[%s1895_s5 + $0x18] sm:$0xff] (%p2143_p1) }
 0x19a   : > { %673 = vst [vmem:[%s1895_s5 + $0x48] sm:$0xff] %v442_v15  ;;  %v444_v17 = vpop.f32.mrb[7].mxu0  ;;  %v1028_v23 = vadd.f32 %v1027_v21, %v1026_v19  ;;  %v747_v4 = vld [vmem:[%s1895_s5 + $0x20] sm:$0xff] (%p2143_p1)  ;;  %746 = vst [vmem:[%s1971_s19 + $0x30] sm:$0xff] (%p2143_p1), %v745_v3 }
 0x19b   : > { %674 = vst [vmem:[%s1895_s5 + $0x50] sm:$0xff] %v444_v17  ;;  %v773_v17 = vld [vmem:[%s1895_s5 + $0x88] sm:$0xff] (%p2143_p1)  ;;  %748 = vst [vmem:[%s1971_s19 + $0x38] sm:$0xff] (%p2143_p1), %v747_v4 }
 0x19c   : > { %693 = vst [vmem:[%s1895_s5 + $0xe8] sm:$0xff] %v1028_v23  ;;  %v1029_v24 = vpop.f32.mrb[20].mxu1  ;;  %774 = vst [vmem:[%s1971_s19 + $0x100] sm:$0xff] (%p2143_p1), %v773_v17  ;;  %v785_v23 = vld [vmem:[%s1895_s5 + $0xb8] sm:$0xff] (%p2143_p1) }
 0x19d   : > { %v448_v20 = vpop.f32.mrb[8].mxu0  ;;  %v1030_v26 = vpop.f32.mrb[21].mxu1  ;;  %v751_v6 = vld [vmem:[%s1895_s5 + $0x30] sm:$0xff] (%p2143_p1)  ;;  %786 = vst [vmem:[%s1971_s19 + $0x160] sm:$0xff] (%p2143_p1), %v785_v23 }
 0x19e   : > { %676 = vst [vmem:[%s1895_s5 + $0x60] sm:$0xff] %v448_v20  ;;  %v450_v22 = vpop.f32.mrb[9].mxu0  ;;  %v1031_v28 = vadd.f32 %v1030_v26, %v1029_v24  ;;  %v753_v7 = vld [vmem:[%s1895_s5 + $0x38] sm:$0xff] (%p2143_p1)  ;;  %v779_v20 = vld [vmem:[%s1895_s5 + $0xa0] sm:$0xff] (%p2143_p1)  ;;  %752 = vst [vmem:[%s1971_s19 + $0x60] sm:$0xff] (%p2143_p1), %v751_v6 }
 0x19f   : > { %677 = vst [vmem:[%s1895_s5 + $0x68] sm:$0xff] %v450_v22  ;;  %754 = vst [vmem:[%s1971_s19 + $0x68] sm:$0xff] (%p2143_p1), %v753_v7  ;;  %v791_v26 = vld [vmem:[%s1895_s5 + $0xd0] sm:$0xff] (%p2143_p1) }
 0x1a0   : > { %696 = vst [vmem:[%s1895_s5 + $0x100] sm:$0xff] %v1031_v28  ;;  %v1032_v29 = vpop.f32.mrb[22].mxu1  ;;  %780 = vst [vmem:[%s1971_s19 + $0x130] sm:$0xff] (%p2143_p1), %v779_v20 }
 0x1a1   : > { %v454_v25 = vpop.f32.mrb[10].mxu0  ;;  %v1033_v31 = vpop.f32.mrb[23].mxu1  ;;  %v757_v9 = vld [vmem:[%s1895_s5 + $0x48] sm:$0xff] (%p2143_p1)  ;;  %792 = vst [vmem:[%s1971_s19 + $0x190] sm:$0xff] (%p2143_p1), %v791_v26 }
 0x1a2   : > { %679 = vst [vmem:[%s1895_s5 + $0x78] sm:$0xff] %v454_v25  ;;  %v456_v27 = vpop.f32.mrb[11].mxu0  ;;  %v1034_v33 = vadd.f32 %v1033_v31, %v1032_v29  ;;  %v759_v10 = vld [vmem:[%s1895_s5 + $0x50] sm:$0xff] (%p2143_p1)  ;;  %758 = vst [vmem:[%s1971_s19 + $0x90] sm:$0xff] (%p2143_p1), %v757_v9 }
 0x1a3   : > { %680 = vst [vmem:[%s1895_s5 + $0x80] sm:$0xff] %v456_v27  ;;  %760 = vst [vmem:[%s1971_s19 + $0x98] sm:$0xff] (%p2143_p1), %v759_v10  ;;  %v797_v29 = vld [vmem:[%s1895_s5 + $0xe8] sm:$0xff] (%p2143_p1) }
 0x1a4   : > { %699 = vst [vmem:[%s1895_s5 + $0x118] sm:$0xff] %v1034_v33  ;;  %v1035_v34 = vpop.f32.mrb[24].mxu1  ;;  %798 = vst [vmem:[%s1971_s19 + $0x1c0] sm:$0xff] (%p2143_p1), %v797_v29 }
 0x1a5   : > { %v460_v30 = vpop.f32.mrb[12].mxu0  ;;  %v1036_v36 = vpop.f32.mrb[25].mxu1  ;;  %v763_v12 = vld [vmem:[%s1895_s5 + $0x60] sm:$0xff] (%p2143_p1) }
 0x1a6   : > { %682 = vst [vmem:[%s1895_s5 + $0x90] sm:$0xff] %v460_v30  ;;  %v462_v32 = vpop.f32.mrb[13].mxu0  ;;  %v1037_v38 = vadd.f32 %v1036_v36, %v1035_v34  ;;  %v765_v13 = vld [vmem:[%s1895_s5 + $0x68] sm:$0xff] (%p2143_p1)  ;;  %764 = vst [vmem:[%s1971_s19 + $0xc0] sm:$0xff] (%p2143_p1), %v763_v12 }
 0x1a7   : > { %683 = vst [vmem:[%s1895_s5 + $0x98] sm:$0xff] %v462_v32  ;;  %766 = vst [vmem:[%s1971_s19 + $0xc8] sm:$0xff] (%p2143_p1), %v765_v13  ;;  %v803_v32 = vld [vmem:[%s1895_s5 + $0x100] sm:$0xff] (%p2143_p1) }
 0x1a8   : > { %702 = vst [vmem:[%s1895_s5 + $0x130] sm:$0xff] %v1037_v38  ;;  %v1038_v39 = vpop.f32.mrb[26].mxu1  ;;  %804 = vst [vmem:[%s1971_s19 + $0x1f0] sm:$0xff] (%p2143_p1), %v803_v32 }
 0x1a9   : > { %v466_v35 = vpop.f32.mrb[14].mxu0  ;;  %v1039_v41 = vpop.f32.mrb[27].mxu1  ;;  %v769_v15 = vld [vmem:[%s1895_s5 + $0x78] sm:$0xff] (%p2143_p1) }
 0x1aa   : > { %685 = vst [vmem:[%s1895_s5 + $0xa8] sm:$0xff] %v466_v35  ;;  %v468_v37 = vpop.f32.mrb[15].mxu0  ;;  %v1040_v43 = vadd.f32 %v1039_v41, %v1038_v39  ;;  %v771_v16 = vld [vmem:[%s1895_s5 + $0x80] sm:$0xff] (%p2143_p1)  ;;  %770 = vst [vmem:[%s1971_s19 + $0xf0] sm:$0xff] (%p2143_p1), %v769_v15 }
 0x1ab   : > { %686 = vst [vmem:[%s1895_s5 + $0xb0] sm:$0xff] %v468_v37  ;;  %772 = vst [vmem:[%s1971_s19 + $0xf8] sm:$0xff] (%p2143_p1), %v771_v16  ;;  %v809_v35 = vld [vmem:[%s1895_s5 + $0x118] sm:$0xff] (%p2143_p1) }
 0x1ac   : > { %705 = vst [vmem:[%s1895_s5 + $0x148] sm:$0xff] %v1040_v43  ;;  %v1041_v44 = vpop.f32.mrb[28].mxu1  ;;  %810 = vst [vmem:[%s1971_s19 + $0x220] sm:$0xff] (%p2143_p1), %v809_v35 }
 0x1ad   : > { %v472_v40 = vpop.f32.mrb[16].mxu0  ;;  %v1042_v46 = vpop.f32.mrb[29].mxu1  ;;  %v775_v18 = vld [vmem:[%s1895_s5 + $0x90] sm:$0xff] (%p2143_p1) }
 0x1ae   : > { %688 = vst [vmem:[%s1895_s5 + $0xc0] sm:$0xff] %v472_v40  ;;  %v474_v42 = vpop.f32.mrb[17].mxu0  ;;  %v1043_v48 = vadd.f32 %v1042_v46, %v1041_v44  ;;  %v777_v19 = vld [vmem:[%s1895_s5 + $0x98] sm:$0xff] (%p2143_p1)  ;;  %776 = vst [vmem:[%s1971_s19 + $0x120] sm:$0xff] (%p2143_p1), %v775_v18 }
 0x1af   : > { %689 = vst [vmem:[%s1895_s5 + $0xc8] sm:$0xff] %v474_v42  ;;  %778 = vst [vmem:[%s1971_s19 + $0x128] sm:$0xff] (%p2143_p1), %v777_v19  ;;  %v815_v38 = vld [vmem:[%s1895_s5 + $0x130] sm:$0xff] (%p2143_p1) }
 0x1b0   : > { %708 = vst [vmem:[%s1895_s5 + $0x160] sm:$0xff] %v1043_v48  ;;  %v1044_v49 = vpop.f32.mrb[30].mxu1  ;;  %816 = vst [vmem:[%s1971_s19 + $0x250] sm:$0xff] (%p2143_p1), %v815_v38 }
 0x1b1   : > { %v478_v45 = vpop.f32.mrb[18].mxu0  ;;  %v1045_v51 = vpop.f32.mrb[31].mxu1  ;;  %v781_v21 = vld [vmem:[%s1895_s5 + $0xa8] sm:$0xff] (%p2143_p1) }
 0x1b2   : > { %691 = vst [vmem:[%s1895_s5 + $0xd8] sm:$0xff] %v478_v45  ;;  %v480_v47 = vpop.f32.mrb[19].mxu0  ;;  %v1046_v53 = vadd.f32 %v1045_v51, %v1044_v49  ;;  %v783_v22 = vld [vmem:[%s1895_s5 + $0xb0] sm:$0xff] (%p2143_p1)  ;;  %782 = vst [vmem:[%s1971_s19 + $0x150] sm:$0xff] (%p2143_p1), %v781_v21 }
 0x1b3   : > { %692 = vst [vmem:[%s1895_s5 + $0xe0] sm:$0xff] %v480_v47  ;;  %784 = vst [vmem:[%s1971_s19 + $0x158] sm:$0xff] (%p2143_p1), %v783_v22  ;;  %v821_v41 = vld [vmem:[%s1895_s5 + $0x148] sm:$0xff] (%p2143_p1) }
 0x1b4   : > { %711 = vst [vmem:[%s1895_s5 + $0x178] sm:$0xff] %v1046_v53  ;;  %822 = vst [vmem:[%s1971_s19 + $0x280] sm:$0xff] (%p2143_p1), %v821_v41 }
 0x1b5   : > { %v484_v50 = vpop.f32.mrb[20].mxu0  ;;  %v787_v24 = vld [vmem:[%s1895_s5 + $0xc0] sm:$0xff] (%p2143_p1) }
 0x1b6   : > { %694 = vst [vmem:[%s1895_s5 + $0xf0] sm:$0xff] %v484_v50  ;;  %v486_v52 = vpop.f32.mrb[21].mxu0  ;;  %v789_v25 = vld [vmem:[%s1895_s5 + $0xc8] sm:$0xff] (%p2143_p1)  ;;  %788 = vst [vmem:[%s1971_s19 + $0x180] sm:$0xff] (%p2143_p1), %v787_v24 }
 0x1b7   : > { %695 = vst [vmem:[%s1895_s5 + $0xf8] sm:$0xff] %v486_v52  ;;  %790 = vst [vmem:[%s1971_s19 + $0x188] sm:$0xff] (%p2143_p1), %v789_v25  ;;  %v827_v44 = vld [vmem:[%s1895_s5 + $0x160] sm:$0xff] (%p2143_p1) }
 0x1b8   : > { %828 = vst [vmem:[%s1971_s19 + $0x2b0] sm:$0xff] (%p2143_p1), %v827_v44 }
 0x1b9   : > { %v490_v54 = vpop.f32.mrb[22].mxu0  ;;  %v793_v27 = vld [vmem:[%s1895_s5 + $0xd8] sm:$0xff] (%p2143_p1) }
 0x1ba   : > { %697 = vst [vmem:[%s1895_s5 + $0x108] sm:$0xff] %v490_v54  ;;  %v492_v55 = vpop.f32.mrb[23].mxu0  ;;  %v795_v28 = vld [vmem:[%s1895_s5 + $0xe0] sm:$0xff] (%p2143_p1)  ;;  %794 = vst [vmem:[%s1971_s19 + $0x1b0] sm:$0xff] (%p2143_p1), %v793_v27 }
 0x1bb   : > { %698 = vst [vmem:[%s1895_s5 + $0x110] sm:$0xff] %v492_v55  ;;  %796 = vst [vmem:[%s1971_s19 + $0x1b8] sm:$0xff] (%p2143_p1), %v795_v28  ;;  %v833_v47 = vld [vmem:[%s1895_s5 + $0x178] sm:$0xff] (%p2143_p1) }
 0x1bc   : > { %834 = vst [vmem:[%s1971_s19 + $0x2e0] sm:$0xff] (%p2143_p1), %v833_v47 }
 0x1bd   : > { %v496_v56 = vpop.f32.mrb[24].mxu0  ;;  %v799_v30 = vld [vmem:[%s1895_s5 + $0xf0] sm:$0xff] (%p2143_p1) }
 0x1be   : > { %700 = vst [vmem:[%s1895_s5 + $0x120] sm:$0xff] %v496_v56  ;;  %v498_v57 = vpop.f32.mrb[25].mxu0  ;;  %v801_v31 = vld [vmem:[%s1895_s5 + $0xf8] sm:$0xff] (%p2143_p1)  ;;  %800 = vst [vmem:[%s1971_s19 + $0x1e0] sm:$0xff] (%p2143_p1), %v799_v30 }
 0x1bf   : > { %701 = vst [vmem:[%s1895_s5 + $0x128] sm:$0xff] %v498_v57  ;;  %802 = vst [vmem:[%s1971_s19 + $0x1e8] sm:$0xff] (%p2143_p1), %v801_v31 }
 0x1c1   : > { %v502_v58 = vpop.f32.mrb[26].mxu0  ;;  %v805_v33 = vld [vmem:[%s1895_s5 + $0x108] sm:$0xff] (%p2143_p1) }
 0x1c2   : > { %703 = vst [vmem:[%s1895_s5 + $0x138] sm:$0xff] %v502_v58  ;;  %v504_v59 = vpop.f32.mrb[27].mxu0  ;;  %v807_v34 = vld [vmem:[%s1895_s5 + $0x110] sm:$0xff] (%p2143_p1)  ;;  %806 = vst [vmem:[%s1971_s19 + $0x210] sm:$0xff] (%p2143_p1), %v805_v33 }
 0x1c3   : > { %704 = vst [vmem:[%s1895_s5 + $0x140] sm:$0xff] %v504_v59  ;;  %808 = vst [vmem:[%s1971_s19 + $0x218] sm:$0xff] (%p2143_p1), %v807_v34 }
 0x1c5   : > { %v508_v60 = vpop.f32.mrb[28].mxu0  ;;  %718 = sbr.rel (!%p2143_p1) target bundleno = 468 (0x1d4), region = 40  ;;  %v811_v36 = vld [vmem:[%s1895_s5 + $0x120] sm:$0xff] (%p2143_p1) }
 0x1c6   : > { %706 = vst [vmem:[%s1895_s5 + $0x150] sm:$0xff] %v508_v60  ;;  %v510_v61 = vpop.f32.mrb[29].mxu0  ;;  %v813_v37 = vld [vmem:[%s1895_s5 + $0x128] sm:$0xff] (%p2143_p1)  ;;  %812 = vst [vmem:[%s1971_s19 + $0x240] sm:$0xff] (%p2143_p1), %v811_v36 }
 0x1c7   : > { %707 = vst [vmem:[%s1895_s5 + $0x158] sm:$0xff] %v510_v61  ;;  %814 = vst [vmem:[%s1971_s19 + $0x248] sm:$0xff] (%p2143_p1), %v813_v37 }
 0x1c9   : > { %v514_v62 = vpop.f32.mrb[30].mxu0  ;;  %v817_v39 = vld [vmem:[%s1895_s5 + $0x138] sm:$0xff] (%p2143_p1) }
 0x1ca   : > { %709 = vst [vmem:[%s1895_s5 + $0x168] sm:$0xff] %v514_v62  ;;  %v516_v63 = vpop.f32.mrb[31].mxu0  ;;  %v819_v40 = vld [vmem:[%s1895_s5 + $0x140] sm:$0xff] (%p2143_p1)  ;;  %818 = vst [vmem:[%s1971_s19 + $0x270] sm:$0xff] (%p2143_p1), %v817_v39 }
 0x1cb   : > { %710 = vst [vmem:[%s1895_s5 + $0x170] sm:$0xff] %v516_v63  ;;  %820 = vst [vmem:[%s1971_s19 + $0x278] sm:$0xff] (%p2143_p1), %v819_v40 }
 0x1cd   : > { %v823_v42 = vld [vmem:[%s1895_s5 + $0x150] sm:$0xff] }
 0x1ce   : > { %v825_v43 = vld [vmem:[%s1895_s5 + $0x158] sm:$0xff]  ;;  %824 = vst [vmem:[%s1971_s19 + $0x2a0] sm:$0xff] %v823_v42 }
 0x1cf   : > { %826 = vst [vmem:[%s1971_s19 + $0x2a8] sm:$0xff] %v825_v43 }
 0x1d1   : > { %v829_v45 = vld [vmem:[%s1895_s5 + $0x168] sm:$0xff] }
 0x1d2   : > { %v831_v46 = vld [vmem:[%s1895_s5 + $0x170] sm:$0xff]  ;;  %830 = vst [vmem:[%s1971_s19 + $0x2d0] sm:$0xff] %v829_v45 }
 0x1d3   : > { %832 = vst [vmem:[%s1971_s19 + $0x2d8] sm:$0xff] %v831_v46 }
 0x1d4 PF: > { %s18_s23 = sadd.s32 1, %s1471_s23   ;;  %s2148_s24 = sld [smem:[#allocation9_spill]] }
 0x1d5   : > { %p2052_p12 = scmp.ge.s32.totalorder %s18_s23, 10   ;;  %s2149_s13 = sld [smem:[#allocation15_spill]] }
 0x1d6   : > { %s2150_s18 = sld [smem:[#allocation12_spill]]  ;;  %s2151_s0 = sld [smem:[#allocation13_spill]] }
 0x1d7   : > { %s2152_s21 = sld [smem:[#allocation14_spill]]  ;;  %s2153_s30 = sld [smem:[#allocation16_spill]] }
 0x1d8   : > { %s2155_s9 = smov %s1419_s10  ;;  %s2156_s10 = smov %s1705_s29 }
 0x1d9   : > { %s2157_s11 = smov %s1427_s12  ;;  %s2159_s14 = smov %s1439_s15 }
 0x1da   : > { %s2158_s12 = smov %s2148_s24  ;;  %s2160_s15 = smov %s1443_s16 }
 0x1db   : > { %s2161_s16 = smov %s1702_s6  ;;  %s2162_s17 = smov %s1459_s20 }
 0x1dc   : > { %s2163_s19 = smov %s1467_s22  ;;  %s2164_s20 = smov %s2151_s0 }
 0x1dd   : > { %s2165_s22 = smov %s2153_s30  ;;  %17 = sbr.rel (!%p2052_p12) target bundleno = 14 (0xe), region = 104 }
 0x1e4   :  { %850 = vsyncpa [#allocation3], 1 }
 0x1e5   :  { %852 = vsyncpa [#allocation3 + $0x1], 1 }
 0x1e6   :  { %853 = vsyncpa [#allocation5], 1 }
 0x1e7   :  { %855 = vsyncpa [#allocation5 + $0x1], 1 }

// kernel: causal_attention_forward.3
= control target key start
LH: loop header
LB: loop body
LE: loop exit
PB: predicated region body
PF: predicated region fallthrough
CT: control target
= control target key end

     0   :  { %10 = vsyncpa [#allocation7], 0  ;;  %s3680_s0 = inlined_call_operand.vmem [shape: f32[2,2,256,128], index: 0, kind: input, shape index: {}]   ;;  %s3681_s1 = inlined_call_operand.vmem [shape: f32[2,2,256,128], index: 1, kind: input, shape index: {}]   ;;  %s3682_s2 = inlined_call_operand.vmem [shape: f32[2,2,256,128], index: 2, kind: input, shape index: {}]   ;;  %s3683_s3 = inlined_call_operand.vmem [shape: f32[256,256], index: 3, kind: input, shape index: {}]   ;;  %s3684_s4 = inlined_call_operand.vmem [shape: f32[1,256], index: 4, kind: input, shape index: {}]   ;;  %s3685_s5 = inlined_call_operand.hbm [shape: f32[2,256,256], index: 5, kind: output, shape index: {}]  }
   0x1   :  { %12 = vsyncpa [#allocation7 + $0x1], 0  ;;  %s2881_s18 = smov 0   ;;  %s2883_s19 = smov 0  }
   0x2   :  { %s2885_s20 = smov 0   ;;  %s2887_s21 = smov 0  }
   0x3   :  { %s2889_s22 = smov 0   ;;  %s2891_s23 = smov 0  }
   0x4   :  { %s2893_s24 = smov 0   ;;  %s2895_s25 = smov 0  }
   0x5   :  { %s2897_s26 = smov 0   ;;  %s2899_s27 = smov 0  }
   0x6   :  { %s2901_s28 = smov 0   ;;  %s2903_s29 = smov 0  }
   0x7 LB: > { %3698 = sst [smem:[#allocation9_spill]] %s2796_s18  ;;  %s2180_s30 = sadd.s32 4294967295, %s2840_s29   ;;  %s2840_s29 = sphi %s2903_s29, %s18_s29   ;;  %s2836_s28 = sphi %s2901_s28, %s3726_s28   ;;  %s2832_s27 = sphi %s2899_s27, %s3725_s27   ;;  %s2828_s26 = sphi %s2897_s26, %s3724_s26   ;;  %s2824_s25 = sphi %s2895_s25, %s3723_s25   ;;  %s2820_s24 = sphi %s2893_s24, %s3722_s24   ;;  %s2816_s23 = sphi %s2891_s23, %s3721_s23   ;;  %s2812_s22 = sphi %s2889_s22, %s3720_s22   ;;  %s2808_s21 = sphi %s2887_s21, %s3719_s21   ;;  %s2804_s20 = sphi %s2885_s20, %s3718_s20   ;;  %s2800_s19 = sphi %s2883_s19, %s3728_s19   ;;  %s2796_s18 = sphi %s2881_s18, %s3727_s18  }
   0x8   : > { %3699 = sst [smem:[#allocation10_spill]] %s2804_s20  ;;  %s2181_s6 = sadd.s32 4294967294, %s2840_s29  }
   0x9   : > { %3700 = sst [smem:[#allocation11_spill]] %s2824_s25  ;;  %s33_s7 = sadd.s32 1, %s2824_s25 }
   0xa   : > { %3701 = sst [smem:[#allocation12_spill]] %s2828_s26  ;;  %p34_p0 = scmp.ge.s32.totalorder %s33_s7, 2 }
   0xb   : > { %3702 = sst [smem:[#allocation13_spill]] %s2832_s27  ;;  %s36_s8 = sadd.s32 1, %s2828_s26 }
   0xc   : > { %3703 = sst [smem:[#allocation14_spill]] %s2836_s28  ;;  %s40_s9 = sadd.s32 1, %s2832_s27 }
   0xd   : > { %3704 = sst [smem:[#allocation15_spill]] %s2840_s29  ;;  %s44_s10 = sadd.s32 1, %s2836_s28 }
   0xe   : > { %s3730_s7 = smov (%p34_p0, %s33_s7), 0  ;;  %s3732_s8 = smov (!%p34_p0, %s36_s8), %s2828_s26 }
   0xf   : > { %3705 = sst [smem:[#allocation16_spill]] %s3730_s7  ;;  %p208_p1 = scmp.ne.s32.totalorder %s2804_s20, %s2800_s19 }
  0x10   : > { %p209_p2 = scmp.eq.s32.totalorder %s2180_s30, 15  ;;  %p38_p3 = scmp.ge.s32.totalorder %s3732_s8, 2 }
  0x11   : > { %p214_p4 = scmp.ne.s32.totalorder %s2800_s19, %s2796_s18  ;;  %p215_p6 = scmp.eq.s32.totalorder %s2181_s6, 15 }
  0x12   : > { %p2954_p5 = por %p209_p2, %p208_p1  ;;  %s3734_s8 = smov (%p38_p3, %s3732_s8), 0 }
  0x13   : > { %3707 = sst [smem:[#allocation17_spill]] %s3734_s8  ;;  %s3736_s9 = smov (!%p38_p3, %s40_s9), %s2832_s27 }
  0x14   : > { %p2961_p7 = por %p215_p6, %p214_p4  ;;  %p2184_p8 = scmp.ge.s32.totalorder %s2840_s29, 1 }
  0x15   : > { %p42_p9 = scmp.ge.s32.totalorder %s3736_s9, 2  ;;  %p305_p10 = scmp.lt.s32.totalorder %s2840_s29, 17 }
  0x16   : > { %s3708_s12 = scalar_select %p2961_p7, 1, 0 }
  0x17   : > { %s3738_s9 = smov (%p42_p9, %s3736_s9), 0  ;;  %s3740_s10 = smov (!%p42_p9, %s44_s10), %s2836_s28 }
  0x18   : > { %3709 = sst [smem:[#allocation18_spill]] %s3708_s12  ;;  %p306_p11 = pnand %p2184_p8, %p305_p10 }
  0x19   : > { %3710 = sst [smem:[#allocation19_spill]] %s3738_s9  ;;  %p46_p12 = scmp.ge.s32.totalorder %s3740_s10, 2 }
  0x1a   : > { %s194_s13 = ssub.s32 %s2832_s27, %s3738_s9  ;;  %s198_s16 = sadd.s32 1, %s2804_s20 }
  0x1b   : > { %s3742_s10 = smov (%p46_p12, %s3740_s10), 0  ;;  %s3691_s30 = sand.u32 (!%p306_p11), 1, %s2800_s19  }
  0x1c   : > { %3711 = sst [smem:[#allocation20_spill]] %s3742_s10  ;;  %s193_s14 = ssub.s32 %s2836_s28, %s3742_s10 }
  0x1d   : > { %s195_s15 = sor.u32 %s194_s13, %s193_s14  ;;  %309 = sbr.rel (%p306_p11) target bundleno = 1374 (0x55e), region = 40 }
  0x1e   : > { %p196_p13 = scmp.eq.s32.totalorder %s195_s15, 0  ;;  %s2186_s6 = sshll.u32 (!%p306_p11), %s2816_s23, 4 }
  0x1f   : > { %s2984_s13 = sshll.u32 (!%p306_p11), %s3691_s30, 8  ;;  %p378_p0 = scmp.lt.s32.totalorder (!%p306_p11), %s2820_s24, 1 }
  0x20   : > { %s2978_s17 = scalar_select %p196_p13, %s2804_s20, %s198_s16  }
  0x21   : > { %p380_p1 = scmp.lt.s32.totalorder (!%p306_p11), %s2812_s22, 1  ;;  %p382_p2 = scmp.lt.s32.totalorder (!%p306_p11), %s2186_s6, 31 }
  0x22   : > { %3712 = sst [smem:[#allocation21_spill]] %s2978_s17  ;;  %p391_p3 = scmp.lt.s32.totalorder (!%p306_p11), %s2808_s21, %s2816_s23 }
  0x23   : > { %s2198_s7 = sshll.u32 (!%p306_p11), %s2812_s22, 4  ;;  %p435_p8 = scmp.eq.s32.totalorder (!%p306_p11), %s2812_s22, 0 }
  0x24   : > { %s379_s14 = scalar_select %p378_p0, %s2820_s24, 1 }
  0x25   : > { %s381_s15 = scalar_select %p380_p1, %s2812_s22, 1 }
  0x26   : > { %s2188_s16 = sshll.u32 %s379_s14, 6  ;;  %s3744_s6 = smov (!%p382_p2, %s2186_s6), 31 }
  0x27   : > { %s2187_s10 = sshll.u32 %s381_s15, 5  ;;  %p428_p6 = scmp.lt.s32.totalorder %s2198_s7, 31 }
  0x28   : > { %s392_s9 = scalar_select %p391_p3, %s2808_s21, %s2816_s23 }
  0x29   : > { %s385_s8 = sadd.s32 %s2187_s10, %s3744_s6  ;;  %s3748_s7 = smov (!%p428_p6, %s2198_s7), 31 }
  0x2a   : > { %s387_s28 = sadd.s32 %s2188_s16, %s385_s8  ;;  %s2190_s27 = sshll.u32 %s392_s9, 4 }
  0x2b   : > { %s2189_s26 = sshll.u32 %s387_s28, 3  ;;  %p398_p4 = scmp.lt.s32.totalorder %s2190_s27, 31 }
  0x2c   : > { %s2998_s17 = scalar_lea.vmem %s3680_s0, %s2189_s26  ;;  %s2213_s20 = sshll.u32 %s3748_s7, 4 }
  0x2d   : > { %s3746_s27 = smov (!%p398_p4, %s2190_s27), 31  ;;  %s3004_s9 = scalar_lea.vmem %s3683_s3, %s2213_s20 }
  0x2e   : > { %s401_s14 = sadd.s32 %s2187_s10, %s3746_s27  ;;  %p436_p9 = scmp.eq.s32.totalorder %s2808_s21, 0 }
  0x2f   : > { %s403_s15 = sadd.s32 %s2188_s16, %s401_s14  ;;  %s3018_s27 = scalar_lea.vmem [#allocation6], %s2984_s13 }
  0x30   : > { %s2193_s6 = sshll.u32 %s403_s15, 3  ;;  %p437_p10 = pnand %p436_p9, %p435_p8 }
  0x31   : > { %s3009_s29 = scalar_lea.vmem %s3681_s1, %s2193_s6  ;;  %s3014_s30 = scalar_lea.vmem %s3682_s2, %s2193_s6  ;;  %v2842_v0 = vmov (!%p437_p10), 0.0  }
  0x32   : > { %440 = sbr.rel (%p437_p10) target bundleno = 66 (0x42), region = 44  ;;  %441 = vst [vmem:[#allocation5] sm:$0xff] (!%p437_p10), %v2842_v0  ;;  %442 = vst [vmem:[#allocation5 + $0x8] sm:$0xff] (!%p437_p10), %v2842_v0 }
  0x33   : > { %443 = vst [vmem:[#allocation5 + $0x10] sm:$0xff] (!%p437_p10), %v2842_v0  ;;  %444 = vst [vmem:[#allocation5 + $0x18] sm:$0xff] (!%p437_p10), %v2842_v0 }
  0x34   : > { %445 = vst [vmem:[#allocation5 + $0x20] sm:$0xff] (!%p437_p10), %v2842_v0  ;;  %446 = vst [vmem:[#allocation5 + $0x28] sm:$0xff] (!%p437_p10), %v2842_v0 }
  0x35   : > { %447 = vst [vmem:[#allocation5 + $0x30] sm:$0xff] (!%p437_p10), %v2842_v0  ;;  %448 = vst [vmem:[#allocation5 + $0x38] sm:$0xff] (!%p437_p10), %v2842_v0 }
  0x36   : > { %449 = vst [vmem:[#allocation5 + $0x40] sm:$0xff] (!%p437_p10), %v2842_v0  ;;  %450 = vst [vmem:[#allocation5 + $0x48] sm:$0xff] (!%p437_p10), %v2842_v0 }
  0x37   : > { %451 = vst [vmem:[#allocation5 + $0x50] sm:$0xff] (!%p437_p10), %v2842_v0  ;;  %452 = vst [vmem:[#allocation5 + $0x58] sm:$0xff] (!%p437_p10), %v2842_v0 }
  0x38   : > { %453 = vst [vmem:[#allocation5 + $0x60] sm:$0xff] (!%p437_p10), %v2842_v0  ;;  %454 = vst [vmem:[#allocation5 + $0x68] sm:$0xff] (!%p437_p10), %v2842_v0 }
  0x39   : > { %455 = vst [vmem:[#allocation5 + $0x70] sm:$0xff] %v2842_v0  ;;  %456 = vst [vmem:[#allocation5 + $0x78] sm:$0xff] %v2842_v0 }
  0x3a   : > { %457 = vst [vmem:[#allocation5 + $0x80] sm:$0xff] %v2842_v0  ;;  %458 = vst [vmem:[#allocation5 + $0x88] sm:$0xff] %v2842_v0 }
  0x3b   : > { %459 = vst [vmem:[#allocation5 + $0x90] sm:$0xff] %v2842_v0  ;;  %460 = vst [vmem:[#allocation5 + $0x98] sm:$0xff] %v2842_v0 }
  0x3c   : > { %461 = vst [vmem:[#allocation5 + $0xa0] sm:$0xff] %v2842_v0  ;;  %462 = vst [vmem:[#allocation5 + $0xa8] sm:$0xff] %v2842_v0 }
  0x3d   : > { %463 = vst [vmem:[#allocation5 + $0xb0] sm:$0xff] %v2842_v0  ;;  %464 = vst [vmem:[#allocation5 + $0xb8] sm:$0xff] %v2842_v0 }
  0x3e   : > { %465 = vst [vmem:[#allocation5 + $0xc0] sm:$0xff] %v2842_v0  ;;  %466 = vst [vmem:[#allocation5 + $0xc8] sm:$0xff] %v2842_v0 }
  0x3f   : > { %467 = vst [vmem:[#allocation5 + $0xd0] sm:$0xff] %v2842_v0  ;;  %468 = vst [vmem:[#allocation5 + $0xd8] sm:$0xff] %v2842_v0 }
  0x40   : > { %469 = vst [vmem:[#allocation5 + $0xe0] sm:$0xff] %v2842_v0  ;;  %470 = vst [vmem:[#allocation5 + $0xe8] sm:$0xff] %v2842_v0 }
  0x41   : > { %471 = vst [vmem:[#allocation5 + $0xf0] sm:$0xff] %v2842_v0  ;;  %472 = vst [vmem:[#allocation5 + $0xf8] sm:$0xff] %v2842_v0 }
  0x42 PF: > { %p2201_p11 = scmp.ne.s32.totalorder %s2808_s21, 0 }
  0x43   : > { %vm476_vm0 = vcmask (!%p2201_p11), 7168   ;;  %v2843_v1 = vmov (!%p2201_p11), -1e+30   ;;  %v2844_v2 = vmov (!%p2201_p11), 0.0  }
  0x44   : > { %475 = sbr.rel (%p2201_p11) target bundleno = 92 (0x5c), region = 48  ;;  %477 = vst.msk [vmem:[#allocation2] sm:$0xff] (!%p2201_p11), %vm476_vm0, %v2843_v1  ;;  %478 = vst.msk [vmem:[#allocation2 + $0x8] sm:$0xff] (!%p2201_p11), %vm476_vm0, %v2843_v1 }
  0x45   : > { %479 = vst.msk [vmem:[#allocation2 + $0x10] sm:$0xff] (!%p2201_p11), %vm476_vm0, %v2843_v1  ;;  %480 = vst.msk [vmem:[#allocation2 + $0x18] sm:$0xff] (!%p2201_p11), %vm476_vm0, %v2843_v1 }
  0x46   : > { %481 = vst.msk [vmem:[#allocation2 + $0x20] sm:$0xff] (!%p2201_p11), %vm476_vm0, %v2843_v1  ;;  %482 = vst.msk [vmem:[#allocation2 + $0x28] sm:$0xff] (!%p2201_p11), %vm476_vm0, %v2843_v1 }
  0x47   : > { %483 = vst.msk [vmem:[#allocation2 + $0x30] sm:$0xff] (!%p2201_p11), %vm476_vm0, %v2843_v1  ;;  %484 = vst.msk [vmem:[#allocation2 + $0x38] sm:$0xff] (!%p2201_p11), %vm476_vm0, %v2843_v1 }
  0x48   : > { %485 = vst.msk [vmem:[#allocation2 + $0x40] sm:$0xff] (!%p2201_p11), %vm476_vm0, %v2843_v1  ;;  %486 = vst.msk [vmem:[#allocation2 + $0x48] sm:$0xff] (!%p2201_p11), %vm476_vm0, %v2843_v1 }
  0x49   : > { %487 = vst.msk [vmem:[#allocation2 + $0x50] sm:$0xff] (!%p2201_p11), %vm476_vm0, %v2843_v1  ;;  %488 = vst.msk [vmem:[#allocation2 + $0x58] sm:$0xff] (!%p2201_p11), %vm476_vm0, %v2843_v1 }
  0x4a   : > { %489 = vst.msk [vmem:[#allocation2 + $0x60] sm:$0xff] (!%p2201_p11), %vm476_vm0, %v2843_v1  ;;  %490 = vst.msk [vmem:[#allocation2 + $0x68] sm:$0xff] (!%p2201_p11), %vm476_vm0, %v2843_v1 }
  0x4b   : > { %491 = vst.msk [vmem:[#allocation2 + $0x70] sm:$0xff] %vm476_vm0, %v2843_v1  ;;  %492 = vst.msk [vmem:[#allocation2 + $0x78] sm:$0xff] %vm476_vm0, %v2843_v1 }
  0x4c   : > { %493 = vst.msk [vmem:[#allocation3] sm:$0xff] %vm476_vm0, %v2844_v2  ;;  %494 = vst.msk [vmem:[#allocation3 + $0x8] sm:$0xff] %vm476_vm0, %v2844_v2 }
  0x4d   : > { %495 = vst.msk [vmem:[#allocation3 + $0x10] sm:$0xff] %vm476_vm0, %v2844_v2  ;;  %496 = vst.msk [vmem:[#allocation3 + $0x18] sm:$0xff] %vm476_vm0, %v2844_v2 }
  0x4e   : > { %497 = vst.msk [vmem:[#allocation3 + $0x20] sm:$0xff] %vm476_vm0, %v2844_v2  ;;  %498 = vst.msk [vmem:[#allocation3 + $0x28] sm:$0xff] %vm476_vm0, %v2844_v2 }
  0x4f   : > { %499 = vst.msk [vmem:[#allocation3 + $0x30] sm:$0xff] %vm476_vm0, %v2844_v2  ;;  %500 = vst.msk [vmem:[#allocation3 + $0x38] sm:$0xff] %vm476_vm0, %v2844_v2 }
  0x50   : > { %501 = vst.msk [vmem:[#allocation3 + $0x40] sm:$0xff] %vm476_vm0, %v2844_v2  ;;  %502 = vst.msk [vmem:[#allocation3 + $0x48] sm:$0xff] %vm476_vm0, %v2844_v2 }
  0x51   : > { %503 = vst.msk [vmem:[#allocation3 + $0x50] sm:$0xff] %vm476_vm0, %v2844_v2  ;;  %504 = vst.msk [vmem:[#allocation3 + $0x58] sm:$0xff] %vm476_vm0, %v2844_v2 }
  0x52   : > { %505 = vst.msk [vmem:[#allocation3 + $0x60] sm:$0xff] %vm476_vm0, %v2844_v2  ;;  %506 = vst.msk [vmem:[#allocation3 + $0x68] sm:$0xff] %vm476_vm0, %v2844_v2 }
  0x53   : > { %507 = vst.msk [vmem:[#allocation3 + $0x70] sm:$0xff] %vm476_vm0, %v2844_v2  ;;  %508 = vst.msk [vmem:[#allocation3 + $0x78] sm:$0xff] %vm476_vm0, %v2844_v2 }
  0x54   : > { %509 = vst [vmem:[#allocation4] sm:$0xff] %v2844_v2  ;;  %510 = vst [vmem:[#allocation4 + $0x8] sm:$0xff] %v2844_v2 }
  0x55   : > { %511 = vst [vmem:[#allocation4 + $0x10] sm:$0xff] %v2844_v2  ;;  %512 = vst [vmem:[#allocation4 + $0x18] sm:$0xff] %v2844_v2 }
  0x56   : > { %513 = vst [vmem:[#allocation4 + $0x20] sm:$0xff] %v2844_v2  ;;  %514 = vst [vmem:[#allocation4 + $0x28] sm:$0xff] %v2844_v2 }
  0x57   : > { %515 = vst [vmem:[#allocation4 + $0x30] sm:$0xff] %v2844_v2  ;;  %516 = vst [vmem:[#allocation4 + $0x38] sm:$0xff] %v2844_v2 }
  0x58   : > { %517 = vst [vmem:[#allocation4 + $0x40] sm:$0xff] %v2844_v2  ;;  %518 = vst [vmem:[#allocation4 + $0x48] sm:$0xff] %v2844_v2 }
  0x59   : > { %519 = vst [vmem:[#allocation4 + $0x50] sm:$0xff] %v2844_v2  ;;  %520 = vst [vmem:[#allocation4 + $0x58] sm:$0xff] %v2844_v2 }
  0x5a   : > { %521 = vst [vmem:[#allocation4 + $0x60] sm:$0xff] %v2844_v2  ;;  %522 = vst [vmem:[#allocation4 + $0x68] sm:$0xff] %v2844_v2 }
  0x5b   : > { %523 = vst [vmem:[#allocation4 + $0x70] sm:$0xff] %v2844_v2  ;;  %524 = vst [vmem:[#allocation4 + $0x78] sm:$0xff] %v2844_v2 }
  0x5c PF: > { %s2202_s18 = sshll.u32 %s2808_s21, 7  ;;  %s2203_s20 = sshll.u32 %s2816_s23, 7 }
  0x5d   : > { %s527_s7 = sadd.s32 127, %s2203_s20 }
  0x5e   : > { %p2204_p12 = scmp.gt.s32.totalorder %s2202_s18, %s527_s7 }
  0x5f   : > { %v548_v3 = vld [vmem:[%s3009_s29] sm:$0xff] (!%p2204_p12)  ;;  %v549_v4 = vld [vmem:[%s3009_s29 + $0x8] sm:$0xff] (!%p2204_p12)  ;;  %v550_v5 = vld [vmem:[%s3009_s29 + $0x10] sm:$0xff] (!%p2204_p12)  ;;  %v741_v43 = vlaneseq (!%p2204_p12)  ;;  %v3095_v46 = vstv (!%p2204_p12), %s2203_s20 }
  0x60   : > { %531 = sbr.rel (%p2204_p12) target bundleno = 926 (0x39e), region = 52  ;;  %v2391_v6 = vpack.c.bf16 (!%p2204_p12), %v549_v4, %v548_v3  ;;  %v551_v7 = vld [vmem:[%s3009_s29 + $0x18] sm:$0xff] (!%p2204_p12)  ;;  %v532_v9 = vld [vmem:[%s2998_s17] sm:$0xff] (!%p2204_p12)  ;;  %v553_v11 = vld [vmem:[%s3009_s29 + $0x28] sm:$0xff] (!%p2204_p12)  ;;  %v777_v47 = vstv (!%p2204_p12), %s2202_s18 }
  0x61   : > { %v2395_v8 = vpack.c.bf16 (!%p2204_p12), %v551_v7, %v550_v5  ;;  %v552_v10 = vld [vmem:[%s3009_s29 + $0x20] sm:$0xff] (!%p2204_p12)  ;;  %2311 = vmatprep.mubr.f32.mxu0 (!%p2204_p12), %v532_v9  ;;  %v554_v13 = vld [vmem:[%s3009_s29 + $0x30] sm:$0xff] (!%p2204_p12)  ;;  %v555_v14 = vld [vmem:[%s3009_s29 + $0x38] sm:$0xff] (!%p2204_p12)  ;;  %v3091_v44 = vshrl.u32 (!%p2204_p12), %v741_v43, 7  ;;  %v776_v45 = vand.u32 (!%p2204_p12), 127, %v741_v43 }
  0x62   : > { %2392 = vmatprep.subr.bf16.mxu0 (!%p2204_p12), %v2391_v6  ;;  %v2399_v12 = vpack.c.bf16 (!%p2204_p12), %v553_v11, %v552_v10  ;;  %v2403_v15 = vpack.c.bf16 (!%p2204_p12), %v555_v14, %v554_v13  ;;  %v556_v16 = vld [vmem:[%s3009_s29 + $0x40] sm:$0xff] (!%p2204_p12)  ;;  %v557_v17 = vld [vmem:[%s3009_s29 + $0x48] sm:$0xff] (!%p2204_p12)  ;;  %v558_v19 = vld [vmem:[%s3009_s29 + $0x50] sm:$0xff] (!%p2204_p12) }
  0x63   : > { %2394 = vmatpush3.bf16.xpose.msra.mxu0 (!%p2204_p12), %v2391_v6  ;;  %v2407_v18 = vpack.c.bf16 (!%p2204_p12), %v557_v17, %v556_v16  ;;  %v559_v20 = vld [vmem:[%s3009_s29 + $0x58] sm:$0xff] (!%p2204_p12)  ;;  %v560_v22 = vld [vmem:[%s3009_s29 + $0x60] sm:$0xff] (!%p2204_p12)  ;;  %v561_v23 = vld [vmem:[%s3009_s29 + $0x68] sm:$0xff] (!%p2204_p12)  ;;  %v745_v48 = vadd.s32 (!%p2204_p12), 24, %v3091_v44  ;;  %v759_v49 = vadd.s32 (!%p2204_p12), %v3095_v46, %v3091_v44  ;;  %v3102_v50 = vadd.s32 (!%p2204_p12), %v777_v47, %v776_v45 }
  0x64   : > { %2396 = vmatprep.subr.bf16.mxu0 (!%p2204_p12), %v2395_v8  ;;  %v2411_v21 = vpack.c.bf16 (!%p2204_p12), %v559_v20, %v558_v19  ;;  %v2415_v24 = vpack.c.bf16 (!%p2204_p12), %v561_v23, %v560_v22  ;;  %v562_v25 = vld [vmem:[%s3009_s29 + $0x70] sm:$0xff] (!%p2204_p12)  ;;  %v563_v26 = vld [vmem:[%s3009_s29 + $0x78] sm:$0xff] (!%p2204_p12)  ;;  %v533_v28 = vld [vmem:[%s2998_s17 + $0x8] sm:$0xff] (!%p2204_p12)  ;;  %v743_v51 = vadd.s32 (!%p2204_p12), 8, %v3091_v44  ;;  %v744_v52 = vadd.s32 (!%p2204_p12), 16, %v3091_v44 }
  0x65   : > { %v2419_v27 = vpack.c.bf16 (!%p2204_p12), %v563_v26, %v562_v25  ;;  %v534_v29 = vld [vmem:[%s2998_s17 + $0x10] sm:$0xff] (!%p2204_p12)  ;;  %v535_v30 = vld [vmem:[%s2998_s17 + $0x18] sm:$0xff] (!%p2204_p12)  ;;  %v536_v31 = vld [vmem:[%s2998_s17 + $0x20] sm:$0xff] (!%p2204_p12)  ;;  %v762_v54 = vadd.s32 (!%p2204_p12), %v3095_v46, %v745_v48  ;;  %vm779_vm1 = vcmp.ge.s32.totalorder (!%p2204_p12), %v759_v49, %v3102_v50  ;;  %v746_v57 = vadd.s32 (!%p2204_p12), 32, %v3091_v44 }
  0x66   : > { %v537_v32 = vld [vmem:[%s2998_s17 + $0x28] sm:$0xff] (!%p2204_p12)  ;;  %v538_v33 = vld [vmem:[%s2998_s17 + $0x30] sm:$0xff] (!%p2204_p12)  ;;  %v539_v34 = vld [vmem:[%s2998_s17 + $0x38] sm:$0xff] (!%p2204_p12)  ;;  %v760_v56 = vadd.s32 (!%p2204_p12), %v3095_v46, %v743_v51  ;;  %v761_v59 = vadd.s32 (!%p2204_p12), %v3095_v46, %v744_v52  ;;  %v747_v60 = vadd.s32 (!%p2204_p12), 40, %v3091_v44  ;;  %v748_v3 = vadd.s32 (!%p2204_p12), 48, %v3091_v44 }
  0x67   : > { %v540_v35 = vld [vmem:[%s2998_s17 + $0x40] sm:$0xff]  ;;  %v541_v36 = vld [vmem:[%s2998_s17 + $0x48] sm:$0xff]  ;;  %v542_v37 = vld [vmem:[%s2998_s17 + $0x50] sm:$0xff]  ;;  %vm782_vm2 = vcmp.ge.s32.totalorder %v762_v54, %v3102_v50  ;;  %v763_v2 = vadd.s32 %v3095_v46, %v746_v57  ;;  %v749_v6 = vadd.s32 56, %v3091_v44  ;;  %v750_v10 = vadd.s32 64, %v3091_v44 }
  0x68   : > { %v543_v38 = vld [vmem:[%s2998_s17 + $0x58] sm:$0xff]  ;;  %v544_v39 = vld [vmem:[%s2998_s17 + $0x60] sm:$0xff]  ;;  %v545_v40 = vld [vmem:[%s2998_s17 + $0x68] sm:$0xff]  ;;  %vm780_vm3 = vcmp.ge.s32.totalorder %v760_v56, %v3102_v50  ;;  %vm781_vm4 = vcmp.ge.s32.totalorder %v761_v59, %v3102_v50  ;;  %v764_v5 = vadd.s32 %v3095_v46, %v747_v60  ;;  %v765_v14 = vadd.s32 %v3095_v46, %v748_v3 }
  0x69   : > { %v546_v41 = vld [vmem:[%s2998_s17 + $0x70] sm:$0xff]  ;;  %v547_v42 = vld [vmem:[%s2998_s17 + $0x78] sm:$0xff]  ;;  %vm783_vm5 = vcmp.ge.s32.totalorder %v763_v2, %v3102_v50  ;;  %v766_v16 = vadd.s32 %v3095_v46, %v749_v6  ;;  %v751_v17 = vadd.s32 72, %v3091_v44  ;;  %v767_v20 = vadd.s32 %v3095_v46, %v750_v10  ;;  %v564_v3 = vld [vmem:[%s3014_s30] sm:$0xff] }
  0x6a   : > { %vm784_vm6 = vcmp.ge.s32.totalorder %v764_v5, %v3102_v50  ;;  %vm785_vm7 = vcmp.ge.s32.totalorder %v765_v14, %v3102_v50  ;;  %v757_v51 = vadd.s32 120, %v3091_v44  ;;  %v566_v5 = vld [vmem:[%s3014_s30 + $0x10] sm:$0xff] }
  0x6b   : > { %2398 = vmatpush3.bf16.xpose.msra.mxu0 %v2395_v8  ;;  %vm786_vm8 = vcmp.ge.s32.totalorder %v766_v16, %v3102_v50  ;;  %v768_v26 = vadd.s32 %v3095_v46, %v751_v17  ;;  %vm787_vm9 = vcmp.ge.s32.totalorder %v767_v20, %v3102_v50  ;;  %v570_v14 = vld [vmem:[%s3014_s30 + $0x30] sm:$0xff]  ;;  %v3205_v17 = vld [vmem:[#allocation2] sm:$0xff] }
  0x6c   : > { %2400 = vmatprep.subr.bf16.mxu0 %v2399_v12 }
  0x6d   : > { %vm788_vm10 = vcmp.ge.s32.totalorder %v768_v26, %v3102_v50  ;;  %v573_v26 = vld [vmem:[%s3014_s30 + $0x48] sm:$0xff] }
  0x73   : > { %2402 = vmatpush3.bf16.xpose.msra.mxu0 %v2399_v12 }
  0x74   : > { %2404 = vmatprep.subr.bf16.mxu0 %v2403_v15 }
  0x7b   : > { %2406 = vmatpush3.bf16.xpose.msra.mxu0 %v2403_v15 }
  0x7c   : > { %2408 = vmatprep.subr.bf16.mxu0 %v2407_v18 }
  0x83   : > { %2410 = vmatpush3.bf16.xpose.msra.mxu0 %v2407_v18 }
  0x84   : > { %2412 = vmatprep.subr.bf16.mxu0 %v2411_v21 }
  0x8b   : > { %2414 = vmatpush3.bf16.xpose.msra.mxu0 %v2411_v21 }
  0x8c   : > { %2416 = vmatprep.subr.bf16.mxu0 %v2415_v24 }
  0x93   : > { %2418 = vmatpush3.bf16.xpose.msra.mxu0 %v2415_v24  ;;  %v752_v24 = vadd.s32 80, %v3091_v44 }
  0x94   : > { %2420 = vmatprep.subr.bf16.mxu0 %v2419_v27 }
  0x9b   : > { %2422 = vmatpush3.bf16.xpose.msra.mxu0 %v2419_v27  ;;  %v753_v27 = vadd.s32 88, %v3091_v44 }
  0xa2   : > { %2312 = vmatmul.mubr.f32.vlgmr.msra.gmra.mrb[0].mxu0 %v533_v28 }
  0xa3   : > { %2314 = vmatprep.mubr.f32.mxu0 %v534_v29 }
  0xa6   : > { %2315 = vmatmul.mubr.f32.gmra.mrb[2].mxu0 %v535_v30 }
  0xa7   : > { %2317 = vmatprep.mubr.f32.mxu0 %v536_v31 }
  0xaa   : > { %2318 = vmatmul.mubr.f32.gmra.mrb[4].mxu0 %v537_v32 }
  0xab   : > { %2320 = vmatprep.mubr.f32.mxu0 %v538_v33  ;;  %v769_v33 = vadd.s32 %v3095_v46, %v752_v24 }
  0xad   : > { %vm789_vm11 = vcmp.ge.s32.totalorder %v769_v33, %v3102_v50  ;;  %v3225_v33 = vld [vmem:[#allocation2 + $0x10] sm:$0xff] }
  0xae   : > { %2321 = vmatmul.mubr.f32.gmra.mrb[6].mxu0 %v539_v34  ;;  %v754_v34 = vadd.s32 96, %v3091_v44 }
  0xaf   : > { %2323 = vmatprep.mubr.f32.mxu0 %v540_v35 }
  0xb0   : > { %v771_v47 = vadd.s32 %v3095_v46, %v754_v34  ;;  %v3229_v34 = vld [vmem:[#allocation2 + $0x20] sm:$0xff] }
  0xb2   : > { %2324 = vmatmul.mubr.f32.gmra.mrb[8].mxu0 %v541_v36  ;;  %v770_v36 = vadd.s32 %v3095_v46, %v753_v27  ;;  %vm791_vm13 = vcmp.ge.s32.totalorder %v771_v47, %v3102_v50  ;;  %v3246_v47 = vld [vmem:[#allocation2 + $0x30] sm:$0xff] }
  0xb3   : > { %2326 = vmatprep.mubr.f32.mxu0 %v542_v37  ;;  %v755_v37 = vadd.s32 104, %v3091_v44 }
  0xb4   : > { %vm790_vm12 = vcmp.ge.s32.totalorder %v770_v36, %v3102_v50  ;;  %v574_v36 = vld [vmem:[%s3014_s30 + $0x50] sm:$0xff] }
  0xb5   : > { %v772_v49 = vadd.s32 %v3095_v46, %v755_v37  ;;  %v575_v37 = vld [vmem:[%s3014_s30 + $0x58] sm:$0xff] }
  0xb6   : > { %2327 = vmatmul.mubr.f32.gmra.mrb[10].mxu0 %v543_v38 }
  0xb7   : > { %2329 = vmatprep.mubr.f32.mxu0 %v544_v39  ;;  %vm792_vm14 = vcmp.ge.s32.totalorder %v772_v49, %v3102_v50  ;;  %v576_v49 = vld [vmem:[%s3014_s30 + $0x60] sm:$0xff] }
  0xba   : > { %2330 = vmatmul.mubr.f32.gmra.mrb[12].mxu0 %v545_v40  ;;  %v756_v40 = vadd.s32 112, %v3091_v44  ;;  %v774_v44 = vadd.s32 %v3095_v46, %v757_v51  ;;  %v577_v51 = vld [vmem:[%s3014_s30 + $0x68] sm:$0xff] }
  0xbb   : > { %2332 = vmatprep.mubr.f32.mxu0 %v546_v41  ;;  %v2845_v41 = vmov 0  }
  0xbc   : > { %2614 = vset.pattern.permute.xlu0 %v2845_v41  ;;  %2615 = vset.pattern.permute.xlu1 %v2845_v41  ;;  %v773_v57 = vadd.s32 %v3095_v46, %v756_v40  ;;  %vm794_vm0 = vcmp.ge.s32.totalorder %v774_v44, %v3102_v50  ;;  %v2443_v41 = vpack.c.bf16 %v575_v37, %v574_v36  ;;  %v3260_v44 = vld [vmem:[#allocation2 + $0x40] sm:$0xff] }
  0xbe   : > { %2333 = vmatmul.mubr.f32.gmra.mrb[14].mxu0 %v547_v42  ;;  %vm793_vm15 = vcmp.ge.s32.totalorder %v773_v57, %v3102_v50  ;;  %v568_v50 = vld [vmem:[%s3014_s30 + $0x20] sm:$0xff]  ;;  %v3254_v57 = vld [vmem:[#allocation2 + $0x38] sm:$0xff] }
 0x175   : > { %v2313_v53 = vpop.f32.mrb[0].mxu0 }
 0x176   : > { %v646_v55 = vpop.f32.mrb[1].mxu0  ;;  %v726_v61 = vmul.f32 0.088388346, %v2313_v53 }
 0x177   : > { %v725_v58 = vmul.f32 0.088388346, %v646_v55 }
 0x178   : > { %v3125_v8 = vsel %vm780_vm3, %v726_v61, -1e+30 }
 0x179   : > { %v2316_v62 = vpop.f32.mrb[2].mxu0  ;;  %v3112_v63 = vsel %vm779_vm1, %v725_v58, -1e+30  ;;  %vm1131_vm1 = vcmask 7168  }
 0x17a   : > { %v728_v0 = vmul.f32 0.088388346, %v2316_v62  ;;  %827 = vmax.xlane.f32.xlu0 %v3112_v63  ;;  %v656_v1 = vpop.f32.mrb[3].mxu0 }
 0x17b   : > { %v727_v4 = vmul.f32 0.088388346, %v656_v1 }
 0x17c   : > { %v3122_v7 = vsel %vm782_vm2, %v728_v0, -1e+30 }
 0x17d   : > { %833 = vmax.xlane.f32.xlu1 %v3122_v7  ;;  %v2319_v9 = vpop.f32.mrb[4].mxu0  ;;  %v3129_v11 = vsel %vm781_vm4, %v727_v4, -1e+30  ;;  %v565_v4 = vld [vmem:[%s3014_s30 + $0x8] sm:$0xff] }
 0x17e   : > { %829 = vmax.xlane.f32.xlu0 %v3125_v8  ;;  %v730_v12 = vmul.f32 0.088388346, %v2319_v9  ;;  %v666_v13 = vpop.f32.mrb[5].mxu0  ;;  %v2423_v6 = vpack.c.bf16 %v565_v4, %v564_v3  ;;  %v567_v9 = vld [vmem:[%s3014_s30 + $0x18] sm:$0xff] }
 0x17f   : > { %v729_v15 = vmul.f32 0.088388346, %v666_v13  ;;  %v2427_v10 = vpack.c.bf16 %v567_v9, %v566_v5  ;;  %v820_v5 = vld [vmem:[#allocation2 + $0x48] sm:$0xff]  ;;  %v3272_v9 = vld [vmem:[#allocation2 + $0x50] sm:$0xff] }
 0x180   : > { %v3140_v21 = vsel %vm784_vm6, %v730_v12, -1e+30  ;;  %v569_v12 = vld [vmem:[%s3014_s30 + $0x28] sm:$0xff]  ;;  %2424 = vmatprep.subr.bf16.mxu1 %v2423_v6 }
 0x181   : > { %831 = vmax.xlane.f32.xlu1 %v3129_v11  ;;  %v2322_v18 = vpop.f32.mrb[6].mxu0  ;;  %v3137_v19 = vsel %vm783_vm5, %v729_v15, -1e+30  ;;  %2426 = vmatpush3.bf16.msra.mxu1 %v2423_v6  ;;  %v2431_v13 = vpack.c.bf16 %v569_v12, %v568_v50  ;;  %v571_v15 = vld [vmem:[%s3014_s30 + $0x38] sm:$0xff] }
 0x182   : > { %v732_v22 = vmul.f32 0.088388346, %v2322_v18  ;;  %v676_v23 = vpop.f32.mrb[7].mxu0  ;;  %835 = vmax.xlane.f32.xlu0 %v3137_v19  ;;  %2428 = vmatprep.subr.bf16.mxu1 %v2427_v10  ;;  %v2435_v16 = vpack.c.bf16 %v571_v15, %v570_v14  ;;  %v822_v14 = vld [vmem:[#allocation2 + $0x58] sm:$0xff] }
 0x183   : > { %v731_v25 = vmul.f32 0.088388346, %v676_v23  ;;  %v3212_v23 = vld [vmem:[#allocation2 + $0x8] sm:$0xff] }
 0x184   : > { %v3152_v30 = vsel %vm786_vm8, %v732_v22, -1e+30  ;;  %v3210_v22 = vld [vmem:[#allocation2 + $0x18] sm:$0xff] }
 0x185   : > { %837 = vmax.xlane.f32.xlu1 %v3140_v21  ;;  %v2325_v28 = vpop.f32.mrb[8].mxu0  ;;  %v3149_v29 = vsel %vm785_vm7, %v731_v25, -1e+30  ;;  %2430 = vmatpush3.bf16.msra.mxu1 %v2427_v10  ;;  %v572_v25 = vld [vmem:[%s3014_s30 + $0x40] sm:$0xff] }
 0x186   : > { %v734_v31 = vmul.f32 0.088388346, %v2325_v28  ;;  %v686_v32 = vpop.f32.mrb[9].mxu0  ;;  %839 = vmax.xlane.f32.xlu0 %v3149_v29  ;;  %2432 = vmatprep.subr.bf16.mxu1 %v2431_v13 }
 0x187   : > { %v733_v35 = vmul.f32 0.088388346, %v686_v32 }
 0x188   : > { %v3164_v42 = vsel %vm788_vm10, %v734_v31, -1e+30  ;;  %v2439_v31 = vpack.c.bf16 %v573_v26, %v572_v25  ;;  %v824_v26 = vld [vmem:[#allocation2 + $0x68] sm:$0xff] }
 0x189   : > { %841 = vmax.xlane.f32.xlu1 %v3152_v30  ;;  %v2328_v38 = vpop.f32.mrb[10].mxu0  ;;  %v3161_v39 = vsel %vm787_vm9, %v733_v35, -1e+30  ;;  %2434 = vmatpush3.bf16.msra.mxu1 %v2431_v13 }
 0x18a   : > { %v736_v43 = vmul.f32 0.088388346, %v2328_v38  ;;  %v696_v45 = vpop.f32.mrb[11].mxu0  ;;  %843 = vmax.xlane.f32.xlu0 %v3161_v39  ;;  %2436 = vmatprep.subr.bf16.mxu1 %v2435_v16 }
 0x18b   : > { %v735_v48 = vmul.f32 0.088388346, %v696_v45 }
 0x18c   : > { %v3175_v54 = vsel %vm790_vm12, %v736_v43, -1e+30  ;;  %v3239_v43 = vld [vmem:[#allocation2 + $0x28] sm:$0xff] }
 0x18d   : > { %845 = vmax.xlane.f32.xlu1 %v3164_v42  ;;  %v2331_v52 = vpop.f32.mrb[12].mxu0  ;;  %v3173_v53 = vsel %vm789_vm11, %v735_v48, -1e+30  ;;  %2438 = vmatpush3.bf16.msra.mxu1 %v2435_v16  ;;  %v3282_v16 = vld [vmem:[#allocation2 + $0x60] sm:$0xff] }
 0x18e   : > { %v738_v55 = vmul.f32 0.088388346, %v2331_v52  ;;  %v706_v56 = vpop.f32.mrb[13].mxu0  ;;  %847 = vmax.xlane.f32.xlu0 %v3173_v53  ;;  %2440 = vmatprep.subr.bf16.mxu1 %v2439_v31 }
 0x18f   : > { %v737_v58 = vmul.f32 0.088388346, %v706_v56  ;;  %v2447_v56 = vpack.c.bf16 %v577_v51, %v576_v49 }
 0x190   : > { %v3185_v61 = vsel %vm792_vm14, %v738_v55, -1e+30 }
 0x191   : > { %849 = vmax.xlane.f32.xlu1 %v3175_v54  ;;  %v2334_v59 = vpop.f32.mrb[14].mxu0  ;;  %v3183_v60 = vsel %vm791_vm13, %v737_v58, -1e+30  ;;  %2442 = vmatpush3.bf16.msra.mxu1 %v2439_v31  ;;  %v3293_v31 = vld [vmem:[#allocation2 + $0x70] sm:$0xff] }
 0x192   : > { %v740_v62 = vmul.f32 0.088388346, %v2334_v59  ;;  %851 = vmax.xlane.f32.xlu0 %v3183_v60  ;;  %v716_v0 = vpop.f32.mrb[15].mxu0  ;;  %2444 = vmatprep.subr.bf16.mxu1 %v2443_v41 }
 0x193   : > { %v739_v46 = vmul.f32 0.088388346, %v716_v0  ;;  %v579_v0 = vld [vmem:[%s3014_s30 + $0x78] sm:$0xff] }
 0x194   : > { %v3193_v2 = vsel %vm794_vm0, %v740_v62, -1e+30  ;;  %v578_v62 = vld [vmem:[%s3014_s30 + $0x70] sm:$0xff] }
 0x195   : > { %853 = vmax.xlane.f32.xlu1 %v3185_v61  ;;  %v3191_v1 = vsel %vm793_vm15, %v739_v46, -1e+30  ;;  %2446 = vmatpush3.bf16.msra.mxu1 %v2443_v41  ;;  %v2451_v4 = vpack.c.bf16 %v579_v0, %v578_v62 }
 0x196   : > { %855 = vmax.xlane.f32.xlu0 %v3191_v1  ;;  %2448 = vmatprep.subr.bf16.mxu1 %v2447_v56 }
 0x199   : > { %857 = vmax.xlane.f32.xlu1 %v3193_v2  ;;  %2450 = vmatpush3.bf16.msra.mxu1 %v2447_v56 }
 0x19a   : > { %2452 = vmatprep.subr.bf16.mxu1 %v2451_v4 }
 0x19d   : > { %2454 = vmatpush3.bf16.msra.mxu1 %v2451_v4 }
 0x207   : > { %v828_v18 = vpop.xlane.xlu0 %827 }
 0x208   : > { %v3208_v20 = vmax.f32 %v3205_v17, %v828_v18 }
 0x20a   : > { %1437 = vst.msk [vmem:[#allocation2] sm:$0xff] %vm1131_vm1, %v3208_v20  ;;  %v834_v24 = vpop.xlane.xlu1 %833  ;;  %925 = vperm.xlu0 %2614, %v3208_v20   ;;  %v875_v10 = vsub.f32 %v3205_v17, %v3208_v20 }
 0x20b   : > { %v3220_v27 = vmax.f32 %v3210_v22, %v834_v24  ;;  %v830_v28 = vpop.xlane.xlu0 %829 }
 0x20c   : > { %v3223_v32 = vmax.f32 %v3212_v23, %v830_v28  ;;  %v891_v18 = vmul.f32 1.442695, %v875_v10 }
 0x20d   : > { %1440 = vst.msk [vmem:[#allocation2 + $0x18] sm:$0xff] %vm1131_vm1, %v3220_v27  ;;  %v878_v17 = vsub.f32 %v3210_v22, %v3220_v27 }
 0x20e   : > { %1438 = vst.msk [vmem:[#allocation2 + $0x8] sm:$0xff] %vm1131_vm1, %v3223_v32  ;;  %v832_v35 = vpop.xlane.xlu1 %831  ;;  %930 = vperm.xlu1 %2615, %v3223_v32   ;;  %2616 = vpow2.f32 %v891_v18 }
 0x20f   : > { %v3237_v38 = vmax.f32 %v3225_v33, %v832_v35  ;;  %v836_v40 = vpop.xlane.xlu0 %835  ;;  %v897_v35 = vmul.f32 1.442695, %v878_v17 }
 0x210   : > { %v3242_v45 = vmax.f32 %v3229_v34, %v836_v40  ;;  %v3298_v40 = vld [vmem:[#allocation2 + $0x78] sm:$0xff] }
 0x211   : > { %1439 = vst.msk [vmem:[#allocation2 + $0x10] sm:$0xff] %vm1131_vm1, %v3237_v38  ;;  %2618 = vpow2.f32 %v897_v35 }
 0x212   : > { %v838_v48 = vpop.xlane.xlu1 %837  ;;  %940 = vperm.xlu1 %2615, %v3220_v27   ;;  %1441 = vst.msk [vmem:[#allocation2 + $0x20] sm:$0xff] %vm1131_vm1, %v3242_v45  ;;  %v879_v4 = vsub.f32 %v3229_v34, %v3242_v45 }
 0x213   : > { %v864_v52 = vmax.f32 %v3239_v43, %v838_v48  ;;  %v840_v55 = vpop.xlane.xlu0 %839 }
 0x214   : > { %v3257_v58 = vmax.f32 %v3246_v47, %v840_v55  ;;  %v899_v10 = vmul.f32 1.442695, %v879_v4 }
 0x215   : > { %1442 = vst.msk [vmem:[#allocation2 + $0x28] sm:$0xff] %vm1131_vm1, %v864_v52  ;;  %v880_v22 = vsub.f32 %v3239_v43, %v864_v52 }
 0x216   : > { %v842_v59 = vpop.xlane.xlu1 %841  ;;  %935 = vperm.xlu1 %2615, %v3237_v38   ;;  %1443 = vst.msk [vmem:[#allocation2 + $0x30] sm:$0xff] %vm1131_vm1, %v3257_v58 }
 0x217   : > { %v866_v46 = vmax.f32 %v3254_v57, %v842_v59  ;;  %v844_v3 = vpop.xlane.xlu0 %843  ;;  %v901_v48 = vmul.f32 1.442695, %v880_v22 }
 0x218   : > { %v3269_v6 = vmax.f32 %v3260_v44, %v844_v3 }
 0x219   : > { %1444 = vst.msk [vmem:[#allocation2 + $0x38] sm:$0xff] %vm1131_vm1, %v866_v46  ;;  %v882_v49 = vsub.f32 %v3254_v57, %v866_v46  ;;  %2620 = vpow2.f32 %v901_v48 }
 0x21a   : > { %v846_v50 = vpop.xlane.xlu1 %845  ;;  %950 = vperm.xlu1 %2615, %v864_v52   ;;  %1445 = vst.msk [vmem:[#allocation2 + $0x40] sm:$0xff] %vm1131_vm1, %v3269_v6  ;;  %v876_v52 = vsub.f32 %v3212_v23, %v3223_v32  ;;  %v877_v23 = vsub.f32 %v3225_v33, %v3237_v38  ;;  %v3323_v32 = vpop.eup %2616 }
 0x21b   : > { %v868_v12 = vmax.f32 %v820_v5, %v846_v50  ;;  %v848_v13 = vpop.xlane.xlu0 %847  ;;  %v905_v57 = vmul.f32 1.442695, %v882_v49  ;;  %v881_v50 = vsub.f32 %v3246_v47, %v3257_v58 }
 0x21c   : > { %v3279_v15 = vmax.f32 %v3272_v9, %v848_v13  ;;  %v893_v62 = vmul.f32 1.442695, %v876_v52  ;;  %v895_v3 = vmul.f32 1.442695, %v877_v23  ;;  %v883_v13 = vsub.f32 %v3260_v44, %v3269_v6 }
 0x21d   : > { %1446 = vst.msk [vmem:[#allocation2 + $0x48] sm:$0xff] %vm1131_vm1, %v868_v12  ;;  %970 = vperm.xlu0 %2614, %v868_v12   ;;  %v884_v59 = vsub.f32 %v820_v5, %v868_v12  ;;  %2622 = vpow2.f32 %v905_v57  ;;  %v3329_v5 = vpop.eup %2618 }
 0x21e   : > { %v850_v20 = vpop.xlane.xlu1 %849  ;;  %945 = vperm.xlu1 %2615, %v3242_v45   ;;  %1447 = vst.msk [vmem:[#allocation2 + $0x50] sm:$0xff] %vm1131_vm1, %v3279_v15  ;;  %2624 = vpow2.f32 %v893_v62  ;;  %v903_v45 = vmul.f32 1.442695, %v881_v50  ;;  %v907_v47 = vmul.f32 1.442695, %v883_v13 }
 0x21f   : > { %v870_v24 = vmax.f32 %v822_v14, %v850_v20  ;;  %v852_v25 = vpop.xlane.xlu0 %851  ;;  %v909_v0 = vmul.f32 1.442695, %v884_v59 }
 0x220   : > { %v3290_v28 = vmax.f32 %v3282_v16, %v852_v25 }
 0x221   : > { %1448 = vst.msk [vmem:[#allocation2 + $0x58] sm:$0xff] %vm1131_vm1, %v870_v24  ;;  %980 = vperm.xlu0 %2614, %v870_v24   ;;  %2626 = vpow2.f32 %v909_v0 }
 0x222   : > { %v854_v27 = vpop.xlane.xlu1 %853  ;;  %960 = vperm.xlu1 %2615, %v866_v46   ;;  %1449 = vst.msk [vmem:[#allocation2 + $0x60] sm:$0xff] %vm1131_vm1, %v3290_v28  ;;  %v886_v46 = vsub.f32 %v822_v14, %v870_v24  ;;  %2628 = vpow2.f32 %v895_v3 }
 0x223   : > { %v872_v36 = vmax.f32 %v824_v26, %v854_v27  ;;  %v856_v37 = vpop.xlane.xlu0 %855  ;;  %v3335_v12 = vpop.eup %2620 }
 0x224   : > { %v3301_v41 = vmax.f32 %v3293_v31, %v856_v37  ;;  %v913_v33 = vmul.f32 1.442695, %v886_v46 }
 0x225   : > { %1450 = vst.msk [vmem:[#allocation2 + $0x68] sm:$0xff] %vm1131_vm1, %v872_v36  ;;  %990 = vperm.xlu0 %2614, %v872_v36   ;;  %v888_v38 = vsub.f32 %v824_v26, %v872_v36 }
 0x226   : > { %955 = vperm.xlu1 %2615, %v3257_v58   ;;  %v858_v43 = vpop.xlane.xlu1 %857  ;;  %v889_v51 = vsub.f32 %v3293_v31, %v3301_v41  ;;  %1451 = vst.msk [vmem:[#allocation2 + $0x70] sm:$0xff] %vm1131_vm1, %v3301_v41  ;;  %2630 = vpow2.f32 %v913_v33  ;;  %v885_v58 = vsub.f32 %v3272_v9, %v3279_v15 }
 0x227   : > { %v3313_v55 = vmax.f32 %v3298_v40, %v858_v43  ;;  %v917_v34 = vmul.f32 1.442695, %v888_v38  ;;  %2632 = vpow2.f32 %v899_v10  ;;  %v3341_v14 = vpop.eup %2622 }
 0x228   : > { %v3343_v18 = vpop.eup %2624  ;;  %v911_v44 = vmul.f32 1.442695, %v885_v58 }
 0x229   : > { %v890_v56 = vsub.f32 %v3298_v40, %v3313_v55  ;;  %1452 = vst.msk [vmem:[#allocation2 + $0x78] sm:$0xff] %vm1131_vm1, %v3313_v55  ;;  %1000 = vperm.xlu0 %2614, %v3313_v55   ;;  %2634 = vpow2.f32 %v917_v34 }
 0x22a   : > { %965 = vperm.xlu1 %2615, %v3269_v6   ;;  %2636 = vpow2.f32 %v903_v45  ;;  %v887_v6 = vsub.f32 %v3282_v16, %v3290_v28 }
 0x22b   : > { %v3349_v17 = vpop.eup %2626  ;;  %2638 = vpow2.f32 %v907_v47 }
 0x22c   : > { %v3351_v20 = vpop.eup %2628  ;;  %2640 = vpow2.f32 %v911_v44  ;;  %v915_v9 = vmul.f32 1.442695, %v887_v6 }
 0x22d   : > { %1166 = vperm.xlu0 %2614, %v3323_v32  }
 0x22e   : > { %975 = vperm.xlu1 %2615, %v3279_v15   ;;  %2642 = vpow2.f32 %v915_v9 }
 0x230   : > { %v3357_v24 = vpop.eup %2630 }
 0x231   : > { %1181 = vperm.xlu0 %2614, %v3329_v5   ;;  %v3359_v25 = vpop.eup %2632 }
 0x232   : > { %985 = vperm.xlu1 %2615, %v3290_v28  }
 0x233   : > { %v3363_v15 = vpop.eup %2634 }
 0x234   : > { %v3365_v26 = vpop.eup %2636 }
 0x235   : > { %1191 = vperm.xlu0 %2614, %v3335_v12   ;;  %v3369_v16 = vpop.eup %2638 }
 0x236   : > { %995 = vperm.xlu1 %2615, %v3301_v41   ;;  %v3372_v28 = vpop.eup %2640 }
 0x238   : > { %v3375_v35 = vpop.eup %2642 }
 0x239   : > { %1201 = vperm.xlu0 %2614, %v3341_v14  }
 0x23a   : > { %1171 = vperm.xlu1 %2615, %v3343_v18  }
 0x23d   : > { %1211 = vperm.xlu0 %2614, %v3349_v17  }
 0x23e   : > { %1176 = vperm.xlu1 %2615, %v3351_v20  }
 0x241   : > { %1221 = vperm.xlu0 %2614, %v3357_v24  }
 0x242   : > { %1186 = vperm.xlu1 %2615, %v3359_v25  }
 0x245   : > { %1231 = vperm.xlu0 %2614, %v3363_v15  }
 0x246   : > { %1196 = vperm.xlu1 %2615, %v3365_v26  }
 0x24a   : > { %1206 = vperm.xlu1 %2615, %v3369_v16  }
 0x24e   : > { %1216 = vperm.xlu1 %2615, %v3372_v28  }
 0x252   : > { %1226 = vperm.xlu1 %2615, %v3375_v35  }
 0x289   : > { %v926_v22 = vpop.permute.xlu0 %925 }
 0x28a   : > { %v1003_v27 = vsub.f32 %v3112_v63, %v926_v22 }
 0x28c   : > { %v1019_v36 = vmul.f32 1.442695, %v1003_v27 }
 0x28d   : > { %v931_v37 = vpop.permute.xlu1 %930 }
 0x28e   : > { %2644 = vpow2.f32 %v1019_v36  ;;  %v1004_v48 = vsub.f32 %v3125_v8, %v931_v37 }
 0x290   : > { %v1021_v49 = vmul.f32 1.442695, %v1004_v48 }
 0x291   : > { %v941_v43 = vpop.permute.xlu1 %940 }
 0x292   : > { %2646 = vpow2.f32 %v1021_v49  ;;  %v1006_v52 = vsub.f32 %v3122_v7, %v941_v43 }
 0x294   : > { %v1025_v57 = vmul.f32 1.442695, %v1006_v52 }
 0x295   : > { %v936_v59 = vpop.permute.xlu1 %935 }
 0x296   : > { %2648 = vpow2.f32 %v1025_v57  ;;  %v1005_v62 = vsub.f32 %v3129_v11, %v936_v59 }
 0x298   : > { %v2645_v23 = vpop.eup %2644  ;;  %v1023_v0 = vmul.f32 1.442695, %v1005_v62 }
 0x299   : > { %v951_v46 = vpop.permute.xlu1 %950  ;;  %1083 = vadd.xlane.f32.xlu1 %v2645_v23  ;;  %2367 = vmatprep.mubr.f32.mxu1 %v2645_v23 }
 0x29a   : > { %2650 = vpow2.f32 %v1023_v0  ;;  %v1008_v63 = vsub.f32 %v3140_v21, %v951_v46 }
 0x29c   : > { %v2647_v3 = vpop.eup %2646  ;;  %v1029_v8 = vmul.f32 1.442695, %v1008_v63  ;;  %v971_v4 = vpop.permute.xlu0 %970 }
 0x29d   : > { %v946_v33 = vpop.permute.xlu1 %945  ;;  %1085 = vadd.xlane.f32.xlu0 %v2647_v3  ;;  %2368 = vmatmul.mubr.f32.vlgmr.msra.gmra.mrb[0].mxu1 %v2647_v3  ;;  %v1012_v45 = vsub.f32 %v3164_v42, %v971_v4 }
 0x29e   : > { %2652 = vpow2.f32 %v1029_v8  ;;  %v1007_v7 = vsub.f32 %v3137_v19, %v946_v33 }
 0x29f   : > { %v1037_v19 = vmul.f32 1.442695, %v1012_v45 }
 0x2a0   : > { %v2649_v38 = vpop.eup %2648  ;;  %v1027_v10 = vmul.f32 1.442695, %v1007_v7  ;;  %v981_v11 = vpop.permute.xlu0 %980 }
 0x2a1   : > { %v961_v50 = vpop.permute.xlu1 %960  ;;  %1089 = vadd.xlane.f32.xlu1 %v2649_v38  ;;  %v1014_v6 = vsub.f32 %v3175_v54, %v981_v11 }
 0x2a2   : > { %2654 = vpow2.f32 %v1027_v10  ;;  %v1010_v34 = vsub.f32 %v3152_v30, %v961_v50  ;;  %v921_v10 = vmul.f32 1.442695, %v890_v56 }
 0x2a3   : > { %v1041_v42 = vmul.f32 1.442695, %v1014_v6 }
 0x2a4   : > { %v2651_v21 = vpop.eup %2650  ;;  %v1033_v13 = vmul.f32 1.442695, %v1010_v34  ;;  %v991_v58 = vpop.permute.xlu0 %990 }
 0x2a5   : > { %v956_v47 = vpop.permute.xlu1 %955  ;;  %1087 = vadd.xlane.f32.xlu0 %v2651_v21  ;;  %2370 = vmatprep.mubr.f32.mxu1 %v2651_v21  ;;  %v1016_v36 = vsub.f32 %v3185_v61, %v991_v58 }
 0x2a6   : > { %2656 = vpow2.f32 %v1033_v13  ;;  %v1009_v44 = vsub.f32 %v3149_v29, %v956_v47  ;;  %2371 = vmatmul.mubr.f32.gmra.mrb[2].mxu1 %v2649_v38  ;;  %v919_v38 = vmul.f32 1.442695, %v889_v51 }
 0x2a7   : > { %v1045_v54 = vmul.f32 1.442695, %v1016_v36 }
 0x2a8   : > { %v2653_v9 = vpop.eup %2652  ;;  %v1031_v22 = vmul.f32 1.442695, %v1009_v44  ;;  %v1001_v48 = vpop.permute.xlu0 %1000 }
 0x2a9   : > { %v966_v27 = vpop.permute.xlu1 %965  ;;  %1093 = vadd.xlane.f32.xlu1 %v2653_v9  ;;  %v1018_v52 = vsub.f32 %v3193_v2, %v1001_v48 }
 0x2aa   : > { %2658 = vpow2.f32 %v1031_v22  ;;  %v1011_v30 = vsub.f32 %v3161_v39, %v966_v27  ;;  %v1052_v27 = vld [vmem:[#allocation3 + $0x8] sm:$0xff] }
 0x2ab   : > { %2660 = vpow2.f32 %v1037_v19  ;;  %v1049_v62 = vmul.f32 1.442695, %v1018_v52  ;;  %v1051_v19 = vld [vmem:[#allocation3] sm:$0xff] }
 0x2ac   : > { %v2655_v37 = vpop.eup %2654  ;;  %v1035_v49 = vmul.f32 1.442695, %v1011_v30  ;;  %v3408_v31 = vpop.permute.xlu0 %1166  ;;  %v1067_v6 = vmul.f32 %v3323_v32, %v1051_v19  ;;  %v1061_v19 = vld [vmem:[#allocation3 + $0x50] sm:$0xff] }
 0x2ad   : > { %v976_v43 = vpop.permute.xlu1 %975  ;;  %1091 = vadd.xlane.f32.xlu0 %v2655_v37  ;;  %2373 = vmatprep.mubr.f32.mxu1 %v2655_v37  ;;  %v1054_v37 = vld [vmem:[#allocation3 + $0x18] sm:$0xff] }
 0x2ae   : > { %2662 = vpow2.f32 %v1035_v49  ;;  %v1013_v29 = vsub.f32 %v3173_v53, %v976_v43  ;;  %2374 = vmatmul.mubr.f32.gmra.mrb[4].mxu1 %v2653_v9  ;;  %v1070_v49 = vmul.f32 %v3329_v5, %v1054_v37 }
 0x2af   : > { %2664 = vpow2.f32 %v1041_v42  ;;  %v1068_v42 = vmul.f32 %v3343_v18, %v1052_v27  ;;  %v1077_v27 = vmul.f32 %v3372_v28, %v1061_v19  ;;  %v1065_v28 = vld [vmem:[#allocation3 + $0x70] sm:$0xff] }
 0x2b0   : > { %v2657_v57 = vpop.eup %2656  ;;  %v1039_v39 = vmul.f32 1.442695, %v1013_v29  ;;  %v3412_v51 = vpop.permute.xlu0 %1181  ;;  %v1053_v29 = vld [vmem:[#allocation3 + $0x10] sm:$0xff] }
 0x2b1   : > { %v986_v59 = vpop.permute.xlu1 %985  ;;  %1097 = vadd.xlane.f32.xlu1 %v2657_v57  ;;  %v1069_v32 = vmul.f32 %v3351_v20, %v1053_v29 }
 0x2b2   : > { %2666 = vpow2.f32 %v1039_v39  ;;  %v1015_v61 = vsub.f32 %v3183_v60, %v986_v59 }
 0x2b3   : > { %2668 = vpow2.f32 %v1045_v54 }
 0x2b4   : > { %v2659_v23 = vpop.eup %2658  ;;  %v1043_v0 = vmul.f32 1.442695, %v1015_v61  ;;  %v3416_v40 = vpop.permute.xlu0 %1191  ;;  %v1055_v61 = vld [vmem:[#allocation3 + $0x20] sm:$0xff] }
 0x2b5   : > { %v2661_v46 = vpop.eup %2660  ;;  %1095 = vadd.xlane.f32.xlu0 %v2659_v23  ;;  %v996_v63 = vpop.permute.xlu1 %995  ;;  %2376 = vmatprep.mubr.f32.mxu1 %v2659_v23  ;;  %v1071_v5 = vmul.f32 %v3359_v25, %v1055_v61 }
 0x2b6   : > { %2670 = vpow2.f32 %v1043_v0  ;;  %v1017_v53 = vsub.f32 %v3191_v1, %v996_v63  ;;  %1101 = vadd.xlane.f32.xlu1 %v2661_v46  ;;  %2377 = vmatmul.mubr.f32.gmra.mrb[6].mxu1 %v2657_v57  ;;  %v1056_v57 = vld [vmem:[#allocation3 + $0x28] sm:$0xff]  ;;  %v1058_v0 = vld [vmem:[#allocation3 + $0x38] sm:$0xff] }
 0x2b7   : > { %2672 = vpow2.f32 %v1049_v62  ;;  %v1072_v18 = vmul.f32 %v3335_v12, %v1056_v57  ;;  %v1074_v20 = vmul.f32 %v3341_v14, %v1058_v0  ;;  %v1151_v0 = vld [vmem:[#allocation4 + $0x18] sm:$0xff] }
 0x2b8   : > { %v2663_v2 = vpop.eup %2662  ;;  %v1047_v3 = vmul.f32 1.442695, %v1017_v53  ;;  %v3420_v56 = vpop.permute.xlu0 %1201  ;;  %v1057_v53 = vld [vmem:[#allocation3 + $0x30] sm:$0xff] }
 0x2b9   : > { %v2665_v8 = vpop.eup %2664  ;;  %1099 = vadd.xlane.f32.xlu0 %v2663_v2  ;;  %2379 = vmatprep.mubr.f32.mxu1 %v2663_v2  ;;  %v3406_v34 = vpop.permute.xlu1 %1171  ;;  %v1073_v12 = vmul.f32 %v3365_v26, %v1057_v53 }
 0x2ba   : > { %2674 = vpow2.f32 %v1047_v3  ;;  %1105 = vadd.xlane.f32.xlu1 %v2665_v8  ;;  %2380 = vmatmul.mubr.f32.gmra.mrb[8].mxu1 %v2661_v46  ;;  %v1060_v3 = vld [vmem:[#allocation3 + $0x48] sm:$0xff] }
 0x2bb   : > { %2676 = vpow2.f32 %v919_v38 }
 0x2bc   : > { %v2667_v60 = vpop.eup %2666  ;;  %2678 = vpow2.f32 %v921_v10  ;;  %v3424_v13 = vpop.permute.xlu0 %1211 }
 0x2bd   : > { %v2669_v4 = vpop.eup %2668  ;;  %1103 = vadd.xlane.f32.xlu0 %v2667_v60  ;;  %2382 = vmatprep.mubr.f32.mxu1 %v2667_v60  ;;  %v3410_v41 = vpop.permute.xlu1 %1176 }
 0x2be   : > { %1109 = vadd.xlane.f32.xlu1 %v2669_v4  ;;  %2383 = vmatmul.mubr.f32.gmra.mrb[10].mxu1 %v2665_v8  ;;  %v1076_v8 = vmul.f32 %v3349_v17, %v1060_v3 }
 0x2c0   : > { %v2671_v33 = vpop.eup %2670  ;;  %v3428_v58 = vpop.permute.xlu0 %1221 }
 0x2c1   : > { %v2673_v7 = vpop.eup %2672  ;;  %1107 = vadd.xlane.f32.xlu0 %v2671_v33  ;;  %2385 = vmatprep.mubr.f32.mxu1 %v2671_v33  ;;  %v3414_v45 = vpop.permute.xlu1 %1186 }
 0x2c2   : > { %1113 = vadd.xlane.f32.xlu1 %v2673_v7  ;;  %2386 = vmatmul.mubr.f32.gmra.mrb[12].mxu1 %v2669_v4  ;;  %v1059_v4 = vld [vmem:[#allocation3 + $0x40] sm:$0xff] }
 0x2c3   : > { %v1075_v14 = vmul.f32 %v3369_v16, %v1059_v4  ;;  %v1063_v16 = vld [vmem:[#allocation3 + $0x60] sm:$0xff] }
 0x2c4   : > { %v2675_v1 = vpop.eup %2674  ;;  %v3433_v9 = vpop.permute.xlu0 %1231 }
 0x2c5   : > { %1111 = vadd.xlane.f32.xlu0 %v2675_v1  ;;  %2388 = vmatprep.mubr.f32.mxu1 %v2675_v1  ;;  %v3400_v11 = vpop.eup %2676  ;;  %v3418_v55 = vpop.permute.xlu1 %1196 }
 0x2c6   : > { %2389 = vmatmul.mubr.f32.gmra.mrb[14].mxu1 %v2673_v7  ;;  %v3403_v50 = vpop.eup %2678  ;;  %v1062_v7 = vld [vmem:[#allocation3 + $0x58] sm:$0xff] }
 0x2c7   : > { %v1078_v38 = vmul.f32 %v3357_v24, %v1062_v7 }
 0x2c9   : > { %v3422_v21 = vpop.permute.xlu1 %1206 }
 0x2cd   : > { %v3426_v47 = vpop.permute.xlu1 %1216 }
 0x2d1   : > { %v3430_v44 = vpop.permute.xlu1 %1226 }
 0x2d3   : > { %1236 = vperm.xlu1 %2615, %v3400_v11  }
 0x2db   : > { %1241 = vperm.xlu0 %2614, %v3403_v50  }
 0x326   : > { %v1084_v22 = vpop.xlane.xlu1 %1083 }
 0x327   : > { %v1115_v30 = vadd.f32 %v1084_v22, %v1067_v6  ;;  %v1064_v22 = vld [vmem:[#allocation3 + $0x68] sm:$0xff] }
 0x329   : > { %1132 = vst.msk [vmem:[#allocation3] sm:$0xff] %vm1131_vm1, %v1115_v30  ;;  %v1080_v30 = vmul.f32 %v3363_v15, %v1064_v22  ;;  %v1081_v15 = vmul.f32 %v3400_v11, %v1065_v28  ;;  %v1150_v11 = vld [vmem:[#allocation4 + $0x10] sm:$0xff] }
 0x32a   : > { %v1086_v36 = vpop.xlane.xlu0 %1085 }
 0x32b   : > { %v1116_v48 = vadd.f32 %v1086_v36, %v1068_v42 }
 0x32d   : > { %1133 = vst.msk [vmem:[#allocation3 + $0x8] sm:$0xff] %vm1131_vm1, %v1116_v48  ;;  %v1066_v48 = vld [vmem:[#allocation3 + $0x78] sm:$0xff] }
 0x32e   : > { %v1090_v43 = vpop.xlane.xlu1 %1089 }
 0x32f   : > { %v1118_v54 = vadd.f32 %v1090_v43, %v1070_v49  ;;  %v1079_v49 = vmul.f32 %v3375_v35, %v1063_v16  ;;  %v1082_v43 = vmul.f32 %v3403_v50, %v1066_v48  ;;  %v1149_v35 = vld [vmem:[#allocation4 + $0x8] sm:$0xff]  ;;  %v1160_v48 = vld [vmem:[#allocation4 + $0x60] sm:$0xff] }
 0x331   : > { %1135 = vst.msk [vmem:[#allocation3 + $0x18] sm:$0xff] %vm1131_vm1, %v1118_v54 }
 0x332   : > { %v1088_v52 = vpop.xlane.xlu0 %1087 }
 0x333   : > { %v1117_v39 = vadd.f32 %v1088_v52, %v1069_v32 }
 0x335   : > { %1134 = vst.msk [vmem:[#allocation3 + $0x10] sm:$0xff] %vm1131_vm1, %v1117_v39 }
 0x336   : > { %v1094_v59 = vpop.xlane.xlu1 %1093 }
 0x337   : > { %v1120_v62 = vadd.f32 %v1094_v59, %v1072_v18  ;;  %v1148_v18 = vld [vmem:[#allocation4] sm:$0xff]  ;;  %v1245_v59 = vmul.f32 %v3406_v34, %v1149_v35  ;;  %v1153_v34 = vld [vmem:[#allocation4 + $0x28] sm:$0xff] }
 0x338   : > { %v1244_v50 = vmul.f32 %v3408_v31, %v1148_v18  ;;  %v1152_v31 = vld [vmem:[#allocation4 + $0x20] sm:$0xff] }
 0x339   : > { %1137 = vst.msk [vmem:[#allocation3 + $0x28] sm:$0xff] %vm1131_vm1, %v1120_v62 }
 0x33a   : > { %v1092_v23 = vpop.xlane.xlu0 %1091 }
 0x33b   : > { %v1119_v46 = vadd.f32 %v1092_v23, %v1071_v5 }
 0x33d   : > { %1136 = vst.msk [vmem:[#allocation3 + $0x20] sm:$0xff] %vm1131_vm1, %v1119_v46  ;;  %v1247_v46 = vmul.f32 %v3412_v51, %v1151_v0  ;;  %v1155_v51 = vld [vmem:[#allocation4 + $0x38] sm:$0xff] }
 0x33e   : > { %v1098_v63 = vpop.xlane.xlu1 %1097  ;;  %v1251_v7 = vmul.f32 %v3420_v56, %v1155_v51 }
 0x33f   : > { %v1122_v2 = vadd.f32 %v1098_v63, %v1074_v20  ;;  %v1246_v20 = vmul.f32 %v3410_v41, %v1150_v11  ;;  %v1154_v41 = vld [vmem:[#allocation4 + $0x30] sm:$0xff] }
 0x341   : > { %1139 = vst.msk [vmem:[#allocation3 + $0x38] sm:$0xff] %vm1131_vm1, %v1122_v2 }
 0x342   : > { %v1096_v60 = vpop.xlane.xlu0 %1095 }
 0x343   : > { %v1102_v25 = vpop.xlane.xlu1 %1101  ;;  %v1121_v33 = vadd.f32 %v1096_v60, %v1073_v12  ;;  %v1249_v12 = vmul.f32 %v3416_v40, %v1153_v34 }
 0x344   : > { %v1124_v1 = vadd.f32 %v1102_v25, %v1076_v8  ;;  %v1248_v8 = vmul.f32 %v3414_v45, %v1152_v31 }
 0x345   : > { %1138 = vst.msk [vmem:[#allocation3 + $0x30] sm:$0xff] %vm1131_vm1, %v1121_v33 }
 0x346   : > { %1141 = vst.msk [vmem:[#allocation3 + $0x48] sm:$0xff] %vm1131_vm1, %v1124_v1  ;;  %v1100_v10 = vpop.xlane.xlu0 %1099  ;;  %v1157_v1 = vld [vmem:[#allocation4 + $0x48] sm:$0xff] }
 0x347   : > { %v1106_v6 = vpop.xlane.xlu1 %1105  ;;  %v1123_v26 = vadd.f32 %v1100_v10, %v1075_v14  ;;  %v1250_v14 = vmul.f32 %v3418_v55, %v1154_v41  ;;  %v1156_v10 = vld [vmem:[#allocation4 + $0x40] sm:$0xff]  ;;  %v1253_v45 = vmul.f32 %v3424_v13, %v1157_v1  ;;  %v1161_v55 = vld [vmem:[#allocation4 + $0x68] sm:$0xff] }
 0x348   : > { %v1126_v17 = vadd.f32 %v1106_v6, %v1078_v38  ;;  %v1252_v22 = vmul.f32 %v3422_v21, %v1156_v10  ;;  %v1257_v21 = vmul.f32 %v3433_v9, %v1161_v55 }
 0x349   : > { %1140 = vst.msk [vmem:[#allocation3 + $0x40] sm:$0xff] %vm1131_vm1, %v1123_v26  ;;  %v1159_v26 = vld [vmem:[#allocation4 + $0x58] sm:$0xff] }
 0x34a   : > { %1143 = vst.msk [vmem:[#allocation3 + $0x58] sm:$0xff] %vm1131_vm1, %v1126_v17  ;;  %v1104_v42 = vpop.xlane.xlu0 %1103  ;;  %v1255_v16 = vmul.f32 %v3428_v58, %v1159_v26  ;;  %v1162_v58 = vld [vmem:[#allocation4 + $0x70] sm:$0xff] }
 0x34b   : > { %v1110_v36 = vpop.xlane.xlu1 %1109  ;;  %v1125_v37 = vadd.f32 %v1104_v42, %v1077_v27  ;;  %v1158_v27 = vld [vmem:[#allocation4 + $0x50] sm:$0xff] }
 0x34c   : > { %v1128_v24 = vadd.f32 %v1110_v36, %v1080_v30  ;;  %v1254_v36 = vmul.f32 %v3426_v47, %v1158_v27 }
 0x34d   : > { %1142 = vst.msk [vmem:[#allocation3 + $0x50] sm:$0xff] %vm1131_vm1, %v1125_v37 }
 0x34e   : > { %1145 = vst.msk [vmem:[#allocation3 + $0x68] sm:$0xff] %vm1131_vm1, %v1128_v24  ;;  %v1108_v29 = vpop.xlane.xlu0 %1107 }
 0x34f   : > { %v1114_v54 = vpop.xlane.xlu1 %1113  ;;  %v1127_v32 = vadd.f32 %v1108_v29, %v1079_v49  ;;  %v1163_v29 = vld [vmem:[#allocation4 + $0x78] sm:$0xff] }
 0x350   : > { %v1130_v52 = vadd.f32 %v1114_v54, %v1082_v43  ;;  %v1256_v43 = vmul.f32 %v3430_v44, %v1160_v48 }
 0x351   : > { %1144 = vst.msk [vmem:[#allocation3 + $0x60] sm:$0xff] %vm1131_vm1, %v1127_v32 }
 0x352   : > { %1147 = vst.msk [vmem:[#allocation3 + $0x78] sm:$0xff] %vm1131_vm1, %v1130_v52  ;;  %v1112_v57 = vpop.xlane.xlu0 %1111 }
 0x353   : > { %v1129_v39 = vadd.f32 %v1112_v57, %v1081_v15  ;;  %v1237_v32 = vpop.permute.xlu1 %1236 }
 0x355   : > { %1146 = vst.msk [vmem:[#allocation3 + $0x70] sm:$0xff] %vm1131_vm1, %v1129_v39  ;;  %v1258_v39 = vmul.f32 %v1237_v32, %v1162_v58 }
 0x35a   : > { %v1242_v28 = vpop.permute.xlu0 %1241 }
 0x35b   : > { %v1259_v57 = vmul.f32 %v1242_v28, %v1163_v29 }
 0x370   : > { %v2369_v61 = vpop.f32.mrb[0].mxu1 }
 0x371   : > { %v1406_v62 = vadd.f32 %v2369_v61, %v1245_v59  ;;  %v1326_v5 = vpop.f32.mrb[1].mxu1 }
 0x372   : > { %v1405_v23 = vadd.f32 %v1326_v5, %v1244_v50 }
 0x373   : > { %1422 = vst [vmem:[#allocation4 + $0x8] sm:$0xff] %v1406_v62 }
 0x374   : > { %1421 = vst [vmem:[#allocation4] sm:$0xff] %v1405_v23 }
 0x379   : > { %v2372_v63 = vpop.f32.mrb[2].mxu1 }
 0x37a   : > { %v1408_v53 = vadd.f32 %v2372_v63, %v1247_v46  ;;  %v1336_v2 = vpop.f32.mrb[3].mxu1 }
 0x37b   : > { %v1407_v3 = vadd.f32 %v1336_v2, %v1246_v20 }
 0x37c   : > { %1424 = vst [vmem:[#allocation4 + $0x18] sm:$0xff] %v1408_v53 }
 0x37d   : > { %1423 = vst [vmem:[#allocation4 + $0x10] sm:$0xff] %v1407_v3 }
 0x381   : > { %v2375_v60 = vpop.f32.mrb[4].mxu1 }
 0x382   : > { %v1410_v4 = vadd.f32 %v2375_v60, %v1249_v12  ;;  %v1346_v25 = vpop.f32.mrb[5].mxu1 }
 0x383   : > { %v1409_v33 = vadd.f32 %v1346_v25, %v1248_v8 }
 0x384   : > { %1426 = vst [vmem:[#allocation4 + $0x28] sm:$0xff] %v1410_v4 }
 0x385   : > { %1425 = vst [vmem:[#allocation4 + $0x20] sm:$0xff] %v1409_v33 }
 0x389   : > { %v2378_v38 = vpop.f32.mrb[6].mxu1 }
 0x38a   : > { %v1412_v19 = vadd.f32 %v2378_v38, %v1251_v7  ;;  %v1356_v6 = vpop.f32.mrb[7].mxu1 }
 0x38b   : > { %v1411_v40 = vadd.f32 %v1356_v6, %v1250_v14 }
 0x38c   : > { %1428 = vst [vmem:[#allocation4 + $0x38] sm:$0xff] %v1412_v19 }
 0x38d   : > { %1427 = vst [vmem:[#allocation4 + $0x30] sm:$0xff] %v1411_v40  ;;  %v2381_v17 = vpop.f32.mrb[8].mxu1 }
 0x38e   : > { %v1414_v30 = vadd.f32 %v2381_v17, %v1253_v45  ;;  %v1366_v42 = vpop.f32.mrb[9].mxu1 }
 0x38f   : > { %v1413_v56 = vadd.f32 %v1366_v42, %v1252_v22 }
 0x390   : > { %1430 = vst [vmem:[#allocation4 + $0x48] sm:$0xff] %v1414_v30 }
 0x391   : > { %1429 = vst [vmem:[#allocation4 + $0x40] sm:$0xff] %v1413_v56  ;;  %v2384_v37 = vpop.f32.mrb[10].mxu1 }
 0x392   : > { %v1416_v13 = vadd.f32 %v2384_v37, %v1255_v16  ;;  %v1376_v24 = vpop.f32.mrb[11].mxu1 }
 0x393   : > { %v1415_v49 = vadd.f32 %v1376_v24, %v1254_v36 }
 0x394   : > { %1432 = vst [vmem:[#allocation4 + $0x58] sm:$0xff] %v1416_v13 }
 0x395   : > { %1431 = vst [vmem:[#allocation4 + $0x50] sm:$0xff] %v1415_v49  ;;  %v2387_v54 = vpop.f32.mrb[12].mxu1 }
 0x396   : > { %v1418_v52 = vadd.f32 %v2387_v54, %v1257_v21  ;;  %v1386_v15 = vpop.f32.mrb[13].mxu1 }
 0x397   : > { %v1417_v47 = vadd.f32 %v1386_v15, %v1256_v43 }
 0x398   : > { %1434 = vst [vmem:[#allocation4 + $0x68] sm:$0xff] %v1418_v52 }
 0x399   : > { %1433 = vst [vmem:[#allocation4 + $0x60] sm:$0xff] %v1417_v47  ;;  %v2390_v35 = vpop.f32.mrb[14].mxu1 }
 0x39a   : > { %v1420_v18 = vadd.f32 %v2390_v35, %v1259_v57  ;;  %v1396_v59 = vpop.f32.mrb[15].mxu1 }
 0x39b   : > { %v1419_v9 = vadd.f32 %v1396_v59, %v1258_v39 }
 0x39c   : > { %1436 = vst [vmem:[#allocation4 + $0x78] sm:$0xff] %v1420_v18 }
 0x39d   : > { %1435 = vst [vmem:[#allocation4 + $0x70] sm:$0xff] %v1419_v9 }
 0x39e PF: > { %p1453_p13 = scmp.eq.s32.totalorder %s2808_s21, 1  ;;  %p2205_p0 = scmp.ne.s32.totalorder %s2808_s21, 1 }
 0x39f   : > { %v1474_v44 = vld [vmem:[#allocation3 + $0x8] sm:$0xff] (!%p2205_p0)  ;;  %v1473_v50 = vld [vmem:[#allocation3] sm:$0xff] (!%p2205_p0)  ;;  %v2846_v62 = vmov (!%p2205_p0), 0   ;;  %v1483_v23 = vld [vmem:[#allocation3 + $0x50] sm:$0xff] (!%p2205_p0)  ;;  %v2847_v16 = vmov (!%p2205_p0), 0.0  }
 0x3a0   : > { %1456 = sbr.rel (%p2205_p0) target bundleno = 1318 (0x526), region = 56  ;;  %v1482_v61 = vld [vmem:[#allocation3 + $0x48] sm:$0xff] (!%p2205_p0)  ;;  %2681 = vset.pattern.permute.xlu1 (!%p2205_p0), %v2846_v62  ;;  %2680 = vset.pattern.permute.xlu0 (!%p2205_p0), %v2846_v62  ;;  %2682 = vrcp.f32 (!%p2205_p0), %v1474_v44  ;;  %v1481_v5 = vld [vmem:[#allocation3 + $0x40] sm:$0xff] (!%p2205_p0)  ;;  %v1475_v0 = vld [vmem:[#allocation3 + $0x10] sm:$0xff] (!%p2205_p0) }
 0x3a1   : > { %2684 = vrcp.f32 (!%p2205_p0), %v1473_v50  ;;  %v1634_v11 = vld [vmem:[%s3004_s9 + $0x8] sm:$0xff] (!%p2205_p0)  ;;  %v1636_v46 = vld [vmem:[%s3004_s9 + $0x18] sm:$0xff] (!%p2205_p0)  ;;  %v1633_v63 = vld [vmem:[%s3004_s9] sm:$0xff] (!%p2205_p0)  ;;  %1729 = vmatprep.mubr.f32.mxu0 (!%p2205_p0), %v2847_v16  ;;  %1777 = vmatprep.mubr.f32.mxu1 (!%p2205_p0), %v2847_v16 }
 0x3a2   : > { %2686 = vrcp.f32 (!%p2205_p0), %v1482_v61  ;;  %v2455_v20 = vpack.c.bf16 (!%p2205_p0), %v1636_v46, %v1634_v11  ;;  %v1635_v53 = vld [vmem:[%s3004_s9 + $0x10] sm:$0xff] (!%p2205_p0)  ;;  %v1638_v2 = vld [vmem:[%s3004_s9 + $0x28] sm:$0xff] (!%p2205_p0)  ;;  %v1640_v34 = vld [vmem:[%s3004_s9 + $0x38] sm:$0xff] (!%p2205_p0) }
 0x3a3   : > { %2688 = vrcp.f32 (!%p2205_p0), %v1481_v5  ;;  %v2457_v3 = vpack.c.bf16 (!%p2205_p0), %v1635_v53, %v1633_v63  ;;  %v1637_v31 = vld [vmem:[%s3004_s9 + $0x20] sm:$0xff] (!%p2205_p0)  ;;  %v1639_v12 = vld [vmem:[%s3004_s9 + $0x30] sm:$0xff] (!%p2205_p0)  ;;  %v1484_v8 = vld [vmem:[#allocation3 + $0x58] sm:$0xff] (!%p2205_p0)  ;;  %v2459_v60 = vpack.c.bf16 (!%p2205_p0), %v1640_v34, %v1638_v2 }
 0x3a4   : > { %2690 = vrcp.f32 (!%p2205_p0), %v1483_v23  ;;  %2456 = vmatprep.subr.bf16.mxu0 (!%p2205_p0), %v2455_v20  ;;  %2487 = vmatprep.subr.bf16.mxu1 (!%p2205_p0), %v2455_v20  ;;  %v1642_v4 = vld [vmem:[%s3004_s9 + $0x48] sm:$0xff] (!%p2205_p0)  ;;  %v1644_v25 = vld [vmem:[%s3004_s9 + $0x58] sm:$0xff] (!%p2205_p0)  ;;  %v2461_v51 = vpack.c.bf16 (!%p2205_p0), %v1639_v12, %v1637_v31  ;;  %v1641_v7 = vld [vmem:[%s3004_s9 + $0x40] sm:$0xff] (!%p2205_p0) }
 0x3a5   : > { %2692 = vrcp.f32 (!%p2205_p0), %v1475_v0  ;;  %v1476_v33 = vld [vmem:[#allocation3 + $0x18] sm:$0xff] (!%p2205_p0)  ;;  %2458 = vmatpush1.bf16.msra.mxu0 (!%p2205_p0), %v2457_v3  ;;  %2495 = vmatpush1.bf16.msra.mxu1 (!%p2205_p0), %v2457_v3  ;;  %v2463_v41 = vpack.c.bf16 (!%p2205_p0), %v1644_v25, %v1642_v4  ;;  %v1643_v1 = vld [vmem:[%s3004_s9 + $0x50] sm:$0xff] (!%p2205_p0)  ;;  %v1646_v38 = vld [vmem:[%s3004_s9 + $0x68] sm:$0xff] (!%p2205_p0) }
 0x3a6   : > { %2460 = vmatprep.subr.bf16.mxu0 (!%p2205_p0), %v2459_v60  ;;  %2488 = vmatprep.subr.bf16.mxu1 (!%p2205_p0), %v2459_v60  ;;  %2694 = vrcp.f32 (!%p2205_p0), %v1484_v8  ;;  %v1648_v10 = vld [vmem:[%s3004_s9 + $0x78] sm:$0xff] (!%p2205_p0)  ;;  %v1485_v6 = vld [vmem:[#allocation3 + $0x60] sm:$0xff] (!%p2205_p0)  ;;  %v2465_v26 = vpack.c.bf16 (!%p2205_p0), %v1643_v1, %v1641_v7  ;;  %v1647_v30 = vld [vmem:[%s3004_s9 + $0x70] sm:$0xff] (!%p2205_p0) }
 0x3a7   : > { %2696 = vrcp.f32 %v1476_v33  ;;  %v1477_v45 = vld [vmem:[#allocation3 + $0x20] sm:$0xff]  ;;  %v2467_v17 = vpack.c.bf16 %v1648_v10, %v1646_v38  ;;  %v1650_v42 = vld [vmem:[%s3004_s9 + $0x88] sm:$0xff]  ;;  %v1652_v56 = vld [vmem:[%s3004_s9 + $0x98] sm:$0xff] }
 0x3a8   : > { %v1645_v27 = vld [vmem:[%s3004_s9 + $0x60] sm:$0xff]  ;;  %2698 = vrcp.f32 %v1485_v6  ;;  %v1486_v55 = vld [vmem:[#allocation3 + $0x68] sm:$0xff]  ;;  %v2471_v24 = vpack.c.bf16 %v1652_v56, %v1650_v42  ;;  %v1651_v21 = vld [vmem:[%s3004_s9 + $0x90] sm:$0xff] }
 0x3a9   : > { %2462 = vmatpush1.bf16.msra.mxu0 %v2461_v51  ;;  %2496 = vmatpush1.bf16.msra.mxu1 %v2461_v51  ;;  %2700 = vrcp.f32 %v1477_v45  ;;  %v1478_v37 = vld [vmem:[#allocation3 + $0x28] sm:$0xff]  ;;  %v2469_v48 = vpack.c.bf16 %v1647_v30, %v1645_v27  ;;  %v1649_v49 = vld [vmem:[%s3004_s9 + $0x80] sm:$0xff]  ;;  %v1656_v29 = vld [vmem:[%s3004_s9 + $0xb8] sm:$0xff] }
 0x3aa   : > { %v2683_v14 = vpop.eup %2682  ;;  %2464 = vmatprep.subr.bf16.mxu0 %v2463_v41  ;;  %2489 = vmatprep.subr.bf16.mxu1 %v2463_v41  ;;  %2702 = vrcp.f32 %v1486_v55  ;;  %v1654_v43 = vld [vmem:[%s3004_s9 + $0xa8] sm:$0xff]  ;;  %v1487_v28 = vld [vmem:[#allocation3 + $0x70] sm:$0xff]  ;;  %v2473_v32 = vpack.c.bf16 %v1651_v21, %v1649_v49  ;;  %v1653_v47 = vld [vmem:[%s3004_s9 + $0xa0] sm:$0xff] }
 0x3ab   : > { %v2685_v19 = vpop.eup %2684  ;;  %1512 = vperm.xlu1 %2681, %v2683_v14   ;;  %2704 = vrcp.f32 %v1478_v37  ;;  %v1479_v58 = vld [vmem:[#allocation3 + $0x30] sm:$0xff]  ;;  %v2475_v15 = vpack.c.bf16 %v1656_v29, %v1654_v43  ;;  %v1658_v39 = vld [vmem:[%s3004_s9 + $0xc8] sm:$0xff]  ;;  %v1660_v35 = vld [vmem:[%s3004_s9 + $0xd8] sm:$0xff] }
 0x3ac   : > { %v2687_v40 = vpop.eup %2686  ;;  %1507 = vperm.xlu0 %2680, %v2685_v19   ;;  %v1655_v57 = vld [vmem:[%s3004_s9 + $0xb0] sm:$0xff]  ;;  %2706 = vrcp.f32 %v1487_v28  ;;  %v1488_v18 = vld [vmem:[#allocation3 + $0x78] sm:$0xff]  ;;  %v2479_v61 = vpack.c.bf16 %v1660_v35, %v1658_v39  ;;  %v1657_v62 = vld [vmem:[%s3004_s9 + $0xc0] sm:$0xff] }
 0x3ad   : > { %v2689_v22 = vpop.eup %2688  ;;  %2466 = vmatpush1.bf16.msra.mxu0 %v2465_v26  ;;  %2497 = vmatpush1.bf16.msra.mxu1 %v2465_v26  ;;  %2708 = vrcp.f32 %v1479_v58  ;;  %v1480_v9 = vld [vmem:[#allocation3 + $0x38] sm:$0xff]  ;;  %v2477_v44 = vpack.c.bf16 %v1655_v57, %v1653_v47  ;;  %v1659_v5 = vld [vmem:[%s3004_s9 + $0xd0] sm:$0xff]  ;;  %v1662_v23 = vld [vmem:[%s3004_s9 + $0xe8] sm:$0xff] }
 0x3ae   : > { %v2691_v36 = vpop.eup %2690  ;;  %2468 = vmatprep.subr.bf16.mxu0 %v2467_v17  ;;  %2490 = vmatprep.subr.bf16.mxu1 %v2467_v17  ;;  %2710 = vrcp.f32 %v1488_v18  ;;  %v1664_v0 = vld [vmem:[%s3004_s9 + $0xf8] sm:$0xff]  ;;  %v2481_v46 = vpack.c.bf16 %v1659_v5, %v1657_v62  ;;  %v1661_v53 = vld [vmem:[%s3004_s9 + $0xe0] sm:$0xff]  ;;  %v1663_v2 = vld [vmem:[%s3004_s9 + $0xf0] sm:$0xff] }
 0x3af   : > { %1552 = vperm.xlu1 %2681, %v2687_v40   ;;  %v2693_v13 = vpop.eup %2692  ;;  %2712 = vrcp.f32 %v1480_v9  ;;  %v2483_v63 = vpack.c.bf16 %v1664_v0, %v1662_v23  ;;  %v2485_v34 = vpack.c.bf16 %v1663_v2, %v1661_v53  ;;  %v1457_v60 = vld [vmem:[#allocation4] sm:$0xff]  ;;  %v1458_v25 = vld [vmem:[#allocation4 + $0x8] sm:$0xff]  ;;  %v1459_v19 = vld [vmem:[#allocation4 + $0x10] sm:$0xff] }
 0x3b0   : > { %1547 = vperm.xlu0 %2680, %v2689_v22   ;;  %v2695_v54 = vpop.eup %2694  ;;  %v1465_v41 = vld [vmem:[#allocation4 + $0x40] sm:$0xff]  ;;  %v1466_v10 = vld [vmem:[#allocation4 + $0x48] sm:$0xff]  ;;  %v1467_v22 = vld [vmem:[#allocation4 + $0x50] sm:$0xff] }
 0x3b1   : > { %2470 = vmatpush1.bf16.msra.mxu0 %v2469_v48  ;;  %v2697_v52 = vpop.eup %2696  ;;  %2498 = vmatpush1.bf16.msra.mxu1 %v2469_v48  ;;  %v1460_v17 = vld [vmem:[#allocation4 + $0x18] sm:$0xff]  ;;  %v1469_v49 = vld [vmem:[#allocation4 + $0x60] sm:$0xff]  ;;  %v1462_v21 = vld [vmem:[#allocation4 + $0x28] sm:$0xff] }
 0x3b2   : > { %2472 = vmatprep.subr.bf16.mxu0 %v2471_v24  ;;  %2491 = vmatprep.subr.bf16.mxu1 %v2471_v24  ;;  %v2699_v59 = vpop.eup %2698  ;;  %v1468_v55 = vld [vmem:[#allocation4 + $0x58] sm:$0xff]  ;;  %v1470_v58 = vld [vmem:[#allocation4 + $0x68] sm:$0xff]  ;;  %v1471_v39 = vld [vmem:[#allocation4 + $0x70] sm:$0xff] }
 0x3b3   : > { %1557 = vperm.xlu1 %2681, %v2691_v36   ;;  %v2701_v50 = vpop.eup %2700  ;;  %v1461_v36 = vld [vmem:[#allocation4 + $0x20] sm:$0xff]  ;;  %v1464_v35 = vld [vmem:[#allocation4 + $0x38] sm:$0xff]  ;;  %v1602_v5 = vld [vmem:[#allocation5 + $0x8] sm:$0xff] }
 0x3b4   : > { %1517 = vperm.xlu0 %2680, %v2693_v13   ;;  %v2703_v11 = vpop.eup %2702  ;;  %v1601_v62 = vld [vmem:[#allocation5] sm:$0xff]  ;;  %v1604_v53 = vld [vmem:[#allocation5 + $0x18] sm:$0xff]  ;;  %v1618_v2 = vld [vmem:[#allocation5 + $0x88] sm:$0xff] }
 0x3b5   : > { %2474 = vmatpush1.bf16.msra.mxu0 %v2473_v32  ;;  %2499 = vmatpush1.bf16.msra.mxu1 %v2473_v32  ;;  %v2705_v20 = vpop.eup %2704  ;;  %v1463_v32 = vld [vmem:[#allocation4 + $0x30] sm:$0xff] }
 0x3b6   : > { %2476 = vmatprep.subr.bf16.mxu0 %v2475_v15  ;;  %2492 = vmatprep.subr.bf16.mxu1 %v2475_v15  ;;  %v2707_v3 = vpop.eup %2706 }
 0x3b7   : > { %1562 = vperm.xlu1 %2681, %v2695_v54   ;;  %v2709_v31 = vpop.eup %2708 }
 0x3b8   : > { %1522 = vperm.xlu0 %2680, %v2697_v52   ;;  %v2711_v12 = vpop.eup %2710 }
 0x3b9   : > { %2478 = vmatpush1.bf16.msra.mxu0 %v2477_v44  ;;  %2500 = vmatpush1.bf16.msra.mxu1 %v2477_v44  ;;  %v2713_v8 = vpop.eup %2712 }
 0x3ba   : > { %2480 = vmatprep.subr.bf16.mxu0 %v2479_v61  ;;  %2493 = vmatprep.subr.bf16.mxu1 %v2479_v61 }
 0x3bb   : > { %1567 = vperm.xlu1 %2681, %v2699_v59  }
 0x3bc   : > { %1527 = vperm.xlu0 %2680, %v2701_v50   ;;  %v1472_v50 = vld [vmem:[#allocation4 + $0x78] sm:$0xff] }
 0x3bd   : > { %2482 = vmatpush1.bf16.msra.mxu0 %v2481_v46  ;;  %2501 = vmatpush1.bf16.msra.mxu1 %v2481_v46 }
 0x3be   : > { %2484 = vmatprep.subr.bf16.mxu0 %v2483_v63  ;;  %2494 = vmatprep.subr.bf16.mxu1 %v2483_v63  ;;  %v1617_v63 = vld [vmem:[#allocation5 + $0x80] sm:$0xff] }
 0x3bf   : > { %1572 = vperm.xlu1 %2681, %v2703_v11  }
 0x3c0   : > { %1532 = vperm.xlu0 %2680, %v2705_v20   ;;  %v1603_v20 = vld [vmem:[#allocation5 + $0x10] sm:$0xff] }
 0x3c1   : > { %2486 = vmatpush1.bf16.msra.mxu0 %v2485_v34  ;;  %2502 = vmatpush1.bf16.msra.mxu1 %v2485_v34 }
 0x3c3   : > { %1577 = vperm.xlu1 %2681, %v2707_v3  }
 0x3c4   : > { %1537 = vperm.xlu0 %2680, %v2709_v31  }
 0x3c7   : > { %1582 = vperm.xlu1 %2681, %v2711_v12  }
 0x3c8   : > { %1542 = vperm.xlu0 %2680, %v2713_v8  }
 0x42a   : > { %v1513_v4 = vpop.permute.xlu1 %1512 }
 0x42b   : > { %v1508_v33 = vpop.permute.xlu0 %1507  ;;  %v1586_v7 = vmul.f32 %v1513_v4, %v1458_v25  ;;  %v1605_v25 = vld [vmem:[#allocation5 + $0x20] sm:$0xff] }
 0x42c   : > { %v1585_v51 = vmul.f32 %v1508_v33, %v1457_v60  ;;  %v1619_v33 = vld [vmem:[#allocation5 + $0x90] sm:$0xff] }
 0x42e   : > { %1730 = vmatmul.mubr.f32.vlgmr.msra.gmra.mrb[0].mxu0 %v1585_v51  ;;  %v1553_v1 = vpop.permute.xlu1 %1552  ;;  %v1606_v51 = vld [vmem:[#allocation5 + $0x28] sm:$0xff] }
 0x42f   : > { %v1548_v14 = vpop.permute.xlu0 %1547  ;;  %1735 = vmatprep.mubr.f32.mxu0 %v2847_v16  ;;  %v1594_v45 = vmul.f32 %v1553_v1, %v1466_v10 }
 0x430   : > { %v1593_v38 = vmul.f32 %v1548_v14, %v1465_v41  ;;  %v1620_v41 = vld [vmem:[#allocation5 + $0x98] sm:$0xff] }
 0x432   : > { %1736 = vmatmul.mubr.f32.gmra.mrb[2].mxu0 %v1586_v7  ;;  %1778 = vmatmul.mubr.f32.vlgmr.msra.gmra.mrb[0].mxu1 %v1593_v38  ;;  %v1558_v6 = vpop.permute.xlu1 %1557 }
 0x433   : > { %v1518_v40 = vpop.permute.xlu0 %1517  ;;  %1741 = vmatprep.mubr.f32.mxu0 %v2847_v16  ;;  %1783 = vmatprep.mubr.f32.mxu1 %v2847_v16  ;;  %v1595_v42 = vmul.f32 %v1558_v6, %v1467_v22  ;;  %v1608_v22 = vld [vmem:[#allocation5 + $0x38] sm:$0xff] }
 0x434   : > { %v1587_v26 = vmul.f32 %v1518_v40, %v1459_v19 }
 0x436   : > { %1742 = vmatmul.mubr.f32.gmra.mrb[4].mxu0 %v1587_v26  ;;  %1784 = vmatmul.mubr.f32.gmra.mrb[2].mxu1 %v1594_v45  ;;  %v1563_v27 = vpop.permute.xlu1 %1562  ;;  %v1607_v45 = vld [vmem:[#allocation5 + $0x30] sm:$0xff]  ;;  %v1621_v26 = vld [vmem:[#allocation5 + $0xa0] sm:$0xff] }
 0x437   : > { %v1523_v30 = vpop.permute.xlu0 %1522  ;;  %1747 = vmatprep.mubr.f32.mxu0 %v2847_v16  ;;  %1789 = vmatprep.mubr.f32.mxu1 %v2847_v16  ;;  %v1596_v13 = vmul.f32 %v1563_v27, %v1468_v55 }
 0x438   : > { %v1588_v56 = vmul.f32 %v1523_v30, %v1460_v17  ;;  %v1622_v17 = vld [vmem:[#allocation5 + $0xa8] sm:$0xff] }
 0x43a   : > { %1748 = vmatmul.mubr.f32.gmra.mrb[6].mxu0 %v1588_v56  ;;  %1790 = vmatmul.mubr.f32.gmra.mrb[4].mxu1 %v1595_v42  ;;  %v1568_v37 = vpop.permute.xlu1 %1567 }
 0x43b   : > { %v1528_v48 = vpop.permute.xlu0 %1527  ;;  %1753 = vmatprep.mubr.f32.mxu0 %v2847_v16  ;;  %1795 = vmatprep.mubr.f32.mxu1 %v2847_v16  ;;  %v1597_v28 = vmul.f32 %v1568_v37, %v1469_v49  ;;  %v1610_v49 = vld [vmem:[#allocation5 + $0x48] sm:$0xff] }
 0x43c   : > { %v1589_v24 = vmul.f32 %v1528_v48, %v1461_v36 }
 0x43e   : > { %1754 = vmatmul.mubr.f32.gmra.mrb[8].mxu0 %v1589_v24  ;;  %1796 = vmatmul.mubr.f32.gmra.mrb[6].mxu1 %v1596_v13  ;;  %v1573_v43 = vpop.permute.xlu1 %1572  ;;  %v1609_v13 = vld [vmem:[#allocation5 + $0x40] sm:$0xff]  ;;  %v1623_v24 = vld [vmem:[#allocation5 + $0xb0] sm:$0xff] }
 0x43f   : > { %v1533_v29 = vpop.permute.xlu0 %1532  ;;  %1759 = vmatprep.mubr.f32.mxu0 %v2847_v16  ;;  %1801 = vmatprep.mubr.f32.mxu1 %v2847_v16  ;;  %v1598_v47 = vmul.f32 %v1573_v43, %v1470_v58 }
 0x440   : > { %v1590_v54 = vmul.f32 %v1533_v29, %v1462_v21  ;;  %v1624_v21 = vld [vmem:[#allocation5 + $0xb8] sm:$0xff] }
 0x442   : > { %1760 = vmatmul.mubr.f32.gmra.mrb[10].mxu0 %v1590_v54  ;;  %1802 = vmatmul.mubr.f32.gmra.mrb[8].mxu1 %v1597_v28  ;;  %v1578_v52 = vpop.permute.xlu1 %1577 }
 0x443   : > { %v1538_v15 = vpop.permute.xlu0 %1537  ;;  %1765 = vmatprep.mubr.f32.mxu0 %v2847_v16  ;;  %1807 = vmatprep.mubr.f32.mxu1 %v2847_v16  ;;  %v1599_v59 = vmul.f32 %v1578_v52, %v1471_v39  ;;  %v1612_v39 = vld [vmem:[#allocation5 + $0x58] sm:$0xff] }
 0x444   : > { %v1591_v57 = vmul.f32 %v1538_v15, %v1463_v32 }
 0x446   : > { %1766 = vmatmul.mubr.f32.gmra.mrb[12].mxu0 %v1591_v57  ;;  %1808 = vmatmul.mubr.f32.gmra.mrb[10].mxu1 %v1598_v47  ;;  %v1583_v44 = vpop.permute.xlu1 %1582  ;;  %v1611_v47 = vld [vmem:[#allocation5 + $0x50] sm:$0xff]  ;;  %v1625_v57 = vld [vmem:[#allocation5 + $0xc0] sm:$0xff] }
 0x447   : > { %v1543_v18 = vpop.permute.xlu0 %1542  ;;  %1771 = vmatprep.mubr.f32.mxu0 %v2847_v16  ;;  %1813 = vmatprep.mubr.f32.mxu1 %v2847_v16  ;;  %v1600_v61 = vmul.f32 %v1583_v44, %v1472_v50 }
 0x448   : > { %v1592_v9 = vmul.f32 %v1543_v18, %v1464_v35  ;;  %v1626_v35 = vld [vmem:[#allocation5 + $0xc8] sm:$0xff] }
 0x44a   : > { %1772 = vmatmul.mubr.f32.gmra.mrb[14].mxu0 %v1592_v9  ;;  %1814 = vmatmul.mubr.f32.gmra.mrb[12].mxu1 %v1599_v59 }
 0x44b   : > { %1819 = vmatprep.mubr.f32.mxu1 %v2847_v16 }
 0x44e   : > { %1820 = vmatmul.mubr.f32.gmra.mrb[14].mxu1 %v1600_v61 }
 0x501   : > { %v1731_v23 = vpop.f32.mrb[0].mxu0 }
 0x502   : > { %v1826_v0 = vadd.f32 %v1731_v23, %v1601_v62  ;;  %v1733_v11 = vpop.f32.mrb[1].mxu0  ;;  %v1613_v23 = vld [vmem:[#allocation5 + $0x60] sm:$0xff] }
 0x503   : > { %v1827_v46 = vadd.f32 %v1733_v11, %v1602_v5  ;;  %v1614_v11 = vld [vmem:[#allocation5 + $0x68] sm:$0xff] }
 0x504   : > { %1858 = vst [vmem:[#allocation5] sm:$0xff] %v1826_v0  ;;  %v1627_v0 = vld [vmem:[#allocation5 + $0xd0] sm:$0xff] }
 0x505   : > { %1859 = vst [vmem:[#allocation5 + $0x8] sm:$0xff] %v1827_v46  ;;  %v1737_v3 = vpop.f32.mrb[2].mxu0  ;;  %v1779_v34 = vpop.f32.mrb[0].mxu1  ;;  %v1628_v46 = vld [vmem:[#allocation5 + $0xd8] sm:$0xff] }
 0x506   : > { %v1828_v31 = vadd.f32 %v1737_v3, %v1603_v20  ;;  %v1842_v12 = vadd.f32 %v1779_v34, %v1617_v63  ;;  %v1739_v8 = vpop.f32.mrb[3].mxu0  ;;  %v1781_v16 = vpop.f32.mrb[1].mxu1 }
 0x507   : > { %v1829_v60 = vadd.f32 %v1739_v8, %v1604_v53  ;;  %v1843_v4 = vadd.f32 %v1781_v16, %v1618_v2  ;;  %v1615_v8 = vld [vmem:[#allocation5 + $0x70] sm:$0xff]  ;;  %v1629_v16 = vld [vmem:[#allocation5 + $0xe0] sm:$0xff] }
 0x508   : > { %1860 = vst [vmem:[#allocation5 + $0x10] sm:$0xff] %v1828_v31  ;;  %1874 = vst [vmem:[#allocation5 + $0x80] sm:$0xff] %v1842_v12 }
 0x509   : > { %1861 = vst [vmem:[#allocation5 + $0x18] sm:$0xff] %v1829_v60  ;;  %1875 = vst [vmem:[#allocation5 + $0x88] sm:$0xff] %v1843_v4  ;;  %v1743_v7 = vpop.f32.mrb[4].mxu0  ;;  %v1785_v1 = vpop.f32.mrb[2].mxu1  ;;  %v1616_v60 = vld [vmem:[#allocation5 + $0x78] sm:$0xff]  ;;  %v1630_v4 = vld [vmem:[#allocation5 + $0xe8] sm:$0xff] }
 0x50a   : > { %v1830_v14 = vadd.f32 %v1743_v7, %v1605_v25  ;;  %v1844_v38 = vadd.f32 %v1785_v1, %v1619_v33  ;;  %v1745_v10 = vpop.f32.mrb[5].mxu0  ;;  %v1787_v19 = vpop.f32.mrb[3].mxu1 }
 0x50b   : > { %v1831_v6 = vadd.f32 %v1745_v10, %v1606_v51  ;;  %v1845_v40 = vadd.f32 %v1787_v19, %v1620_v41  ;;  %v1631_v10 = vld [vmem:[#allocation5 + $0xf0] sm:$0xff]  ;;  %v1632_v19 = vld [vmem:[#allocation5 + $0xf8] sm:$0xff] }
 0x50c   : > { %1862 = vst [vmem:[#allocation5 + $0x20] sm:$0xff] %v1830_v14  ;;  %1876 = vst [vmem:[#allocation5 + $0x90] sm:$0xff] %v1844_v38 }
 0x50d   : > { %1863 = vst [vmem:[#allocation5 + $0x28] sm:$0xff] %v1831_v6  ;;  %1877 = vst [vmem:[#allocation5 + $0x98] sm:$0xff] %v1845_v40  ;;  %v1749_v27 = vpop.f32.mrb[6].mxu0  ;;  %v1791_v30 = vpop.f32.mrb[4].mxu1 }
 0x50e   : > { %v1832_v42 = vadd.f32 %v1749_v27, %v1607_v45  ;;  %v1846_v56 = vadd.f32 %v1791_v30, %v1621_v26  ;;  %v1751_v55 = vpop.f32.mrb[7].mxu0  ;;  %v1793_v36 = vpop.f32.mrb[5].mxu1 }
 0x50f   : > { %v1833_v37 = vadd.f32 %v1751_v55, %v1608_v22  ;;  %v1847_v48 = vadd.f32 %v1793_v36, %v1622_v17 }
 0x510   : > { %1864 = vst [vmem:[#allocation5 + $0x30] sm:$0xff] %v1832_v42  ;;  %1878 = vst [vmem:[#allocation5 + $0xa0] sm:$0xff] %v1846_v56 }
 0x511   : > { %1865 = vst [vmem:[#allocation5 + $0x38] sm:$0xff] %v1833_v37  ;;  %1879 = vst [vmem:[#allocation5 + $0xa8] sm:$0xff] %v1847_v48  ;;  %v1755_v43 = vpop.f32.mrb[8].mxu0  ;;  %v1797_v29 = vpop.f32.mrb[6].mxu1 }
 0x512   : > { %v1834_v28 = vadd.f32 %v1755_v43, %v1609_v13  ;;  %v1848_v54 = vadd.f32 %v1797_v29, %v1623_v24  ;;  %v1757_v58 = vpop.f32.mrb[9].mxu0  ;;  %v1799_v32 = vpop.f32.mrb[7].mxu1 }
 0x513   : > { %v1835_v52 = vadd.f32 %v1757_v58, %v1610_v49  ;;  %v1849_v15 = vadd.f32 %v1799_v32, %v1624_v21 }
 0x514   : > { %1866 = vst [vmem:[#allocation5 + $0x40] sm:$0xff] %v1834_v28  ;;  %1880 = vst [vmem:[#allocation5 + $0xb0] sm:$0xff] %v1848_v54 }
 0x515   : > { %1867 = vst [vmem:[#allocation5 + $0x48] sm:$0xff] %v1835_v52  ;;  %1881 = vst [vmem:[#allocation5 + $0xb8] sm:$0xff] %v1849_v15  ;;  %v1761_v18 = vpop.f32.mrb[10].mxu0  ;;  %v1803_v59 = vpop.f32.mrb[8].mxu1 }
 0x516   : > { %v1836_v9 = vadd.f32 %v1761_v18, %v1611_v47  ;;  %v1850_v44 = vadd.f32 %v1803_v59, %v1625_v57  ;;  %v1763_v50 = vpop.f32.mrb[11].mxu0  ;;  %v1805_v61 = vpop.f32.mrb[9].mxu1 }
 0x517   : > { %v1837_v62 = vadd.f32 %v1763_v50, %v1612_v39  ;;  %v1851_v5 = vadd.f32 %v1805_v61, %v1626_v35 }
 0x518   : > { %1868 = vst [vmem:[#allocation5 + $0x50] sm:$0xff] %v1836_v9  ;;  %1882 = vst [vmem:[#allocation5 + $0xc0] sm:$0xff] %v1850_v44 }
 0x519   : > { %1869 = vst [vmem:[#allocation5 + $0x58] sm:$0xff] %v1837_v62  ;;  %1883 = vst [vmem:[#allocation5 + $0xc8] sm:$0xff] %v1851_v5  ;;  %v1767_v20 = vpop.f32.mrb[12].mxu0  ;;  %v1809_v63 = vpop.f32.mrb[10].mxu1 }
 0x51a   : > { %v1838_v53 = vadd.f32 %v1767_v20, %v1613_v23  ;;  %v1852_v2 = vadd.f32 %v1809_v63, %v1627_v0  ;;  %v1769_v3 = vpop.f32.mrb[13].mxu0  ;;  %v1811_v34 = vpop.f32.mrb[11].mxu1 }
 0x51b   : > { %v1839_v31 = vadd.f32 %v1769_v3, %v1614_v11  ;;  %v1853_v12 = vadd.f32 %v1811_v34, %v1628_v46 }
 0x51c   : > { %1870 = vst [vmem:[#allocation5 + $0x60] sm:$0xff] %v1838_v53  ;;  %1884 = vst [vmem:[#allocation5 + $0xd0] sm:$0xff] %v1852_v2 }
 0x51d   : > { %1871 = vst [vmem:[#allocation5 + $0x68] sm:$0xff] %v1839_v31  ;;  %1885 = vst [vmem:[#allocation5 + $0xd8] sm:$0xff] %v1853_v12  ;;  %v1773_v25 = vpop.f32.mrb[14].mxu0  ;;  %v1815_v33 = vpop.f32.mrb[12].mxu1 }
 0x51e   : > { %v1840_v51 = vadd.f32 %v1773_v25, %v1615_v8  ;;  %v1854_v41 = vadd.f32 %v1815_v33, %v1629_v16  ;;  %v1775_v7 = vpop.f32.mrb[15].mxu0  ;;  %v1817_v1 = vpop.f32.mrb[13].mxu1 }
 0x51f   : > { %v1841_v14 = vadd.f32 %v1775_v7, %v1616_v60  ;;  %v1855_v38 = vadd.f32 %v1817_v1, %v1630_v4 }
 0x520   : > { %1872 = vst [vmem:[#allocation5 + $0x70] sm:$0xff] %v1840_v51  ;;  %1886 = vst [vmem:[#allocation5 + $0xe0] sm:$0xff] %v1854_v41 }
 0x521   : > { %1873 = vst [vmem:[#allocation5 + $0x78] sm:$0xff] %v1841_v14  ;;  %1887 = vst [vmem:[#allocation5 + $0xe8] sm:$0xff] %v1855_v38  ;;  %v1821_v6 = vpop.f32.mrb[14].mxu1 }
 0x522   : > { %v1856_v40 = vadd.f32 %v1821_v6, %v1631_v10  ;;  %v1823_v45 = vpop.f32.mrb[15].mxu1 }
 0x523   : > { %v1857_v26 = vadd.f32 %v1823_v45, %v1632_v19 }
 0x524   : > { %1888 = vst [vmem:[#allocation5 + $0xf0] sm:$0xff] %v1856_v40 }
 0x525   : > { %1889 = vst [vmem:[#allocation5 + $0xf8] sm:$0xff] %v1857_v26 }
 0x526 PF: > { %p1890_p1 = scmp.eq.s32.totalorder %s2812_s22, 1 }
 0x528   : > { %p1891_p2 = pnand %p1890_p1, %p1453_p13 }
 0x529   : > { %v1929_v22 = vlaneseq (!%p1891_p2)  ;;  %v1927_v17 = vld [vmem:[%s3684_s4] sm:$0x3] (!%p1891_p2)  ;;  %v1896_v42 = vld [vmem:[#allocation5 + $0x8] sm:$0xff] (!%p1891_p2)  ;;  %v1897_v56 = vld [vmem:[#allocation5 + $0x10] sm:$0xff] (!%p1891_p2) }
 0x52a   : > { %1894 = sbr.rel (%p1891_p2) target bundleno = 1347 (0x543), region = 60  ;;  %v1895_v30 = vld [vmem:[#allocation5] sm:$0xff] (!%p1891_p2)  ;;  %v1898_v55 = vld [vmem:[#allocation5 + $0x18] sm:$0xff] (!%p1891_p2)  ;;  %v1900_v13 = vld [vmem:[#allocation5 + $0x28] sm:$0xff] (!%p1891_p2) }
 0x52b   : > { %v1930_v27 = vshrl.u32 (!%p1891_p2), %v1929_v22, 7  ;;  %v1899_v48 = vld [vmem:[#allocation5 + $0x20] sm:$0xff] (!%p1891_p2)  ;;  %v1901_v24 = vld [vmem:[#allocation5 + $0x30] sm:$0xff] (!%p1891_p2)  ;;  %v1902_v49 = vld [vmem:[#allocation5 + $0x38] sm:$0xff] (!%p1891_p2) }
 0x52c   : > { %v1903_v21 = vld [vmem:[#allocation5 + $0x40] sm:$0xff] (!%p1891_p2)  ;;  %v1904_v43 = vld [vmem:[#allocation5 + $0x48] sm:$0xff] (!%p1891_p2)  ;;  %v1905_v29 = vld [vmem:[#allocation5 + $0x50] sm:$0xff] (!%p1891_p2) }
 0x52d   : > { %v1931_v36 = vsub.s32 (!%p1891_p2), 0, %v1930_v27  ;;  %v1935_v37 = vsub.s32 (!%p1891_p2), 1, %v1930_v27  ;;  %v1906_v58 = vld [vmem:[#allocation5 + $0x58] sm:$0xff] (!%p1891_p2)  ;;  %v1907_v32 = vld [vmem:[#allocation5 + $0x60] sm:$0xff] (!%p1891_p2)  ;;  %v1908_v52 = vld [vmem:[#allocation5 + $0x68] sm:$0xff] (!%p1891_p2) }
 0x52e   : > { %v1909_v15 = vld [vmem:[#allocation5 + $0x70] sm:$0xff] (!%p1891_p2)  ;;  %v1910_v47 = vld [vmem:[#allocation5 + $0x78] sm:$0xff] (!%p1891_p2)  ;;  %v1911_v57 = vld [vmem:[#allocation5 + $0x80] sm:$0xff] (!%p1891_p2) }
 0x52f   : > { %v3536_v28 = vrot.slane (!%p1891_p2), %v1927_v17, %v1931_v36  ;;  %v3538_v54 = vrot.slane (!%p1891_p2), %v1927_v17, %v1935_v37  ;;  %v1912_v9 = vld [vmem:[#allocation5 + $0x88] sm:$0xff] (!%p1891_p2)  ;;  %v1913_v44 = vld [vmem:[#allocation5 + $0x90] sm:$0xff] (!%p1891_p2)  ;;  %v1914_v50 = vld [vmem:[#allocation5 + $0x98] sm:$0xff] (!%p1891_p2) }
 0x530   : > { %v1915_v0 = vld [vmem:[#allocation5 + $0xa0] sm:$0xff] (!%p1891_p2)  ;;  %v1916_v11 = vld [vmem:[#allocation5 + $0xa8] sm:$0xff] (!%p1891_p2)  ;;  %v1917_v46 = vld [vmem:[#allocation5 + $0xb0] sm:$0xff] (!%p1891_p2) }
 0x531   : > { %v1939_v39 = vadd.f32 %v3536_v28, %v1895_v30  ;;  %v1940_v35 = vadd.f32 %v3538_v54, %v1896_v42  ;;  %v1941_v18 = vadd.f32 %v3536_v28, %v1897_v56  ;;  %v1942_v59 = vadd.f32 %v3538_v54, %v1898_v55  ;;  %v1918_v3 = vld [vmem:[#allocation5 + $0xb8] sm:$0xff]  ;;  %v1919_v34 = vld [vmem:[#allocation5 + $0xc0] sm:$0xff]  ;;  %v1920_v31 = vld [vmem:[#allocation5 + $0xc8] sm:$0xff] }
 0x532   : > { %v1943_v61 = vadd.f32 %v3536_v28, %v1899_v48  ;;  %v1944_v62 = vadd.f32 %v3538_v54, %v1900_v13  ;;  %v1945_v5 = vadd.f32 %v3536_v28, %v1901_v24  ;;  %v1946_v23 = vadd.f32 %v3538_v54, %v1902_v49  ;;  %v1921_v4 = vld [vmem:[#allocation5 + $0xd0] sm:$0xff]  ;;  %v1922_v25 = vld [vmem:[#allocation5 + $0xd8] sm:$0xff]  ;;  %v1923_v33 = vld [vmem:[#allocation5 + $0xe0] sm:$0xff] }
 0x533   : > { %1971 = vst [vmem:[%s3018_s27] sm:$0xff] %v1939_v39  ;;  %1972 = vst [vmem:[%s3018_s27 + $0x8] sm:$0xff] %v1940_v35  ;;  %v1947_v20 = vadd.f32 %v3536_v28, %v1903_v21  ;;  %v1948_v63 = vadd.f32 %v3538_v54, %v1904_v43  ;;  %v1949_v53 = vadd.f32 %v3536_v28, %v1905_v29  ;;  %v1924_v14 = vld [vmem:[#allocation5 + $0xe8] sm:$0xff]  ;;  %v1925_v38 = vld [vmem:[#allocation5 + $0xf0] sm:$0xff] }
 0x534   : > { %1973 = vst [vmem:[%s3018_s27 + $0x10] sm:$0xff] %v1941_v18  ;;  %1974 = vst [vmem:[%s3018_s27 + $0x18] sm:$0xff] %v1942_v59  ;;  %v1950_v2 = vadd.f32 %v3538_v54, %v1906_v58  ;;  %v1951_v12 = vadd.f32 %v3536_v28, %v1907_v32  ;;  %v1952_v8 = vadd.f32 %v3538_v54, %v1908_v52  ;;  %v1926_v10 = vld [vmem:[#allocation5 + $0xf8] sm:$0xff] }
 0x535   : > { %1975 = vst [vmem:[%s3018_s27 + $0x20] sm:$0xff] %v1943_v61  ;;  %1976 = vst [vmem:[%s3018_s27 + $0x28] sm:$0xff] %v1944_v62  ;;  %v1953_v16 = vadd.f32 %v3536_v28, %v1909_v15  ;;  %v1954_v60 = vadd.f32 %v3538_v54, %v1910_v47  ;;  %v1955_v51 = vadd.f32 %v3536_v28, %v1911_v57 }
 0x536   : > { %1977 = vst [vmem:[%s3018_s27 + $0x30] sm:$0xff] %v1945_v5  ;;  %1978 = vst [vmem:[%s3018_s27 + $0x38] sm:$0xff] %v1946_v23  ;;  %v1956_v41 = vadd.f32 %v3538_v54, %v1912_v9  ;;  %v1957_v7 = vadd.f32 %v3536_v28, %v1913_v44  ;;  %v1958_v1 = vadd.f32 %v3538_v54, %v1914_v50 }
 0x537   : > { %1979 = vst [vmem:[%s3018_s27 + $0x40] sm:$0xff] %v1947_v20  ;;  %1980 = vst [vmem:[%s3018_s27 + $0x48] sm:$0xff] %v1948_v63  ;;  %v1959_v19 = vadd.f32 %v3536_v28, %v1915_v0  ;;  %v1960_v6 = vadd.f32 %v3538_v54, %v1916_v11  ;;  %v1961_v40 = vadd.f32 %v3536_v28, %v1917_v46 }
 0x538   : > { %1981 = vst [vmem:[%s3018_s27 + $0x50] sm:$0xff] %v1949_v53  ;;  %1982 = vst [vmem:[%s3018_s27 + $0x58] sm:$0xff] %v1950_v2  ;;  %v1962_v45 = vadd.f32 %v3538_v54, %v1918_v3  ;;  %v1963_v26 = vadd.f32 %v3536_v28, %v1919_v34  ;;  %v1964_v22 = vadd.f32 %v3538_v54, %v1920_v31 }
 0x539   : > { %1983 = vst [vmem:[%s3018_s27 + $0x60] sm:$0xff] %v1951_v12  ;;  %1984 = vst [vmem:[%s3018_s27 + $0x68] sm:$0xff] %v1952_v8  ;;  %v1965_v17 = vadd.f32 %v3536_v28, %v1921_v4  ;;  %v1966_v27 = vadd.f32 %v3538_v54, %v1922_v25  ;;  %v1967_v30 = vadd.f32 %v3536_v28, %v1923_v33 }
 0x53a   : > { %1985 = vst [vmem:[%s3018_s27 + $0x70] sm:$0xff] %v1953_v16  ;;  %1986 = vst [vmem:[%s3018_s27 + $0x78] sm:$0xff] %v1954_v60  ;;  %v1968_v42 = vadd.f32 %v3538_v54, %v1924_v14  ;;  %v1969_v56 = vadd.f32 %v3536_v28, %v1925_v38  ;;  %v1970_v55 = vadd.f32 %v3538_v54, %v1926_v10 }
 0x53b   : > { %1987 = vst [vmem:[%s3018_s27 + $0x80] sm:$0xff] %v1955_v51  ;;  %1988 = vst [vmem:[%s3018_s27 + $0x88] sm:$0xff] %v1956_v41 }
 0x53c   : > { %1989 = vst [vmem:[%s3018_s27 + $0x90] sm:$0xff] %v1957_v7  ;;  %1990 = vst [vmem:[%s3018_s27 + $0x98] sm:$0xff] %v1958_v1 }
 0x53d   : > { %1991 = vst [vmem:[%s3018_s27 + $0xa0] sm:$0xff] %v1959_v19  ;;  %1992 = vst [vmem:[%s3018_s27 + $0xa8] sm:$0xff] %v1960_v6 }
 0x53e   : > { %1993 = vst [vmem:[%s3018_s27 + $0xb0] sm:$0xff] %v1961_v40  ;;  %1994 = vst [vmem:[%s3018_s27 + $0xb8] sm:$0xff] %v1962_v45 }
 0x53f   : > { %1995 = vst [vmem:[%s3018_s27 + $0xc0] sm:$0xff] %v1963_v26  ;;  %1996 = vst [vmem:[%s3018_s27 + $0xc8] sm:$0xff] %v1964_v22 }
 0x540   : > { %1997 = vst [vmem:[%s3018_s27 + $0xd0] sm:$0xff] %v1965_v17  ;;  %1998 = vst [vmem:[%s3018_s27 + $0xd8] sm:$0xff] %v1966_v27 }
 0x541   : > { %1999 = vst [vmem:[%s3018_s27 + $0xe0] sm:$0xff] %v1967_v30  ;;  %2000 = vst [vmem:[%s3018_s27 + $0xe8] sm:$0xff] %v1968_v42 }
 0x542   : > { %2001 = vst [vmem:[%s3018_s27 + $0xf0] sm:$0xff] %v1969_v56  ;;  %2002 = vst [vmem:[%s3018_s27 + $0xf8] sm:$0xff] %v1970_v55 }
 0x543 PF: > { %s2214_s21 = sshll.u32 %s2816_s23, 5  ;;  %s2209_s22 = sshll.u32 %s2820_s24, 6 }
 0x544   : > { %s2020_s12 = sshll.u32 %s3018_s27, 4  ;;  %s2017_s17 = sadd.s32 %s2214_s21, %s2209_s22  ;;  %s3607_s12 = int_to_ptr.vmem [resolvable:$true] %s2020_s12 }
 0x545   : > { %s2210_s13 = sshll.u32 %s2017_s17, 7  ;;  %s3713_s6 = sand.u32 1, %s2800_s19  }
 0x546   : > { %s3612_s15 = scalar_lea.hbm %s3685_s5, %s2210_s13  ;;  %s3616_s8 = scalar_lea.sflag [#allocation7], %s3713_s6 }
 0x547   : > { %s2714_s9 = scalar_lea.vmem %s3607_s12, 4096  ;;  %s2848_s23 = smov [#allocation6]  }
 0x548   : > { %p2715_p3 = scmp.ne.s32.totalorder %s3607_s12, %s2714_s9  ;;  %s2718_s24 = sshll.u32 %s2848_s23, 4  ;;  %s2719_s24 = int_to_ptr.vmem [resolvable:$false] %s2718_s24 }
 0x549   : > { %s2720_s28 = scalar_lea.vmem %s2719_s24, 8192  ;;  %p2721_p8 = scmp.lt.s32.totalorder %s3607_s12, %s2719_s24 }
 0x54a   : > { %p2716_p4 = pnand %p2715_p3, %p2954_p5  ;;  %p2722_p9 = scmp.lt.s32.totalorder %s2720_s28, %s2714_s9 }
 0x54c   : > { %p2717_p6 = pneg %p2716_p4  ;;  %p2723_p10 = por %p2722_p9, %p2721_p8 }
 0x54e   : > { %p2724_p11 = pnand %p2723_p10, %p2717_p6 }
 0x550   : > { %2727 = shalt.err (!%p2724_p11)
}
 0x551   : > { %s2728_s25 = scalar_lea.hbm %s3612_s15, 4096  ;;  %s2732_s27 = scalar_lea.hbm %s3685_s5, 16384 }
 0x552   : > { %p2729_p12 = scmp.ne.s32.totalorder %s3612_s15, %s2728_s25  ;;  %p2733_p1 = scmp.lt.u32.totalorder %s3612_s15, %s3685_s5 }
 0x553   : > { %p2734_p2 = scmp.lt.u32.totalorder %s2732_s27, %s2728_s25  ;;  %p2736_p4 = scmp.lt.u32.totalorder %s2728_s25, %s3612_s15 }
 0x554   : > { %p2730_p13 = pnand %p2729_p12, %p2954_p5 }
 0x555   : > { %p2735_p3 = por %p2734_p2, %p2733_p1 }
 0x556   : > { %p2731_p0 = pneg %p2730_p13 }
 0x557   : > { %p2737_p6 = por %p2736_p4, %p2735_p3 }
 0x559   : > { %p2738_p8 = pnand %p2737_p6, %p2731_p0 }
 0x55b   : > { %2741 = shalt.err (!%p2738_p8)
}
 0x55c   : > { %s2849_s7 = smov 256   ;;  %s2850_s29 = smov 16  }
 0x55d   : > { %2503 = dma.vmem_to_hbm [thread:$0]  (%p2954_p5), %s3607_s12, 4096, %s3612_s15, %s3616_s8, %s2849_s7, %s2849_s7, %s2850_s29  }
 0x55e PF: > { %s3714_s10 = sld [smem:[#allocation15_spill]]  ;;  %s3715_s21 = sld [smem:[#allocation9_spill]] }
 0x564   : > { %p2509_p9 = scmp.ge.s32.totalorder %s3714_s10, 2  ;;  %s2035_s17 = sand.u32 1, %s3715_s21  }
 0x565   : > { %s2036_s13 = scalar_lea.sflag [#allocation7], %s2035_s17 }
 0x566   : > { %p2506_p10 = pnand %p2509_p9, %p2961_p7 }
 0x568   : > { %2791 = dma.done.wait (!%p2506_p10), %s2036_s13, 4096  }
 0x569   : > { %2793 = vsyncadd (!%p2506_p10), %s2036_s13, 4294963200  ;;  %s18_s29 = sadd.s32 1, %s3714_s10   ;;  %s3717_s16 = sld [smem:[#allocation10_spill]] }
 0x56a   : > { %p15_p11 = scmp.ge.s32.totalorder %s18_s29, 18   ;;  %s3718_s20 = sld [smem:[#allocation21_spill]] }
 0x56b   : > { %s3719_s21 = sld [smem:[#allocation11_spill]]  ;;  %s3720_s22 = sld [smem:[#allocation12_spill]] }
 0x56c   : > { %s3721_s23 = sld [smem:[#allocation13_spill]]  ;;  %s3722_s24 = sld [smem:[#allocation14_spill]] }
 0x56d   : > { %s3723_s25 = sld [smem:[#allocation16_spill]]  ;;  %s3724_s26 = sld [smem:[#allocation17_spill]] }
 0x56e   : > { %s3725_s27 = sld [smem:[#allocation19_spill]]  ;;  %s3726_s28 = sld [smem:[#allocation20_spill]] }
 0x56f   : > { %s3727_s18 = smov %s2800_s19  ;;  %s3728_s19 = smov %s3717_s16 }
 0x570   :  { %17 = sbr.rel (!%p15_p11) target bundleno = 7 (0x7), region = 104 }
 0x577   :  { %2041 = vsyncpa [#allocation7], 1 }
 0x578   :  { %2043 = vsyncpa [#allocation7 + $0x1], 1 }

</bundles_post_ra>
